<compile_context>
chip_gen: v7x
topology: tpu7x:2x2x1
jax: 0.10.0
libtpu: 0.0.40
codegen_flags: <defaults>
</compile_context>

<pallas_src>
import functools
import math

import jax
import jax.numpy as jnp
from jax.experimental import pallas as pl
from jax.experimental.pallas import tpu as pltpu

VMEM_SPEC = pl.BlockSpec(memory_space=pltpu.MemorySpace.VMEM)
LN_EPS = 1e-5
BN_EPS = 1e-5


# ----------------------------------------------------------------------------
# Fused forward kernel
# ----------------------------------------------------------------------------
def _simsdf_fused_kernel(*refs, num_heads, num_layers, n_valid):
    out_ref = refs[-1]
    it = iter(refs[:-1])

    x = next(it)[...]                      # (Np, 3) f32 query points
    n_pad = x.shape[0]

    # ---- lifting layer 0: K=3 contraction done on the VPU (3-term FMA),
    #      eval-mode BatchNorm folded into scale/shift, ReLU.
    w0 = next(it)[...]                     # (3, D/4)
    ss0 = next(it)[...]                    # (2, D/4) = [scale; shift]
    h = (x[:, 0:1] * w0[0:1, :]
         + x[:, 1:2] * w0[1:2, :]
         + x[:, 2:3] * w0[2:3, :])
    h = jnp.maximum(h * ss0[0:1, :] + ss0[1:2, :], 0.0)

    # ---- lifting layers 1, 2: MXU matmul + folded BN + ReLU
    for _ in range(2):
        w = next(it)[...]                  # (ic, oc)
        ss = next(it)[...]                 # (2, oc)
        h = jnp.dot(h, w, preferred_element_type=jnp.float32)
        h = jnp.maximum(h * ss[0:1, :] + ss[1:2, :], 0.0)

    d = h.shape[-1]
    inv_d = 1.0 / d
    H = num_heads

    def layer_norm(z, g, b):
        # single-pass mean / variance (one sum + one sum-of-squares reduction)
        s1 = jnp.sum(z, axis=-1, keepdims=True)
        s2 = jnp.sum(z * z, axis=-1, keepdims=True)
        mu = s1 * inv_d
        var = s2 * inv_d - mu * mu
        return (z - mu) * jax.lax.rsqrt(var + LN_EPS) * g + b

    # key-padding mask (static decision; only built when rows were padded)
    if n_pad > n_valid:
        kidx = jax.lax.broadcasted_iota(jnp.int32, (1, 1, n_pad), 2)
        key_bias = jnp.where(kidx < n_valid, 0.0, -1e30).astype(jnp.float32)
    else:
        key_bias = None

    # dot_general dimension numbers (head axis is the batch axis everywhere)
    dn_proj = (((2,), (1,)), ((0,), (0,)))   # (H,N,D) x (H,D,dh) -> (H,N,dh)
    dn_qk = (((2,), (2,)), ((0,), (0,)))     # (H,N,dh) x (H,N,dh) -> (H,N,N)
    dn_pv = (((2,), (1,)), ((0,), (0,)))     # (H,N,N) x (H,N,dh) -> (H,N,dh)

    for _ in range(num_layers):
        wq = next(it)[...]                  # (H, D, dh)  (1/sqrt(dh) folded in)
        wk = next(it)[...]                  # (H, D, dh)
        wv = next(it)[...]                  # (H, D, dh)
        bqkv = next(it)[...]                # (H, 3, dh)  q(scaled)/k/v biases
        wo = next(it)[...]                  # (H, dh, D)
        w1 = next(it)[...]                  # (D, D)
        w2 = next(it)[...]                  # (D, D)
        vecs = next(it)[...]                # (7, D): bo, ln1_g, ln1_b, b1, b2, ln2_g, ln2_b

        # ---- multi-head self attention (head axis batched, no slicing/concat)
        xb = jnp.broadcast_to(h[None, :, :], (H, n_pad, d))
        q3 = jax.lax.dot_general(xb, wq, dn_proj,
                                 preferred_element_type=jnp.float32) + bqkv[:, 0:1, :]
        k3 = jax.lax.dot_general(xb, wk, dn_proj,
                                 preferred_element_type=jnp.float32) + bqkv[:, 1:2, :]
        v3 = jax.lax.dot_general(xb, wv, dn_proj,
                                 preferred_element_type=jnp.float32) + bqkv[:, 2:3, :]

        s = jax.lax.dot_general(q3, k3, dn_qk,
                                preferred_element_type=jnp.float32)     # (H,N,N)
        if key_bias is not None:
            s = s + key_bias
        m = jnp.max(s, axis=-1, keepdims=True)
        p = jnp.exp(s - m)
        denom = jnp.sum(p, axis=-1, keepdims=True)
        p = p * pl.reciprocal(denom, approx=True)

        o3 = jax.lax.dot_general(p, v3, dn_pv,
                                 preferred_element_type=jnp.float32)    # (H,N,dh)
        y3 = jax.lax.dot_general(o3, wo, dn_pv,
                                 preferred_element_type=jnp.float32)    # (H,N,D)
        y = jnp.sum(y3, axis=0) + vecs[0:1, :]          # out-proj (sum over heads) + bias
        # TODO(synk): dropout omitted (eval-mode identity).

        z = layer_norm(h + y, vecs[1:2, :], vecs[2:3, :])               # post-norm 1

        # ---- feed-forward (dim_feedforward == D) + residual + LayerNorm
        f = jnp.maximum(jnp.dot(z, w1, preferred_element_type=jnp.float32)
                        + vecs[3:4, :], 0.0)
        f = jnp.dot(f, w2, preferred_element_type=jnp.float32) + vecs[4:5, :]
        h = layer_norm(z + f, vecs[5:6, :], vecs[6:7, :])               # post-norm 2

    # ---- decoder Linear(D, 1): row-wise multiply + lane reduction (epilogue)
    dec_w = next(it)[...]                   # (1, D)
    dec_b = next(it)[...]                   # (1, 1)
    out_ref[...] = jnp.sum(h * dec_w, axis=-1, keepdims=True) + dec_b


# ----------------------------------------------------------------------------
# Wrapper
# ----------------------------------------------------------------------------
def sim_sdf_forward(packed, sdf_q, *, num_heads, num_layers):
    n = sdf_q.shape[0]
    n_pad = max(8, ((n + 7) // 8) * 8)
    x = sdf_q
    if n_pad != n:
        x = jnp.pad(sdf_q, ((0, n_pad - n), (0, 0)))

    flat_inputs = [x] + list(packed)
    kernel = functools.partial(_simsdf_fused_kernel,
                               num_heads=num_heads,
                               num_layers=num_layers,
                               n_valid=n)
    out = pl.pallas_call(
        kernel,
        in_specs=[VMEM_SPEC] * len(flat_inputs),
        out_specs=VMEM_SPEC,
        out_shape=jax.ShapeDtypeStruct((n_pad, 1), jnp.float32),
        compiler_params=pltpu.CompilerParams(vmem_limit_bytes=32 * 1024 * 1024),
    )(*flat_inputs)
    return out[:n, 0]                        # squeeze(-1) -> (N,)


# ----------------------------------------------------------------------------
# Synthetic parameters in PyTorch layout, then packed into kernel layout
# ----------------------------------------------------------------------------
def init_params(key, D, num_layers=4):
    """Synthetic params stored in PyTorch layout (Linear.weight = (out, in))."""
    keys = iter(jax.random.split(key, 128))

    def nrm(shape, sd=0.1):
        return sd * jax.random.normal(next(keys), shape, jnp.float32)

    lifting = []
    for ic, oc in [(3, D // 4), (D // 4, D // 2), (D // 2, D)]:
        w = nrm((oc, ic), 1.0 / math.sqrt(ic))
        gamma = 1.0 + nrm((oc,))
        beta = nrm((oc,))
        mean = nrm((oc,))
        var = 1.0 + 0.1 * jnp.abs(nrm((oc,)))
        lifting.append((w, gamma, beta, mean, var))

    layers = []
    for _ in range(num_layers):
        layers.append(dict(
            in_proj_weight=nrm((3 * D, D), 1.0 / math.sqrt(D)),
            in_proj_bias=nrm((3 * D,)),
            out_proj_weight=nrm((D, D), 1.0 / math.sqrt(D)),
            out_proj_bias=nrm((D,)),
            norm1_weight=1.0 + nrm((D,)),
            norm1_bias=nrm((D,)),
            linear1_weight=nrm((D, D), 1.0 / math.sqrt(D)),   # dim_feedforward = D
            linear1_bias=nrm((D,)),
            linear2_weight=nrm((D, D), 1.0 / math.sqrt(D)),
            linear2_bias=nrm((D,)),
            norm2_weight=1.0 + nrm((D,)),
            norm2_bias=nrm((D,)),
        ))

    return dict(lifting=lifting, transformer=layers,
                dec_weight=nrm((1, D), 1.0 / math.sqrt(D)),
                dec_bias=nrm((1,)))


def pack_params(params, D, num_heads):
    """Transpose weights, fold eval-mode BN, fold 1/sqrt(dh) into Q, rearrange
    attention weights head-major, and concatenate tiny per-layer vectors."""
    H = num_heads
    dh = D // H
    scale = 1.0 / math.sqrt(dh)
    packed = []

    for w, gamma, beta, mean, var in params["lifting"]:
        bn_scale = gamma / jnp.sqrt(var + BN_EPS)
        bn_shift = beta - mean * bn_scale
        packed.append(jnp.transpose(w))                       # (ic, oc)
        packed.append(jnp.stack([bn_scale, bn_shift], axis=0))  # (2, oc)

    def to_heads(w_t):    # (D, D) -> (H, D, dh): head h gets output cols h*dh:(h+1)*dh
        return jnp.transpose(w_t.reshape(D, H, dh), (1, 0, 2))

    for layer in params["transformer"]:
        win = layer["in_proj_weight"]                         # (3D, D)
        bin_ = layer["in_proj_bias"]                          # (3D,)
        packed.append(to_heads(jnp.transpose(win[0:D]) * scale))   # wq (scaled)
        packed.append(to_heads(jnp.transpose(win[D:2 * D])))       # wk
        packed.append(to_heads(jnp.transpose(win[2 * D:3 * D])))   # wv
        bq = (bin_[0:D] * scale).reshape(H, dh)
        bk = bin_[D:2 * D].reshape(H, dh)
        bv = bin_[2 * D:3 * D].reshape(H, dh)
        packed.append(jnp.stack([bq, bk, bv], axis=1))        # (H, 3, dh)
        packed.append(jnp.transpose(layer["out_proj_weight"]).reshape(H, dh, D))
        packed.append(jnp.transpose(layer["linear1_weight"]))
        packed.append(jnp.transpose(layer["linear2_weight"]))
        packed.append(jnp.stack([layer["out_proj_bias"],
                                 layer["norm1_weight"], layer["norm1_bias"],
                                 layer["linear1_bias"], layer["linear2_bias"],
                                 layer["norm2_weight"], layer["norm2_bias"]],
                                axis=0))                      # (7, D)

    packed.append(params["dec_weight"].reshape(1, D))
    packed.append(params["dec_bias"].reshape(1, 1))
    return packed


# ----------------------------------------------------------------------------
if __name__ == "__main__":
    D = 32                      # d_model; nhead=8 -> head_dim=4
    N = 8                       # number of query points / sequence length
    NUM_HEADS = 8
    NUM_LAYERS = 4

    key = jax.random.PRNGKey(0)
    pkey, xkey = jax.random.split(key)
    params = init_params(pkey, D, num_layers=NUM_LAYERS)
    packed = pack_params(params, D, NUM_HEADS)
    sdf_q = jax.random.normal(xkey, (N, 3), jnp.float32)

    fwd = jax.jit(functools.partial(sim_sdf_forward,
                                    num_heads=NUM_HEADS, num_layers=NUM_LAYERS))
    out = fwd(packed, sdf_q)
    out = jax.block_until_ready(out)

    assert out.shape == (N,), out.shape
    assert bool(jnp.all(jnp.isfinite(out)))
    print("KERNEL_OK")
</pallas_src>

<mosaic_0001>
module attributes {stable_mosaic.version = 11 : i64} {
  func.func @_simsdf_fused_kernel(%arg0: memref<8x3xf32, #tpu.memory_space<vmem>>, %arg1: memref<3x8xf32, #tpu.memory_space<vmem>>, %arg2: memref<2x8xf32, #tpu.memory_space<vmem>>, %arg3: memref<8x16xf32, #tpu.memory_space<vmem>>, %arg4: memref<2x16xf32, #tpu.memory_space<vmem>>, %arg5: memref<16x32xf32, #tpu.memory_space<vmem>>, %arg6: memref<2x32xf32, #tpu.memory_space<vmem>>, %arg7: memref<8x32x4xf32, #tpu.memory_space<vmem>>, %arg8: memref<8x32x4xf32, #tpu.memory_space<vmem>>, %arg9: memref<8x32x4xf32, #tpu.memory_space<vmem>>, %arg10: memref<8x3x4xf32, #tpu.memory_space<vmem>>, %arg11: memref<8x4x32xf32, #tpu.memory_space<vmem>>, %arg12: memref<32x32xf32, #tpu.memory_space<vmem>>, %arg13: memref<32x32xf32, #tpu.memory_space<vmem>>, %arg14: memref<7x32xf32, #tpu.memory_space<vmem>>, %arg15: memref<8x32x4xf32, #tpu.memory_space<vmem>>, %arg16: memref<8x32x4xf32, #tpu.memory_space<vmem>>, %arg17: memref<8x32x4xf32, #tpu.memory_space<vmem>>, %arg18: memref<8x3x4xf32, #tpu.memory_space<vmem>>, %arg19: memref<8x4x32xf32, #tpu.memory_space<vmem>>, %arg20: memref<32x32xf32, #tpu.memory_space<vmem>>, %arg21: memref<32x32xf32, #tpu.memory_space<vmem>>, %arg22: memref<7x32xf32, #tpu.memory_space<vmem>>, %arg23: memref<8x32x4xf32, #tpu.memory_space<vmem>>, %arg24: memref<8x32x4xf32, #tpu.memory_space<vmem>>, %arg25: memref<8x32x4xf32, #tpu.memory_space<vmem>>, %arg26: memref<8x3x4xf32, #tpu.memory_space<vmem>>, %arg27: memref<8x4x32xf32, #tpu.memory_space<vmem>>, %arg28: memref<32x32xf32, #tpu.memory_space<vmem>>, %arg29: memref<32x32xf32, #tpu.memory_space<vmem>>, %arg30: memref<7x32xf32, #tpu.memory_space<vmem>>, %arg31: memref<8x32x4xf32, #tpu.memory_space<vmem>>, %arg32: memref<8x32x4xf32, #tpu.memory_space<vmem>>, %arg33: memref<8x32x4xf32, #tpu.memory_space<vmem>>, %arg34: memref<8x3x4xf32, #tpu.memory_space<vmem>>, %arg35: memref<8x4x32xf32, #tpu.memory_space<vmem>>, %arg36: memref<32x32xf32, #tpu.memory_space<vmem>>, %arg37: memref<32x32xf32, #tpu.memory_space<vmem>>, %arg38: memref<7x32xf32, #tpu.memory_space<vmem>>, %arg39: memref<1x32xf32, #tpu.memory_space<vmem>>, %arg40: memref<1x1xf32, #tpu.memory_space<vmem>>, %arg41: memref<8x1xf32, #tpu.memory_space<vmem>>) attributes {dimension_semantics = [], scalar_prefetch = 0 : i64, scratch_operands = 0 : i64, tpu.core_type = #tpu.core_type<tc>} {
    %c0 = arith.constant 0 : index
    %c0_0 = arith.constant 0 : index
    %0 = vector.load %arg0[%c0, %c0_0] : memref<8x3xf32, #tpu.memory_space<vmem>>, vector<8x3xf32>
    %c0_1 = arith.constant 0 : index
    %c0_2 = arith.constant 0 : index
    %1 = vector.load %arg1[%c0_1, %c0_2] : memref<3x8xf32, #tpu.memory_space<vmem>>, vector<3x8xf32>
    %c0_3 = arith.constant 0 : index
    %c0_4 = arith.constant 0 : index
    %2 = vector.load %arg2[%c0_3, %c0_4] : memref<2x8xf32, #tpu.memory_space<vmem>>, vector<2x8xf32>
    %3 = vector.extract_strided_slice %0 {offsets = [0, 0], sizes = [8, 1], strides = [1, 1]} : vector<8x3xf32> to vector<8x1xf32>
    %4 = vector.extract_strided_slice %1 {offsets = [0, 0], sizes = [1, 8], strides = [1, 1]} : vector<3x8xf32> to vector<1x8xf32>
    %5 = vector.broadcast %3 : vector<8x1xf32> to vector<8x8xf32>
    %6 = vector.broadcast %4 : vector<1x8xf32> to vector<8x8xf32>
    %7 = arith.mulf %5, %6 : vector<8x8xf32>
    %8 = vector.extract_strided_slice %0 {offsets = [0, 1], sizes = [8, 1], strides = [1, 1]} : vector<8x3xf32> to vector<8x1xf32>
    %9 = vector.extract_strided_slice %1 {offsets = [1, 0], sizes = [1, 8], strides = [1, 1]} : vector<3x8xf32> to vector<1x8xf32>
    %10 = vector.broadcast %8 : vector<8x1xf32> to vector<8x8xf32>
    %11 = vector.broadcast %9 : vector<1x8xf32> to vector<8x8xf32>
    %12 = arith.mulf %10, %11 : vector<8x8xf32>
    %13 = arith.addf %7, %12 : vector<8x8xf32>
    %14 = vector.extract_strided_slice %0 {offsets = [0, 2], sizes = [8, 1], strides = [1, 1]} : vector<8x3xf32> to vector<8x1xf32>
    %15 = vector.extract_strided_slice %1 {offsets = [2, 0], sizes = [1, 8], strides = [1, 1]} : vector<3x8xf32> to vector<1x8xf32>
    %16 = vector.broadcast %14 : vector<8x1xf32> to vector<8x8xf32>
    %17 = vector.broadcast %15 : vector<1x8xf32> to vector<8x8xf32>
    %18 = arith.mulf %16, %17 : vector<8x8xf32>
    %19 = arith.addf %13, %18 : vector<8x8xf32>
    %20 = vector.extract_strided_slice %2 {offsets = [0, 0], sizes = [1, 8], strides = [1, 1]} : vector<2x8xf32> to vector<1x8xf32>
    %21 = vector.broadcast %20 : vector<1x8xf32> to vector<8x8xf32>
    %22 = arith.mulf %19, %21 : vector<8x8xf32>
    %23 = vector.extract_strided_slice %2 {offsets = [1, 0], sizes = [1, 8], strides = [1, 1]} : vector<2x8xf32> to vector<1x8xf32>
    %24 = vector.broadcast %23 : vector<1x8xf32> to vector<8x8xf32>
    %25 = arith.addf %22, %24 : vector<8x8xf32>
    %cst = arith.constant 0.000000e+00 : f32
    %26 = vector.broadcast %cst : f32 to vector<8x8xf32>
    %27 = arith.maximumf %25, %26 : vector<8x8xf32>
    %c0_5 = arith.constant 0 : index
    %c0_6 = arith.constant 0 : index
    %28 = vector.load %arg3[%c0_5, %c0_6] : memref<8x16xf32, #tpu.memory_space<vmem>>, vector<8x16xf32>
    %c0_7 = arith.constant 0 : index
    %c0_8 = arith.constant 0 : index
    %29 = vector.load %arg4[%c0_7, %c0_8] : memref<2x16xf32, #tpu.memory_space<vmem>>, vector<2x16xf32>
    %cst_9 = arith.constant dense<0.000000e+00> : vector<8x16xf32>
    %30 = tpu.matmul %27, %28, %cst_9 {dimension_numbers = #tpu.dot_dimension_numbers<[1], [0], [0], [1], [0, 0, 1, 1], [], []>} : vector<8x8xf32>, vector<8x16xf32>, vector<8x16xf32> -> vector<8x16xf32>
    %31 = vector.extract_strided_slice %29 {offsets = [0, 0], sizes = [1, 16], strides = [1, 1]} : vector<2x16xf32> to vector<1x16xf32>
    %32 = vector.broadcast %31 : vector<1x16xf32> to vector<8x16xf32>
    %33 = arith.mulf %30, %32 : vector<8x16xf32>
    %34 = vector.extract_strided_slice %29 {offsets = [1, 0], sizes = [1, 16], strides = [1, 1]} : vector<2x16xf32> to vector<1x16xf32>
    %35 = vector.broadcast %34 : vector<1x16xf32> to vector<8x16xf32>
    %36 = arith.addf %33, %35 : vector<8x16xf32>
    %cst_10 = arith.constant 0.000000e+00 : f32
    %37 = vector.broadcast %cst_10 : f32 to vector<8x16xf32>
    %38 = arith.maximumf %36, %37 : vector<8x16xf32>
    %c0_11 = arith.constant 0 : index
    %c0_12 = arith.constant 0 : index
    %39 = vector.load %arg5[%c0_11, %c0_12] : memref<16x32xf32, #tpu.memory_space<vmem>>, vector<16x32xf32>
    %c0_13 = arith.constant 0 : index
    %c0_14 = arith.constant 0 : index
    %40 = vector.load %arg6[%c0_13, %c0_14] : memref<2x32xf32, #tpu.memory_space<vmem>>, vector<2x32xf32>
    %cst_15 = arith.constant dense<0.000000e+00> : vector<8x32xf32>
    %41 = tpu.matmul %38, %39, %cst_15 {dimension_numbers = #tpu.dot_dimension_numbers<[1], [0], [0], [1], [0, 0, 1, 1], [], []>} : vector<8x16xf32>, vector<16x32xf32>, vector<8x32xf32> -> vector<8x32xf32>
    %42 = vector.extract_strided_slice %40 {offsets = [0, 0], sizes = [1, 32], strides = [1, 1]} : vector<2x32xf32> to vector<1x32xf32>
    %43 = vector.broadcast %42 : vector<1x32xf32> to vector<8x32xf32>
    %44 = arith.mulf %41, %43 : vector<8x32xf32>
    %45 = vector.extract_strided_slice %40 {offsets = [1, 0], sizes = [1, 32], strides = [1, 1]} : vector<2x32xf32> to vector<1x32xf32>
    %46 = vector.broadcast %45 : vector<1x32xf32> to vector<8x32xf32>
    %47 = arith.addf %44, %46 : vector<8x32xf32>
    %cst_16 = arith.constant 0.000000e+00 : f32
    %48 = vector.broadcast %cst_16 : f32 to vector<8x32xf32>
    %49 = arith.maximumf %47, %48 : vector<8x32xf32>
    %c0_17 = arith.constant 0 : index
    %c0_18 = arith.constant 0 : index
    %c0_19 = arith.constant 0 : index
    %50 = vector.load %arg7[%c0_17, %c0_18, %c0_19] : memref<8x32x4xf32, #tpu.memory_space<vmem>>, vector<8x32x4xf32>
    %c0_20 = arith.constant 0 : index
    %c0_21 = arith.constant 0 : index
    %c0_22 = arith.constant 0 : index
    %51 = vector.load %arg8[%c0_20, %c0_21, %c0_22] : memref<8x32x4xf32, #tpu.memory_space<vmem>>, vector<8x32x4xf32>
    %c0_23 = arith.constant 0 : index
    %c0_24 = arith.constant 0 : index
    %c0_25 = arith.constant 0 : index
    %52 = vector.load %arg9[%c0_23, %c0_24, %c0_25] : memref<8x32x4xf32, #tpu.memory_space<vmem>>, vector<8x32x4xf32>
    %c0_26 = arith.constant 0 : index
    %c0_27 = arith.constant 0 : index
    %c0_28 = arith.constant 0 : index
    %53 = vector.load %arg10[%c0_26, %c0_27, %c0_28] : memref<8x3x4xf32, #tpu.memory_space<vmem>>, vector<8x3x4xf32>
    %c0_29 = arith.constant 0 : index
    %c0_30 = arith.constant 0 : index
    %c0_31 = arith.constant 0 : index
    %54 = vector.load %arg11[%c0_29, %c0_30, %c0_31] : memref<8x4x32xf32, #tpu.memory_space<vmem>>, vector<8x4x32xf32>
    %c0_32 = arith.constant 0 : index
    %c0_33 = arith.constant 0 : index
    %55 = vector.load %arg12[%c0_32, %c0_33] : memref<32x32xf32, #tpu.memory_space<vmem>>, vector<32x32xf32>
    %c0_34 = arith.constant 0 : index
    %c0_35 = arith.constant 0 : index
    %56 = vector.load %arg13[%c0_34, %c0_35] : memref<32x32xf32, #tpu.memory_space<vmem>>, vector<32x32xf32>
    %c0_36 = arith.constant 0 : index
    %c0_37 = arith.constant 0 : index
    %57 = vector.load %arg14[%c0_36, %c0_37] : memref<7x32xf32, #tpu.memory_space<vmem>>, vector<7x32xf32>
    %58 = vector.shape_cast %49 : vector<8x32xf32> to vector<1x8x32xf32>
    %59 = vector.shape_cast %58 : vector<1x8x32xf32> to vector<1x8x32xf32>
    %60 = vector.broadcast %59 : vector<1x8x32xf32> to vector<8x8x32xf32>
    %cst_38 = arith.constant dense<0.000000e+00> : vector<8x8x4xf32>
    %61 = tpu.matmul %60, %50, %cst_38 {dimension_numbers = #tpu.dot_dimension_numbers<[2], [1], [1], [2], [0, 0, 0, 1, 1, 2], [0], [0]>} : vector<8x8x32xf32>, vector<8x32x4xf32>, vector<8x8x4xf32> -> vector<8x8x4xf32>
    %62 = vector.extract_strided_slice %53 {offsets = [0, 0, 0], sizes = [8, 1, 4], strides = [1, 1, 1]} : vector<8x3x4xf32> to vector<8x1x4xf32>
    %63 = vector.broadcast %62 : vector<8x1x4xf32> to vector<8x8x4xf32>
    %64 = arith.addf %61, %63 : vector<8x8x4xf32>
    %cst_39 = arith.constant dense<0.000000e+00> : vector<8x8x4xf32>
    %65 = tpu.matmul %60, %51, %cst_39 {dimension_numbers = #tpu.dot_dimension_numbers<[2], [1], [1], [2], [0, 0, 0, 1, 1, 2], [0], [0]>} : vector<8x8x32xf32>, vector<8x32x4xf32>, vector<8x8x4xf32> -> vector<8x8x4xf32>
    %66 = vector.extract_strided_slice %53 {offsets = [0, 1, 0], sizes = [8, 1, 4], strides = [1, 1, 1]} : vector<8x3x4xf32> to vector<8x1x4xf32>
    %67 = vector.broadcast %66 : vector<8x1x4xf32> to vector<8x8x4xf32>
    %68 = arith.addf %65, %67 : vector<8x8x4xf32>
    %cst_40 = arith.constant dense<0.000000e+00> : vector<8x8x4xf32>
    %69 = tpu.matmul %60, %52, %cst_40 {dimension_numbers = #tpu.dot_dimension_numbers<[2], [1], [1], [2], [0, 0, 0, 1, 1, 2], [0], [0]>} : vector<8x8x32xf32>, vector<8x32x4xf32>, vector<8x8x4xf32> -> vector<8x8x4xf32>
    %70 = vector.extract_strided_slice %53 {offsets = [0, 2, 0], sizes = [8, 1, 4], strides = [1, 1, 1]} : vector<8x3x4xf32> to vector<8x1x4xf32>
    %71 = vector.broadcast %70 : vector<8x1x4xf32> to vector<8x8x4xf32>
    %72 = arith.addf %69, %71 : vector<8x8x4xf32>
    %cst_41 = arith.constant dense<0.000000e+00> : vector<8x8x8xf32>
    %73 = tpu.matmul %64, %68, %cst_41 {dimension_numbers = #tpu.dot_dimension_numbers<[2], [2], [1], [1], [0, 0, 0, 1, 1, 1], [0], [0]>} : vector<8x8x4xf32>, vector<8x8x4xf32>, vector<8x8x8xf32> -> vector<8x8x8xf32>
    %cst_42 = arith.constant dense<0xFF800000> : vector<8x8xf32>
    %74 = vector.multi_reduction <maximumf>, %73, %cst_42 [2] : vector<8x8x8xf32> to vector<8x8xf32>
    %75 = vector.shape_cast %74 : vector<8x8xf32> to vector<8x8x1xf32>
    %76 = vector.broadcast %75 : vector<8x8x1xf32> to vector<8x8x8xf32>
    %77 = arith.subf %73, %76 : vector<8x8x8xf32>
    %78 = math.exp %77 : vector<8x8x8xf32>
    %cst_43 = arith.constant dense<0.000000e+00> : vector<8x8xf32>
    %79 = vector.multi_reduction <add>, %78, %cst_43 [2] : vector<8x8x8xf32> to vector<8x8xf32>
    %80 = vector.shape_cast %79 : vector<8x8xf32> to vector<8x8x1xf32>
    %81 = tpu.reciprocal %80 {approx = true} : vector<8x8x1xf32> -> vector<8x8x1xf32>
    %82 = vector.broadcast %81 : vector<8x8x1xf32> to vector<8x8x8xf32>
    %83 = arith.mulf %78, %82 : vector<8x8x8xf32>
    %cst_44 = arith.constant dense<0.000000e+00> : vector<8x8x4xf32>
    %84 = tpu.matmul %83, %72, %cst_44 {dimension_numbers = #tpu.dot_dimension_numbers<[2], [1], [1], [2], [0, 0, 0, 1, 1, 2], [0], [0]>} : vector<8x8x8xf32>, vector<8x8x4xf32>, vector<8x8x4xf32> -> vector<8x8x4xf32>
    %cst_45 = arith.constant dense<0.000000e+00> : vector<8x8x32xf32>
    %85 = tpu.matmul %84, %54, %cst_45 {dimension_numbers = #tpu.dot_dimension_numbers<[2], [1], [1], [2], [0, 0, 0, 1, 1, 2], [0], [0]>} : vector<8x8x4xf32>, vector<8x4x32xf32>, vector<8x8x32xf32> -> vector<8x8x32xf32>
    %cst_46 = arith.constant dense<0.000000e+00> : vector<8x32xf32>
    %86 = vector.multi_reduction <add>, %85, %cst_46 [0] : vector<8x8x32xf32> to vector<8x32xf32>
    %87 = vector.extract_strided_slice %57 {offsets = [0, 0], sizes = [1, 32], strides = [1, 1]} : vector<7x32xf32> to vector<1x32xf32>
    %88 = vector.broadcast %87 : vector<1x32xf32> to vector<8x32xf32>
    %89 = arith.addf %86, %88 : vector<8x32xf32>
    %90 = arith.addf %49, %89 : vector<8x32xf32>
    %91 = vector.extract_strided_slice %57 {offsets = [1, 0], sizes = [1, 32], strides = [1, 1]} : vector<7x32xf32> to vector<1x32xf32>
    %92 = vector.extract_strided_slice %57 {offsets = [2, 0], sizes = [1, 32], strides = [1, 1]} : vector<7x32xf32> to vector<1x32xf32>
    %cst_47 = arith.constant dense<0.000000e+00> : vector<8xf32>
    %93 = vector.multi_reduction <add>, %90, %cst_47 [1] : vector<8x32xf32> to vector<8xf32>
    %94 = vector.shape_cast %93 : vector<8xf32> to vector<8x1xf32>
    %95 = arith.mulf %90, %90 : vector<8x32xf32>
    %cst_48 = arith.constant dense<0.000000e+00> : vector<8xf32>
    %96 = vector.multi_reduction <add>, %95, %cst_48 [1] : vector<8x32xf32> to vector<8xf32>
    %97 = vector.shape_cast %96 : vector<8xf32> to vector<8x1xf32>
    %cst_49 = arith.constant 3.125000e-02 : f32
    %98 = vector.broadcast %cst_49 : f32 to vector<8x1xf32>
    %99 = arith.mulf %94, %98 : vector<8x1xf32>
    %cst_50 = arith.constant 3.125000e-02 : f32
    %100 = vector.broadcast %cst_50 : f32 to vector<8x1xf32>
    %101 = arith.mulf %97, %100 : vector<8x1xf32>
    %102 = arith.mulf %99, %99 : vector<8x1xf32>
    %103 = arith.subf %101, %102 : vector<8x1xf32>
    %104 = vector.broadcast %99 : vector<8x1xf32> to vector<8x32xf32>
    %105 = arith.subf %90, %104 : vector<8x32xf32>
    %cst_51 = arith.constant 9.99999974E-6 : f32
    %106 = vector.broadcast %cst_51 : f32 to vector<8x1xf32>
    %107 = arith.addf %103, %106 : vector<8x1xf32>
    %108 = math.rsqrt %107 : vector<8x1xf32>
    %109 = vector.broadcast %108 : vector<8x1xf32> to vector<8x32xf32>
    %110 = arith.mulf %105, %109 : vector<8x32xf32>
    %111 = vector.broadcast %91 : vector<1x32xf32> to vector<8x32xf32>
    %112 = arith.mulf %110, %111 : vector<8x32xf32>
    %113 = vector.broadcast %92 : vector<1x32xf32> to vector<8x32xf32>
    %114 = arith.addf %112, %113 : vector<8x32xf32>
    %cst_52 = arith.constant dense<0.000000e+00> : vector<8x32xf32>
    %115 = tpu.matmul %114, %55, %cst_52 {dimension_numbers = #tpu.dot_dimension_numbers<[1], [0], [0], [1], [0, 0, 1, 1], [], []>} : vector<8x32xf32>, vector<32x32xf32>, vector<8x32xf32> -> vector<8x32xf32>
    %116 = vector.extract_strided_slice %57 {offsets = [3, 0], sizes = [1, 32], strides = [1, 1]} : vector<7x32xf32> to vector<1x32xf32>
    %117 = vector.broadcast %116 : vector<1x32xf32> to vector<8x32xf32>
    %118 = arith.addf %115, %117 : vector<8x32xf32>
    %cst_53 = arith.constant 0.000000e+00 : f32
    %119 = vector.broadcast %cst_53 : f32 to vector<8x32xf32>
    %120 = arith.maximumf %118, %119 : vector<8x32xf32>
    %cst_54 = arith.constant dense<0.000000e+00> : vector<8x32xf32>
    %121 = tpu.matmul %120, %56, %cst_54 {dimension_numbers = #tpu.dot_dimension_numbers<[1], [0], [0], [1], [0, 0, 1, 1], [], []>} : vector<8x32xf32>, vector<32x32xf32>, vector<8x32xf32> -> vector<8x32xf32>
    %122 = vector.extract_strided_slice %57 {offsets = [4, 0], sizes = [1, 32], strides = [1, 1]} : vector<7x32xf32> to vector<1x32xf32>
    %123 = vector.broadcast %122 : vector<1x32xf32> to vector<8x32xf32>
    %124 = arith.addf %121, %123 : vector<8x32xf32>
    %125 = arith.addf %114, %124 : vector<8x32xf32>
    %126 = vector.extract_strided_slice %57 {offsets = [5, 0], sizes = [1, 32], strides = [1, 1]} : vector<7x32xf32> to vector<1x32xf32>
    %127 = vector.extract_strided_slice %57 {offsets = [6, 0], sizes = [1, 32], strides = [1, 1]} : vector<7x32xf32> to vector<1x32xf32>
    %cst_55 = arith.constant dense<0.000000e+00> : vector<8xf32>
    %128 = vector.multi_reduction <add>, %125, %cst_55 [1] : vector<8x32xf32> to vector<8xf32>
    %129 = vector.shape_cast %128 : vector<8xf32> to vector<8x1xf32>
    %130 = arith.mulf %125, %125 : vector<8x32xf32>
    %cst_56 = arith.constant dense<0.000000e+00> : vector<8xf32>
    %131 = vector.multi_reduction <add>, %130, %cst_56 [1] : vector<8x32xf32> to vector<8xf32>
    %132 = vector.shape_cast %131 : vector<8xf32> to vector<8x1xf32>
    %cst_57 = arith.constant 3.125000e-02 : f32
    %133 = vector.broadcast %cst_57 : f32 to vector<8x1xf32>
    %134 = arith.mulf %129, %133 : vector<8x1xf32>
    %cst_58 = arith.constant 3.125000e-02 : f32
    %135 = vector.broadcast %cst_58 : f32 to vector<8x1xf32>
    %136 = arith.mulf %132, %135 : vector<8x1xf32>
    %137 = arith.mulf %134, %134 : vector<8x1xf32>
    %138 = arith.subf %136, %137 : vector<8x1xf32>
    %139 = vector.broadcast %134 : vector<8x1xf32> to vector<8x32xf32>
    %140 = arith.subf %125, %139 : vector<8x32xf32>
    %cst_59 = arith.constant 9.99999974E-6 : f32
    %141 = vector.broadcast %cst_59 : f32 to vector<8x1xf32>
    %142 = arith.addf %138, %141 : vector<8x1xf32>
    %143 = math.rsqrt %142 : vector<8x1xf32>
    %144 = vector.broadcast %143 : vector<8x1xf32> to vector<8x32xf32>
    %145 = arith.mulf %140, %144 : vector<8x32xf32>
    %146 = vector.broadcast %126 : vector<1x32xf32> to vector<8x32xf32>
    %147 = arith.mulf %145, %146 : vector<8x32xf32>
    %148 = vector.broadcast %127 : vector<1x32xf32> to vector<8x32xf32>
    %149 = arith.addf %147, %148 : vector<8x32xf32>
    %c0_60 = arith.constant 0 : index
    %c0_61 = arith.constant 0 : index
    %c0_62 = arith.constant 0 : index
    %150 = vector.load %arg15[%c0_60, %c0_61, %c0_62] : memref<8x32x4xf32, #tpu.memory_space<vmem>>, vector<8x32x4xf32>
    %c0_63 = arith.constant 0 : index
    %c0_64 = arith.constant 0 : index
    %c0_65 = arith.constant 0 : index
    %151 = vector.load %arg16[%c0_63, %c0_64, %c0_65] : memref<8x32x4xf32, #tpu.memory_space<vmem>>, vector<8x32x4xf32>
    %c0_66 = arith.constant 0 : index
    %c0_67 = arith.constant 0 : index
    %c0_68 = arith.constant 0 : index
    %152 = vector.load %arg17[%c0_66, %c0_67, %c0_68] : memref<8x32x4xf32, #tpu.memory_space<vmem>>, vector<8x32x4xf32>
    %c0_69 = arith.constant 0 : index
    %c0_70 = arith.constant 0 : index
    %c0_71 = arith.constant 0 : index
    %153 = vector.load %arg18[%c0_69, %c0_70, %c0_71] : memref<8x3x4xf32, #tpu.memory_space<vmem>>, vector<8x3x4xf32>
    %c0_72 = arith.constant 0 : index
    %c0_73 = arith.constant 0 : index
    %c0_74 = arith.constant 0 : index
    %154 = vector.load %arg19[%c0_72, %c0_73, %c0_74] : memref<8x4x32xf32, #tpu.memory_space<vmem>>, vector<8x4x32xf32>
    %c0_75 = arith.constant 0 : index
    %c0_76 = arith.constant 0 : index
    %155 = vector.load %arg20[%c0_75, %c0_76] : memref<32x32xf32, #tpu.memory_space<vmem>>, vector<32x32xf32>
    %c0_77 = arith.constant 0 : index
    %c0_78 = arith.constant 0 : index
    %156 = vector.load %arg21[%c0_77, %c0_78] : memref<32x32xf32, #tpu.memory_space<vmem>>, vector<32x32xf32>
    %c0_79 = arith.constant 0 : index
    %c0_80 = arith.constant 0 : index
    %157 = vector.load %arg22[%c0_79, %c0_80] : memref<7x32xf32, #tpu.memory_space<vmem>>, vector<7x32xf32>
    %158 = vector.shape_cast %149 : vector<8x32xf32> to vector<1x8x32xf32>
    %159 = vector.shape_cast %158 : vector<1x8x32xf32> to vector<1x8x32xf32>
    %160 = vector.broadcast %159 : vector<1x8x32xf32> to vector<8x8x32xf32>
    %cst_81 = arith.constant dense<0.000000e+00> : vector<8x8x4xf32>
    %161 = tpu.matmul %160, %150, %cst_81 {dimension_numbers = #tpu.dot_dimension_numbers<[2], [1], [1], [2], [0, 0, 0, 1, 1, 2], [0], [0]>} : vector<8x8x32xf32>, vector<8x32x4xf32>, vector<8x8x4xf32> -> vector<8x8x4xf32>
    %162 = vector.extract_strided_slice %153 {offsets = [0, 0, 0], sizes = [8, 1, 4], strides = [1, 1, 1]} : vector<8x3x4xf32> to vector<8x1x4xf32>
    %163 = vector.broadcast %162 : vector<8x1x4xf32> to vector<8x8x4xf32>
    %164 = arith.addf %161, %163 : vector<8x8x4xf32>
    %cst_82 = arith.constant dense<0.000000e+00> : vector<8x8x4xf32>
    %165 = tpu.matmul %160, %151, %cst_82 {dimension_numbers = #tpu.dot_dimension_numbers<[2], [1], [1], [2], [0, 0, 0, 1, 1, 2], [0], [0]>} : vector<8x8x32xf32>, vector<8x32x4xf32>, vector<8x8x4xf32> -> vector<8x8x4xf32>
    %166 = vector.extract_strided_slice %153 {offsets = [0, 1, 0], sizes = [8, 1, 4], strides = [1, 1, 1]} : vector<8x3x4xf32> to vector<8x1x4xf32>
    %167 = vector.broadcast %166 : vector<8x1x4xf32> to vector<8x8x4xf32>
    %168 = arith.addf %165, %167 : vector<8x8x4xf32>
    %cst_83 = arith.constant dense<0.000000e+00> : vector<8x8x4xf32>
    %169 = tpu.matmul %160, %152, %cst_83 {dimension_numbers = #tpu.dot_dimension_numbers<[2], [1], [1], [2], [0, 0, 0, 1, 1, 2], [0], [0]>} : vector<8x8x32xf32>, vector<8x32x4xf32>, vector<8x8x4xf32> -> vector<8x8x4xf32>
    %170 = vector.extract_strided_slice %153 {offsets = [0, 2, 0], sizes = [8, 1, 4], strides = [1, 1, 1]} : vector<8x3x4xf32> to vector<8x1x4xf32>
    %171 = vector.broadcast %170 : vector<8x1x4xf32> to vector<8x8x4xf32>
    %172 = arith.addf %169, %171 : vector<8x8x4xf32>
    %cst_84 = arith.constant dense<0.000000e+00> : vector<8x8x8xf32>
    %173 = tpu.matmul %164, %168, %cst_84 {dimension_numbers = #tpu.dot_dimension_numbers<[2], [2], [1], [1], [0, 0, 0, 1, 1, 1], [0], [0]>} : vector<8x8x4xf32>, vector<8x8x4xf32>, vector<8x8x8xf32> -> vector<8x8x8xf32>
    %cst_85 = arith.constant dense<0xFF800000> : vector<8x8xf32>
    %174 = vector.multi_reduction <maximumf>, %173, %cst_85 [2] : vector<8x8x8xf32> to vector<8x8xf32>
    %175 = vector.shape_cast %174 : vector<8x8xf32> to vector<8x8x1xf32>
    %176 = vector.broadcast %175 : vector<8x8x1xf32> to vector<8x8x8xf32>
    %177 = arith.subf %173, %176 : vector<8x8x8xf32>
    %178 = math.exp %177 : vector<8x8x8xf32>
    %cst_86 = arith.constant dense<0.000000e+00> : vector<8x8xf32>
    %179 = vector.multi_reduction <add>, %178, %cst_86 [2] : vector<8x8x8xf32> to vector<8x8xf32>
    %180 = vector.shape_cast %179 : vector<8x8xf32> to vector<8x8x1xf32>
    %181 = tpu.reciprocal %180 {approx = true} : vector<8x8x1xf32> -> vector<8x8x1xf32>
    %182 = vector.broadcast %181 : vector<8x8x1xf32> to vector<8x8x8xf32>
    %183 = arith.mulf %178, %182 : vector<8x8x8xf32>
    %cst_87 = arith.constant dense<0.000000e+00> : vector<8x8x4xf32>
    %184 = tpu.matmul %183, %172, %cst_87 {dimension_numbers = #tpu.dot_dimension_numbers<[2], [1], [1], [2], [0, 0, 0, 1, 1, 2], [0], [0]>} : vector<8x8x8xf32>, vector<8x8x4xf32>, vector<8x8x4xf32> -> vector<8x8x4xf32>
    %cst_88 = arith.constant dense<0.000000e+00> : vector<8x8x32xf32>
    %185 = tpu.matmul %184, %154, %cst_88 {dimension_numbers = #tpu.dot_dimension_numbers<[2], [1], [1], [2], [0, 0, 0, 1, 1, 2], [0], [0]>} : vector<8x8x4xf32>, vector<8x4x32xf32>, vector<8x8x32xf32> -> vector<8x8x32xf32>
    %cst_89 = arith.constant dense<0.000000e+00> : vector<8x32xf32>
    %186 = vector.multi_reduction <add>, %185, %cst_89 [0] : vector<8x8x32xf32> to vector<8x32xf32>
    %187 = vector.extract_strided_slice %157 {offsets = [0, 0], sizes = [1, 32], strides = [1, 1]} : vector<7x32xf32> to vector<1x32xf32>
    %188 = vector.broadcast %187 : vector<1x32xf32> to vector<8x32xf32>
    %189 = arith.addf %186, %188 : vector<8x32xf32>
    %190 = arith.addf %149, %189 : vector<8x32xf32>
    %191 = vector.extract_strided_slice %157 {offsets = [1, 0], sizes = [1, 32], strides = [1, 1]} : vector<7x32xf32> to vector<1x32xf32>
    %192 = vector.extract_strided_slice %157 {offsets = [2, 0], sizes = [1, 32], strides = [1, 1]} : vector<7x32xf32> to vector<1x32xf32>
    %cst_90 = arith.constant dense<0.000000e+00> : vector<8xf32>
    %193 = vector.multi_reduction <add>, %190, %cst_90 [1] : vector<8x32xf32> to vector<8xf32>
    %194 = vector.shape_cast %193 : vector<8xf32> to vector<8x1xf32>
    %195 = arith.mulf %190, %190 : vector<8x32xf32>
    %cst_91 = arith.constant dense<0.000000e+00> : vector<8xf32>
    %196 = vector.multi_reduction <add>, %195, %cst_91 [1] : vector<8x32xf32> to vector<8xf32>
    %197 = vector.shape_cast %196 : vector<8xf32> to vector<8x1xf32>
    %cst_92 = arith.constant 3.125000e-02 : f32
    %198 = vector.broadcast %cst_92 : f32 to vector<8x1xf32>
    %199 = arith.mulf %194, %198 : vector<8x1xf32>
    %cst_93 = arith.constant 3.125000e-02 : f32
    %200 = vector.broadcast %cst_93 : f32 to vector<8x1xf32>
    %201 = arith.mulf %197, %200 : vector<8x1xf32>
    %202 = arith.mulf %199, %199 : vector<8x1xf32>
    %203 = arith.subf %201, %202 : vector<8x1xf32>
    %204 = vector.broadcast %199 : vector<8x1xf32> to vector<8x32xf32>
    %205 = arith.subf %190, %204 : vector<8x32xf32>
    %cst_94 = arith.constant 9.99999974E-6 : f32
    %206 = vector.broadcast %cst_94 : f32 to vector<8x1xf32>
    %207 = arith.addf %203, %206 : vector<8x1xf32>
    %208 = math.rsqrt %207 : vector<8x1xf32>
    %209 = vector.broadcast %208 : vector<8x1xf32> to vector<8x32xf32>
    %210 = arith.mulf %205, %209 : vector<8x32xf32>
    %211 = vector.broadcast %191 : vector<1x32xf32> to vector<8x32xf32>
    %212 = arith.mulf %210, %211 : vector<8x32xf32>
    %213 = vector.broadcast %192 : vector<1x32xf32> to vector<8x32xf32>
    %214 = arith.addf %212, %213 : vector<8x32xf32>
    %cst_95 = arith.constant dense<0.000000e+00> : vector<8x32xf32>
    %215 = tpu.matmul %214, %155, %cst_95 {dimension_numbers = #tpu.dot_dimension_numbers<[1], [0], [0], [1], [0, 0, 1, 1], [], []>} : vector<8x32xf32>, vector<32x32xf32>, vector<8x32xf32> -> vector<8x32xf32>
    %216 = vector.extract_strided_slice %157 {offsets = [3, 0], sizes = [1, 32], strides = [1, 1]} : vector<7x32xf32> to vector<1x32xf32>
    %217 = vector.broadcast %216 : vector<1x32xf32> to vector<8x32xf32>
    %218 = arith.addf %215, %217 : vector<8x32xf32>
    %cst_96 = arith.constant 0.000000e+00 : f32
    %219 = vector.broadcast %cst_96 : f32 to vector<8x32xf32>
    %220 = arith.maximumf %218, %219 : vector<8x32xf32>
    %cst_97 = arith.constant dense<0.000000e+00> : vector<8x32xf32>
    %221 = tpu.matmul %220, %156, %cst_97 {dimension_numbers = #tpu.dot_dimension_numbers<[1], [0], [0], [1], [0, 0, 1, 1], [], []>} : vector<8x32xf32>, vector<32x32xf32>, vector<8x32xf32> -> vector<8x32xf32>
    %222 = vector.extract_strided_slice %157 {offsets = [4, 0], sizes = [1, 32], strides = [1, 1]} : vector<7x32xf32> to vector<1x32xf32>
    %223 = vector.broadcast %222 : vector<1x32xf32> to vector<8x32xf32>
    %224 = arith.addf %221, %223 : vector<8x32xf32>
    %225 = arith.addf %214, %224 : vector<8x32xf32>
    %226 = vector.extract_strided_slice %157 {offsets = [5, 0], sizes = [1, 32], strides = [1, 1]} : vector<7x32xf32> to vector<1x32xf32>
    %227 = vector.extract_strided_slice %157 {offsets = [6, 0], sizes = [1, 32], strides = [1, 1]} : vector<7x32xf32> to vector<1x32xf32>
    %cst_98 = arith.constant dense<0.000000e+00> : vector<8xf32>
    %228 = vector.multi_reduction <add>, %225, %cst_98 [1] : vector<8x32xf32> to vector<8xf32>
    %229 = vector.shape_cast %228 : vector<8xf32> to vector<8x1xf32>
    %230 = arith.mulf %225, %225 : vector<8x32xf32>
    %cst_99 = arith.constant dense<0.000000e+00> : vector<8xf32>
    %231 = vector.multi_reduction <add>, %230, %cst_99 [1] : vector<8x32xf32> to vector<8xf32>
    %232 = vector.shape_cast %231 : vector<8xf32> to vector<8x1xf32>
    %cst_100 = arith.constant 3.125000e-02 : f32
    %233 = vector.broadcast %cst_100 : f32 to vector<8x1xf32>
    %234 = arith.mulf %229, %233 : vector<8x1xf32>
    %cst_101 = arith.constant 3.125000e-02 : f32
    %235 = vector.broadcast %cst_101 : f32 to vector<8x1xf32>
    %236 = arith.mulf %232, %235 : vector<8x1xf32>
    %237 = arith.mulf %234, %234 : vector<8x1xf32>
    %238 = arith.subf %236, %237 : vector<8x1xf32>
    %239 = vector.broadcast %234 : vector<8x1xf32> to vector<8x32xf32>
    %240 = arith.subf %225, %239 : vector<8x32xf32>
    %cst_102 = arith.constant 9.99999974E-6 : f32
    %241 = vector.broadcast %cst_102 : f32 to vector<8x1xf32>
    %242 = arith.addf %238, %241 : vector<8x1xf32>
    %243 = math.rsqrt %242 : vector<8x1xf32>
    %244 = vector.broadcast %243 : vector<8x1xf32> to vector<8x32xf32>
    %245 = arith.mulf %240, %244 : vector<8x32xf32>
    %246 = vector.broadcast %226 : vector<1x32xf32> to vector<8x32xf32>
    %247 = arith.mulf %245, %246 : vector<8x32xf32>
    %248 = vector.broadcast %227 : vector<1x32xf32> to vector<8x32xf32>
    %249 = arith.addf %247, %248 : vector<8x32xf32>
    %c0_103 = arith.constant 0 : index
    %c0_104 = arith.constant 0 : index
    %c0_105 = arith.constant 0 : index
    %250 = vector.load %arg23[%c0_103, %c0_104, %c0_105] : memref<8x32x4xf32, #tpu.memory_space<vmem>>, vector<8x32x4xf32>
    %c0_106 = arith.constant 0 : index
    %c0_107 = arith.constant 0 : index
    %c0_108 = arith.constant 0 : index
    %251 = vector.load %arg24[%c0_106, %c0_107, %c0_108] : memref<8x32x4xf32, #tpu.memory_space<vmem>>, vector<8x32x4xf32>
    %c0_109 = arith.constant 0 : index
    %c0_110 = arith.constant 0 : index
    %c0_111 = arith.constant 0 : index
    %252 = vector.load %arg25[%c0_109, %c0_110, %c0_111] : memref<8x32x4xf32, #tpu.memory_space<vmem>>, vector<8x32x4xf32>
    %c0_112 = arith.constant 0 : index
    %c0_113 = arith.constant 0 : index
    %c0_114 = arith.constant 0 : index
    %253 = vector.load %arg26[%c0_112, %c0_113, %c0_114] : memref<8x3x4xf32, #tpu.memory_space<vmem>>, vector<8x3x4xf32>
    %c0_115 = arith.constant 0 : index
    %c0_116 = arith.constant 0 : index
    %c0_117 = arith.constant 0 : index
    %254 = vector.load %arg27[%c0_115, %c0_116, %c0_117] : memref<8x4x32xf32, #tpu.memory_space<vmem>>, vector<8x4x32xf32>
    %c0_118 = arith.constant 0 : index
    %c0_119 = arith.constant 0 : index
    %255 = vector.load %arg28[%c0_118, %c0_119] : memref<32x32xf32, #tpu.memory_space<vmem>>, vector<32x32xf32>
    %c0_120 = arith.constant 0 : index
    %c0_121 = arith.constant 0 : index
    %256 = vector.load %arg29[%c0_120, %c0_121] : memref<32x32xf32, #tpu.memory_space<vmem>>, vector<32x32xf32>
    %c0_122 = arith.constant 0 : index
    %c0_123 = arith.constant 0 : index
    %257 = vector.load %arg30[%c0_122, %c0_123] : memref<7x32xf32, #tpu.memory_space<vmem>>, vector<7x32xf32>
    %258 = vector.shape_cast %249 : vector<8x32xf32> to vector<1x8x32xf32>
    %259 = vector.shape_cast %258 : vector<1x8x32xf32> to vector<1x8x32xf32>
    %260 = vector.broadcast %259 : vector<1x8x32xf32> to vector<8x8x32xf32>
    %cst_124 = arith.constant dense<0.000000e+00> : vector<8x8x4xf32>
    %261 = tpu.matmul %260, %250, %cst_124 {dimension_numbers = #tpu.dot_dimension_numbers<[2], [1], [1], [2], [0, 0, 0, 1, 1, 2], [0], [0]>} : vector<8x8x32xf32>, vector<8x32x4xf32>, vector<8x8x4xf32> -> vector<8x8x4xf32>
    %262 = vector.extract_strided_slice %253 {offsets = [0, 0, 0], sizes = [8, 1, 4], strides = [1, 1, 1]} : vector<8x3x4xf32> to vector<8x1x4xf32>
    %263 = vector.broadcast %262 : vector<8x1x4xf32> to vector<8x8x4xf32>
    %264 = arith.addf %261, %263 : vector<8x8x4xf32>
    %cst_125 = arith.constant dense<0.000000e+00> : vector<8x8x4xf32>
    %265 = tpu.matmul %260, %251, %cst_125 {dimension_numbers = #tpu.dot_dimension_numbers<[2], [1], [1], [2], [0, 0, 0, 1, 1, 2], [0], [0]>} : vector<8x8x32xf32>, vector<8x32x4xf32>, vector<8x8x4xf32> -> vector<8x8x4xf32>
    %266 = vector.extract_strided_slice %253 {offsets = [0, 1, 0], sizes = [8, 1, 4], strides = [1, 1, 1]} : vector<8x3x4xf32> to vector<8x1x4xf32>
    %267 = vector.broadcast %266 : vector<8x1x4xf32> to vector<8x8x4xf32>
    %268 = arith.addf %265, %267 : vector<8x8x4xf32>
    %cst_126 = arith.constant dense<0.000000e+00> : vector<8x8x4xf32>
    %269 = tpu.matmul %260, %252, %cst_126 {dimension_numbers = #tpu.dot_dimension_numbers<[2], [1], [1], [2], [0, 0, 0, 1, 1, 2], [0], [0]>} : vector<8x8x32xf32>, vector<8x32x4xf32>, vector<8x8x4xf32> -> vector<8x8x4xf32>
    %270 = vector.extract_strided_slice %253 {offsets = [0, 2, 0], sizes = [8, 1, 4], strides = [1, 1, 1]} : vector<8x3x4xf32> to vector<8x1x4xf32>
    %271 = vector.broadcast %270 : vector<8x1x4xf32> to vector<8x8x4xf32>
    %272 = arith.addf %269, %271 : vector<8x8x4xf32>
    %cst_127 = arith.constant dense<0.000000e+00> : vector<8x8x8xf32>
    %273 = tpu.matmul %264, %268, %cst_127 {dimension_numbers = #tpu.dot_dimension_numbers<[2], [2], [1], [1], [0, 0, 0, 1, 1, 1], [0], [0]>} : vector<8x8x4xf32>, vector<8x8x4xf32>, vector<8x8x8xf32> -> vector<8x8x8xf32>
    %cst_128 = arith.constant dense<0xFF800000> : vector<8x8xf32>
    %274 = vector.multi_reduction <maximumf>, %273, %cst_128 [2] : vector<8x8x8xf32> to vector<8x8xf32>
    %275 = vector.shape_cast %274 : vector<8x8xf32> to vector<8x8x1xf32>
    %276 = vector.broadcast %275 : vector<8x8x1xf32> to vector<8x8x8xf32>
    %277 = arith.subf %273, %276 : vector<8x8x8xf32>
    %278 = math.exp %277 : vector<8x8x8xf32>
    %cst_129 = arith.constant dense<0.000000e+00> : vector<8x8xf32>
    %279 = vector.multi_reduction <add>, %278, %cst_129 [2] : vector<8x8x8xf32> to vector<8x8xf32>
    %280 = vector.shape_cast %279 : vector<8x8xf32> to vector<8x8x1xf32>
    %281 = tpu.reciprocal %280 {approx = true} : vector<8x8x1xf32> -> vector<8x8x1xf32>
    %282 = vector.broadcast %281 : vector<8x8x1xf32> to vector<8x8x8xf32>
    %283 = arith.mulf %278, %282 : vector<8x8x8xf32>
    %cst_130 = arith.constant dense<0.000000e+00> : vector<8x8x4xf32>
    %284 = tpu.matmul %283, %272, %cst_130 {dimension_numbers = #tpu.dot_dimension_numbers<[2], [1], [1], [2], [0, 0, 0, 1, 1, 2], [0], [0]>} : vector<8x8x8xf32>, vector<8x8x4xf32>, vector<8x8x4xf32> -> vector<8x8x4xf32>
    %cst_131 = arith.constant dense<0.000000e+00> : vector<8x8x32xf32>
    %285 = tpu.matmul %284, %254, %cst_131 {dimension_numbers = #tpu.dot_dimension_numbers<[2], [1], [1], [2], [0, 0, 0, 1, 1, 2], [0], [0]>} : vector<8x8x4xf32>, vector<8x4x32xf32>, vector<8x8x32xf32> -> vector<8x8x32xf32>
    %cst_132 = arith.constant dense<0.000000e+00> : vector<8x32xf32>
    %286 = vector.multi_reduction <add>, %285, %cst_132 [0] : vector<8x8x32xf32> to vector<8x32xf32>
    %287 = vector.extract_strided_slice %257 {offsets = [0, 0], sizes = [1, 32], strides = [1, 1]} : vector<7x32xf32> to vector<1x32xf32>
    %288 = vector.broadcast %287 : vector<1x32xf32> to vector<8x32xf32>
    %289 = arith.addf %286, %288 : vector<8x32xf32>
    %290 = arith.addf %249, %289 : vector<8x32xf32>
    %291 = vector.extract_strided_slice %257 {offsets = [1, 0], sizes = [1, 32], strides = [1, 1]} : vector<7x32xf32> to vector<1x32xf32>
    %292 = vector.extract_strided_slice %257 {offsets = [2, 0], sizes = [1, 32], strides = [1, 1]} : vector<7x32xf32> to vector<1x32xf32>
    %cst_133 = arith.constant dense<0.000000e+00> : vector<8xf32>
    %293 = vector.multi_reduction <add>, %290, %cst_133 [1] : vector<8x32xf32> to vector<8xf32>
    %294 = vector.shape_cast %293 : vector<8xf32> to vector<8x1xf32>
    %295 = arith.mulf %290, %290 : vector<8x32xf32>
    %cst_134 = arith.constant dense<0.000000e+00> : vector<8xf32>
    %296 = vector.multi_reduction <add>, %295, %cst_134 [1] : vector<8x32xf32> to vector<8xf32>
    %297 = vector.shape_cast %296 : vector<8xf32> to vector<8x1xf32>
    %cst_135 = arith.constant 3.125000e-02 : f32
    %298 = vector.broadcast %cst_135 : f32 to vector<8x1xf32>
    %299 = arith.mulf %294, %298 : vector<8x1xf32>
    %cst_136 = arith.constant 3.125000e-02 : f32
    %300 = vector.broadcast %cst_136 : f32 to vector<8x1xf32>
    %301 = arith.mulf %297, %300 : vector<8x1xf32>
    %302 = arith.mulf %299, %299 : vector<8x1xf32>
    %303 = arith.subf %301, %302 : vector<8x1xf32>
    %304 = vector.broadcast %299 : vector<8x1xf32> to vector<8x32xf32>
    %305 = arith.subf %290, %304 : vector<8x32xf32>
    %cst_137 = arith.constant 9.99999974E-6 : f32
    %306 = vector.broadcast %cst_137 : f32 to vector<8x1xf32>
    %307 = arith.addf %303, %306 : vector<8x1xf32>
    %308 = math.rsqrt %307 : vector<8x1xf32>
    %309 = vector.broadcast %308 : vector<8x1xf32> to vector<8x32xf32>
    %310 = arith.mulf %305, %309 : vector<8x32xf32>
    %311 = vector.broadcast %291 : vector<1x32xf32> to vector<8x32xf32>
    %312 = arith.mulf %310, %311 : vector<8x32xf32>
    %313 = vector.broadcast %292 : vector<1x32xf32> to vector<8x32xf32>
    %314 = arith.addf %312, %313 : vector<8x32xf32>
    %cst_138 = arith.constant dense<0.000000e+00> : vector<8x32xf32>
    %315 = tpu.matmul %314, %255, %cst_138 {dimension_numbers = #tpu.dot_dimension_numbers<[1], [0], [0], [1], [0, 0, 1, 1], [], []>} : vector<8x32xf32>, vector<32x32xf32>, vector<8x32xf32> -> vector<8x32xf32>
    %316 = vector.extract_strided_slice %257 {offsets = [3, 0], sizes = [1, 32], strides = [1, 1]} : vector<7x32xf32> to vector<1x32xf32>
    %317 = vector.broadcast %316 : vector<1x32xf32> to vector<8x32xf32>
    %318 = arith.addf %315, %317 : vector<8x32xf32>
    %cst_139 = arith.constant 0.000000e+00 : f32
    %319 = vector.broadcast %cst_139 : f32 to vector<8x32xf32>
    %320 = arith.maximumf %318, %319 : vector<8x32xf32>
    %cst_140 = arith.constant dense<0.000000e+00> : vector<8x32xf32>
    %321 = tpu.matmul %320, %256, %cst_140 {dimension_numbers = #tpu.dot_dimension_numbers<[1], [0], [0], [1], [0, 0, 1, 1], [], []>} : vector<8x32xf32>, vector<32x32xf32>, vector<8x32xf32> -> vector<8x32xf32>
    %322 = vector.extract_strided_slice %257 {offsets = [4, 0], sizes = [1, 32], strides = [1, 1]} : vector<7x32xf32> to vector<1x32xf32>
    %323 = vector.broadcast %322 : vector<1x32xf32> to vector<8x32xf32>
    %324 = arith.addf %321, %323 : vector<8x32xf32>
    %325 = arith.addf %314, %324 : vector<8x32xf32>
    %326 = vector.extract_strided_slice %257 {offsets = [5, 0], sizes = [1, 32], strides = [1, 1]} : vector<7x32xf32> to vector<1x32xf32>
    %327 = vector.extract_strided_slice %257 {offsets = [6, 0], sizes = [1, 32], strides = [1, 1]} : vector<7x32xf32> to vector<1x32xf32>
    %cst_141 = arith.constant dense<0.000000e+00> : vector<8xf32>
    %328 = vector.multi_reduction <add>, %325, %cst_141 [1] : vector<8x32xf32> to vector<8xf32>
    %329 = vector.shape_cast %328 : vector<8xf32> to vector<8x1xf32>
    %330 = arith.mulf %325, %325 : vector<8x32xf32>
    %cst_142 = arith.constant dense<0.000000e+00> : vector<8xf32>
    %331 = vector.multi_reduction <add>, %330, %cst_142 [1] : vector<8x32xf32> to vector<8xf32>
    %332 = vector.shape_cast %331 : vector<8xf32> to vector<8x1xf32>
    %cst_143 = arith.constant 3.125000e-02 : f32
    %333 = vector.broadcast %cst_143 : f32 to vector<8x1xf32>
    %334 = arith.mulf %329, %333 : vector<8x1xf32>
    %cst_144 = arith.constant 3.125000e-02 : f32
    %335 = vector.broadcast %cst_144 : f32 to vector<8x1xf32>
    %336 = arith.mulf %332, %335 : vector<8x1xf32>
    %337 = arith.mulf %334, %334 : vector<8x1xf32>
    %338 = arith.subf %336, %337 : vector<8x1xf32>
    %339 = vector.broadcast %334 : vector<8x1xf32> to vector<8x32xf32>
    %340 = arith.subf %325, %339 : vector<8x32xf32>
    %cst_145 = arith.constant 9.99999974E-6 : f32
    %341 = vector.broadcast %cst_145 : f32 to vector<8x1xf32>
    %342 = arith.addf %338, %341 : vector<8x1xf32>
    %343 = math.rsqrt %342 : vector<8x1xf32>
    %344 = vector.broadcast %343 : vector<8x1xf32> to vector<8x32xf32>
    %345 = arith.mulf %340, %344 : vector<8x32xf32>
    %346 = vector.broadcast %326 : vector<1x32xf32> to vector<8x32xf32>
    %347 = arith.mulf %345, %346 : vector<8x32xf32>
    %348 = vector.broadcast %327 : vector<1x32xf32> to vector<8x32xf32>
    %349 = arith.addf %347, %348 : vector<8x32xf32>
    %c0_146 = arith.constant 0 : index
    %c0_147 = arith.constant 0 : index
    %c0_148 = arith.constant 0 : index
    %350 = vector.load %arg31[%c0_146, %c0_147, %c0_148] : memref<8x32x4xf32, #tpu.memory_space<vmem>>, vector<8x32x4xf32>
    %c0_149 = arith.constant 0 : index
    %c0_150 = arith.constant 0 : index
    %c0_151 = arith.constant 0 : index
    %351 = vector.load %arg32[%c0_149, %c0_150, %c0_151] : memref<8x32x4xf32, #tpu.memory_space<vmem>>, vector<8x32x4xf32>
    %c0_152 = arith.constant 0 : index
    %c0_153 = arith.constant 0 : index
    %c0_154 = arith.constant 0 : index
    %352 = vector.load %arg33[%c0_152, %c0_153, %c0_154] : memref<8x32x4xf32, #tpu.memory_space<vmem>>, vector<8x32x4xf32>
    %c0_155 = arith.constant 0 : index
    %c0_156 = arith.constant 0 : index
    %c0_157 = arith.constant 0 : index
    %353 = vector.load %arg34[%c0_155, %c0_156, %c0_157] : memref<8x3x4xf32, #tpu.memory_space<vmem>>, vector<8x3x4xf32>
    %c0_158 = arith.constant 0 : index
    %c0_159 = arith.constant 0 : index
    %c0_160 = arith.constant 0 : index
    %354 = vector.load %arg35[%c0_158, %c0_159, %c0_160] : memref<8x4x32xf32, #tpu.memory_space<vmem>>, vector<8x4x32xf32>
    %c0_161 = arith.constant 0 : index
    %c0_162 = arith.constant 0 : index
    %355 = vector.load %arg36[%c0_161, %c0_162] : memref<32x32xf32, #tpu.memory_space<vmem>>, vector<32x32xf32>
    %c0_163 = arith.constant 0 : index
    %c0_164 = arith.constant 0 : index
    %356 = vector.load %arg37[%c0_163, %c0_164] : memref<32x32xf32, #tpu.memory_space<vmem>>, vector<32x32xf32>
    %c0_165 = arith.constant 0 : index
    %c0_166 = arith.constant 0 : index
    %357 = vector.load %arg38[%c0_165, %c0_166] : memref<7x32xf32, #tpu.memory_space<vmem>>, vector<7x32xf32>
    %358 = vector.shape_cast %349 : vector<8x32xf32> to vector<1x8x32xf32>
    %359 = vector.shape_cast %358 : vector<1x8x32xf32> to vector<1x8x32xf32>
    %360 = vector.broadcast %359 : vector<1x8x32xf32> to vector<8x8x32xf32>
    %cst_167 = arith.constant dense<0.000000e+00> : vector<8x8x4xf32>
    %361 = tpu.matmul %360, %350, %cst_167 {dimension_numbers = #tpu.dot_dimension_numbers<[2], [1], [1], [2], [0, 0, 0, 1, 1, 2], [0], [0]>} : vector<8x8x32xf32>, vector<8x32x4xf32>, vector<8x8x4xf32> -> vector<8x8x4xf32>
    %362 = vector.extract_strided_slice %353 {offsets = [0, 0, 0], sizes = [8, 1, 4], strides = [1, 1, 1]} : vector<8x3x4xf32> to vector<8x1x4xf32>
    %363 = vector.broadcast %362 : vector<8x1x4xf32> to vector<8x8x4xf32>
    %364 = arith.addf %361, %363 : vector<8x8x4xf32>
    %cst_168 = arith.constant dense<0.000000e+00> : vector<8x8x4xf32>
    %365 = tpu.matmul %360, %351, %cst_168 {dimension_numbers = #tpu.dot_dimension_numbers<[2], [1], [1], [2], [0, 0, 0, 1, 1, 2], [0], [0]>} : vector<8x8x32xf32>, vector<8x32x4xf32>, vector<8x8x4xf32> -> vector<8x8x4xf32>
    %366 = vector.extract_strided_slice %353 {offsets = [0, 1, 0], sizes = [8, 1, 4], strides = [1, 1, 1]} : vector<8x3x4xf32> to vector<8x1x4xf32>
    %367 = vector.broadcast %366 : vector<8x1x4xf32> to vector<8x8x4xf32>
    %368 = arith.addf %365, %367 : vector<8x8x4xf32>
    %cst_169 = arith.constant dense<0.000000e+00> : vector<8x8x4xf32>
    %369 = tpu.matmul %360, %352, %cst_169 {dimension_numbers = #tpu.dot_dimension_numbers<[2], [1], [1], [2], [0, 0, 0, 1, 1, 2], [0], [0]>} : vector<8x8x32xf32>, vector<8x32x4xf32>, vector<8x8x4xf32> -> vector<8x8x4xf32>
    %370 = vector.extract_strided_slice %353 {offsets = [0, 2, 0], sizes = [8, 1, 4], strides = [1, 1, 1]} : vector<8x3x4xf32> to vector<8x1x4xf32>
    %371 = vector.broadcast %370 : vector<8x1x4xf32> to vector<8x8x4xf32>
    %372 = arith.addf %369, %371 : vector<8x8x4xf32>
    %cst_170 = arith.constant dense<0.000000e+00> : vector<8x8x8xf32>
    %373 = tpu.matmul %364, %368, %cst_170 {dimension_numbers = #tpu.dot_dimension_numbers<[2], [2], [1], [1], [0, 0, 0, 1, 1, 1], [0], [0]>} : vector<8x8x4xf32>, vector<8x8x4xf32>, vector<8x8x8xf32> -> vector<8x8x8xf32>
    %cst_171 = arith.constant dense<0xFF800000> : vector<8x8xf32>
    %374 = vector.multi_reduction <maximumf>, %373, %cst_171 [2] : vector<8x8x8xf32> to vector<8x8xf32>
    %375 = vector.shape_cast %374 : vector<8x8xf32> to vector<8x8x1xf32>
    %376 = vector.broadcast %375 : vector<8x8x1xf32> to vector<8x8x8xf32>
    %377 = arith.subf %373, %376 : vector<8x8x8xf32>
    %378 = math.exp %377 : vector<8x8x8xf32>
    %cst_172 = arith.constant dense<0.000000e+00> : vector<8x8xf32>
    %379 = vector.multi_reduction <add>, %378, %cst_172 [2] : vector<8x8x8xf32> to vector<8x8xf32>
    %380 = vector.shape_cast %379 : vector<8x8xf32> to vector<8x8x1xf32>
    %381 = tpu.reciprocal %380 {approx = true} : vector<8x8x1xf32> -> vector<8x8x1xf32>
    %382 = vector.broadcast %381 : vector<8x8x1xf32> to vector<8x8x8xf32>
    %383 = arith.mulf %378, %382 : vector<8x8x8xf32>
    %cst_173 = arith.constant dense<0.000000e+00> : vector<8x8x4xf32>
    %384 = tpu.matmul %383, %372, %cst_173 {dimension_numbers = #tpu.dot_dimension_numbers<[2], [1], [1], [2], [0, 0, 0, 1, 1, 2], [0], [0]>} : vector<8x8x8xf32>, vector<8x8x4xf32>, vector<8x8x4xf32> -> vector<8x8x4xf32>
    %cst_174 = arith.constant dense<0.000000e+00> : vector<8x8x32xf32>
    %385 = tpu.matmul %384, %354, %cst_174 {dimension_numbers = #tpu.dot_dimension_numbers<[2], [1], [1], [2], [0, 0, 0, 1, 1, 2], [0], [0]>} : vector<8x8x4xf32>, vector<8x4x32xf32>, vector<8x8x32xf32> -> vector<8x8x32xf32>
    %cst_175 = arith.constant dense<0.000000e+00> : vector<8x32xf32>
    %386 = vector.multi_reduction <add>, %385, %cst_175 [0] : vector<8x8x32xf32> to vector<8x32xf32>
    %387 = vector.extract_strided_slice %357 {offsets = [0, 0], sizes = [1, 32], strides = [1, 1]} : vector<7x32xf32> to vector<1x32xf32>
    %388 = vector.broadcast %387 : vector<1x32xf32> to vector<8x32xf32>
    %389 = arith.addf %386, %388 : vector<8x32xf32>
    %390 = arith.addf %349, %389 : vector<8x32xf32>
    %391 = vector.extract_strided_slice %357 {offsets = [1, 0], sizes = [1, 32], strides = [1, 1]} : vector<7x32xf32> to vector<1x32xf32>
    %392 = vector.extract_strided_slice %357 {offsets = [2, 0], sizes = [1, 32], strides = [1, 1]} : vector<7x32xf32> to vector<1x32xf32>
    %cst_176 = arith.constant dense<0.000000e+00> : vector<8xf32>
    %393 = vector.multi_reduction <add>, %390, %cst_176 [1] : vector<8x32xf32> to vector<8xf32>
    %394 = vector.shape_cast %393 : vector<8xf32> to vector<8x1xf32>
    %395 = arith.mulf %390, %390 : vector<8x32xf32>
    %cst_177 = arith.constant dense<0.000000e+00> : vector<8xf32>
    %396 = vector.multi_reduction <add>, %395, %cst_177 [1] : vector<8x32xf32> to vector<8xf32>
    %397 = vector.shape_cast %396 : vector<8xf32> to vector<8x1xf32>
    %cst_178 = arith.constant 3.125000e-02 : f32
    %398 = vector.broadcast %cst_178 : f32 to vector<8x1xf32>
    %399 = arith.mulf %394, %398 : vector<8x1xf32>
    %cst_179 = arith.constant 3.125000e-02 : f32
    %400 = vector.broadcast %cst_179 : f32 to vector<8x1xf32>
    %401 = arith.mulf %397, %400 : vector<8x1xf32>
    %402 = arith.mulf %399, %399 : vector<8x1xf32>
    %403 = arith.subf %401, %402 : vector<8x1xf32>
    %404 = vector.broadcast %399 : vector<8x1xf32> to vector<8x32xf32>
    %405 = arith.subf %390, %404 : vector<8x32xf32>
    %cst_180 = arith.constant 9.99999974E-6 : f32
    %406 = vector.broadcast %cst_180 : f32 to vector<8x1xf32>
    %407 = arith.addf %403, %406 : vector<8x1xf32>
    %408 = math.rsqrt %407 : vector<8x1xf32>
    %409 = vector.broadcast %408 : vector<8x1xf32> to vector<8x32xf32>
    %410 = arith.mulf %405, %409 : vector<8x32xf32>
    %411 = vector.broadcast %391 : vector<1x32xf32> to vector<8x32xf32>
    %412 = arith.mulf %410, %411 : vector<8x32xf32>
    %413 = vector.broadcast %392 : vector<1x32xf32> to vector<8x32xf32>
    %414 = arith.addf %412, %413 : vector<8x32xf32>
    %cst_181 = arith.constant dense<0.000000e+00> : vector<8x32xf32>
    %415 = tpu.matmul %414, %355, %cst_181 {dimension_numbers = #tpu.dot_dimension_numbers<[1], [0], [0], [1], [0, 0, 1, 1], [], []>} : vector<8x32xf32>, vector<32x32xf32>, vector<8x32xf32> -> vector<8x32xf32>
    %416 = vector.extract_strided_slice %357 {offsets = [3, 0], sizes = [1, 32], strides = [1, 1]} : vector<7x32xf32> to vector<1x32xf32>
    %417 = vector.broadcast %416 : vector<1x32xf32> to vector<8x32xf32>
    %418 = arith.addf %415, %417 : vector<8x32xf32>
    %cst_182 = arith.constant 0.000000e+00 : f32
    %419 = vector.broadcast %cst_182 : f32 to vector<8x32xf32>
    %420 = arith.maximumf %418, %419 : vector<8x32xf32>
    %cst_183 = arith.constant dense<0.000000e+00> : vector<8x32xf32>
    %421 = tpu.matmul %420, %356, %cst_183 {dimension_numbers = #tpu.dot_dimension_numbers<[1], [0], [0], [1], [0, 0, 1, 1], [], []>} : vector<8x32xf32>, vector<32x32xf32>, vector<8x32xf32> -> vector<8x32xf32>
    %422 = vector.extract_strided_slice %357 {offsets = [4, 0], sizes = [1, 32], strides = [1, 1]} : vector<7x32xf32> to vector<1x32xf32>
    %423 = vector.broadcast %422 : vector<1x32xf32> to vector<8x32xf32>
    %424 = arith.addf %421, %423 : vector<8x32xf32>
    %425 = arith.addf %414, %424 : vector<8x32xf32>
    %426 = vector.extract_strided_slice %357 {offsets = [5, 0], sizes = [1, 32], strides = [1, 1]} : vector<7x32xf32> to vector<1x32xf32>
    %427 = vector.extract_strided_slice %357 {offsets = [6, 0], sizes = [1, 32], strides = [1, 1]} : vector<7x32xf32> to vector<1x32xf32>
    %cst_184 = arith.constant dense<0.000000e+00> : vector<8xf32>
    %428 = vector.multi_reduction <add>, %425, %cst_184 [1] : vector<8x32xf32> to vector<8xf32>
    %429 = vector.shape_cast %428 : vector<8xf32> to vector<8x1xf32>
    %430 = arith.mulf %425, %425 : vector<8x32xf32>
    %cst_185 = arith.constant dense<0.000000e+00> : vector<8xf32>
    %431 = vector.multi_reduction <add>, %430, %cst_185 [1] : vector<8x32xf32> to vector<8xf32>
    %432 = vector.shape_cast %431 : vector<8xf32> to vector<8x1xf32>
    %cst_186 = arith.constant 3.125000e-02 : f32
    %433 = vector.broadcast %cst_186 : f32 to vector<8x1xf32>
    %434 = arith.mulf %429, %433 : vector<8x1xf32>
    %cst_187 = arith.constant 3.125000e-02 : f32
    %435 = vector.broadcast %cst_187 : f32 to vector<8x1xf32>
    %436 = arith.mulf %432, %435 : vector<8x1xf32>
    %437 = arith.mulf %434, %434 : vector<8x1xf32>
    %438 = arith.subf %436, %437 : vector<8x1xf32>
    %439 = vector.broadcast %434 : vector<8x1xf32> to vector<8x32xf32>
    %440 = arith.subf %425, %439 : vector<8x32xf32>
    %cst_188 = arith.constant 9.99999974E-6 : f32
    %441 = vector.broadcast %cst_188 : f32 to vector<8x1xf32>
    %442 = arith.addf %438, %441 : vector<8x1xf32>
    %443 = math.rsqrt %442 : vector<8x1xf32>
    %444 = vector.broadcast %443 : vector<8x1xf32> to vector<8x32xf32>
    %445 = arith.mulf %440, %444 : vector<8x32xf32>
    %446 = vector.broadcast %426 : vector<1x32xf32> to vector<8x32xf32>
    %447 = arith.mulf %445, %446 : vector<8x32xf32>
    %448 = vector.broadcast %427 : vector<1x32xf32> to vector<8x32xf32>
    %449 = arith.addf %447, %448 : vector<8x32xf32>
    %c0_189 = arith.constant 0 : index
    %c0_190 = arith.constant 0 : index
    %450 = vector.load %arg39[%c0_189, %c0_190] : memref<1x32xf32, #tpu.memory_space<vmem>>, vector<1x32xf32>
    %c0_191 = arith.constant 0 : index
    %c0_192 = arith.constant 0 : index
    %451 = vector.load %arg40[%c0_191, %c0_192] : memref<1x1xf32, #tpu.memory_space<vmem>>, vector<1x1xf32>
    %452 = vector.broadcast %450 : vector<1x32xf32> to vector<8x32xf32>
    %453 = arith.mulf %449, %452 : vector<8x32xf32>
    %cst_193 = arith.constant dense<0.000000e+00> : vector<8xf32>
    %454 = vector.multi_reduction <add>, %453, %cst_193 [1] : vector<8x32xf32> to vector<8xf32>
    %455 = vector.shape_cast %454 : vector<8xf32> to vector<8x1xf32>
    %456 = vector.broadcast %451 : vector<1x1xf32> to vector<8x1xf32>
    %457 = arith.addf %455, %456 : vector<8x1xf32>
    %c0_194 = arith.constant 0 : index
    %c0_195 = arith.constant 0 : index
    %458 = vector.load %arg41[%c0_194, %c0_195] : memref<8x1xf32, #tpu.memory_space<vmem>>, vector<8x1xf32>
    tpu.vector_store %arg41[%c0_194, %c0_195], %457 {strides = array<i32>} : memref<8x1xf32, #tpu.memory_space<vmem>>, vector<8x1xf32>,
    return
  }
}

</mosaic_0001>

<bundles_post_ra>
// kernel: sim_sdf_forward.1
= control target key start
LH: loop header
LB: loop body
LE: loop exit
PB: predicated region body
PF: predicated region fallthrough
CT: control target
= control target key end

     0   :  { %v19963_v0 = vmov 0   ;;  %v19964_v1 = vmov 2   ;;  %v19965_v3 = vmov 1   ;;  %s19966_s6 = smov 3   ;;  %v19967_v4 = vmov 0.0   ;;  %s19969_s10 = smov 1   ;;  %s22257_s0 = inlined_call_operand.smem [shape: u32[42], index: -1, kind: input, shape index: {}] }
   0x1   :  { %19815 = vset.pattern.permute.xlu0 %v19963_v0  ;;  %s1_s5 = sld [smem:[%s22257_s0]]   ;;  %19817 = vset.pattern.permute.xlu1 %v19964_v1  ;;  %vm19968_vm0 = vmmov 0   ;;  %v180_v6 = vlaneseq  ;;  %s19970_s14 = smov 2   ;;  %vm218_vm1 = vcmask 64512   ;;  %v19972_v32 = vmov 0.0|0.0  }
   0x2   :  { %s16481_s9 = sld [smem:[%s22257_s0 + %s19966_s6]]   ;;  %17505 = vmatprep.subr.mxu0 %v19967_v4  ;;  %17507 = vmatprep.mubr.msk.f32.mxu0 %vm19968_vm0, %v19967_v4  ;;  %s19971_s18 = smov 5   ;;  %vm306_vm2 = vcmask 130048   ;;  %vm544_vm3 = vcmask 261120   ;;  %vm2292_vm4 = vcmask 31744   ;;  %vm3576_vm5 = vcmask 1043456  }
   0x3   :  { %17514 = vmatprep.mubr.msk.f32.mxu1 %vm19968_vm0, %v19967_v4  ;;  %s16479_s13 = sld [smem:[%s22257_s0 + %s19969_s10]]   ;;  %v20029_v7 = vshrl.u32 %v180_v6, 7  ;;  %19141 = vmatprep.subr.bf16.mxu1 %v19972_v32  ;;  %s19973_s22 = smov 7   ;;  %vm16473_vm6 = vcmask 7168  }
   0x4   :  { %s16480_s17 = sld [smem:[%s22257_s0 + %s19970_s14]]   ;;  %s19974_s26 = smov 4  }
   0x5   :  { %v20035_v8 = vsub.s32 0, %v20029_v7  ;;  %v20038_v9 = vsub.s32 1, %v20029_v7  ;;  %v20041_v10 = vsub.s32 2, %v20029_v7  ;;  %s16483_s21 = sld [smem:[%s22257_s0 + %s19971_s18]]   ;;  %s19975_s30 = smov 6  }
   0x6   :  { %s20060_s25 = sld [smem:[%s22257_s0 + %s19973_s22]]   ;;  %s19976_s4 = smov 8  }
   0x7   :  { %v172_v2 = vld [vmem:[%s1_s5] sm:$0xff]  ;;  %s16482_s29 = sld [smem:[%s22257_s0 + %s19974_s26]]   ;;  %s19977_s8 = smov 9  }
   0x8   :  { %177 = vperm.xlu0 %19815, %v172_v2   ;;  %196 = vperm.xlu1 %19817, %v172_v2   ;;  %v216_v5 = vld [vmem:[%s16481_s9] sm:$0xff]  ;;  %s16484_s3 = sld [smem:[%s22257_s0 + %s19975_s30]]   ;;  %s19978_s12 = smov 10  }
   0x9   :  { %17506 = vmatpush3.msra.mxu0 %v216_v5  ;;  %v173_v11 = vld [vmem:[%s16479_s13] sm:$0x7]  ;;  %s20124_s7 = sld [smem:[%s22257_s0 + %s19976_s4]]   ;;  %s19979_s16 = smov 11  }
   0xa   :  { %v183_v13 = vrot.slane %v173_v11, %v20035_v8  ;;  %v192_v14 = vrot.slane %v173_v11, %v20038_v9  ;;  %v202_v15 = vrot.slane %v173_v11, %v20041_v10  ;;  %v174_v18 = vld [vmem:[%s16480_s17] sm:$0x3]  ;;  %19144 = vmatprep.subr.bf16.mxu0 %v19972_v32  ;;  %s20209_s11 = sld [smem:[%s22257_s0 + %s19977_s8]]   ;;  %s19980_s20 = smov 14  }
   0xb   :  { %v208_v23 = vrot.slane %v174_v18, %v20035_v8  ;;  %v213_v24 = vrot.slane %v174_v18, %v20038_v9  ;;  %v303_v29 = vld [vmem:[%s16483_s21] sm:$0xff]  ;;  %v304_v30 = vld [vmem:[%s16483_s21 + $0x8] sm:$0xff]  ;;  %s20333_s15 = sld [smem:[%s22257_s0 + %s19978_s12]]   ;;  %s19981_s24 = smov 12  }
   0xc   :  { %19816 = vset.pattern.permute.xlu0 %v19965_v3  ;;  %v19142_v31 = vpack.c.bf16 %v304_v30, %v303_v29  ;;  %v391_v33 = vld [vmem:[%s20060_s25] sm:$0xff]  ;;  %v392_v34 = vld [vmem:[%s20060_s25 + $0x8] sm:$0xff]  ;;  %v393_v47 = vld [vmem:[%s20060_s25 + $0x10] sm:$0xff]  ;;  %s20514_s19 = sld [smem:[%s22257_s0 + %s19979_s16]]   ;;  %s19982_s28 = smov 13  }
   0xd   :  { %186 = vperm.xlu0 %19816, %v172_v2   ;;  %v19145_v35 = vpack.c.bf16 %v392_v34, %v391_v33  ;;  %v217_v36 = vld [vmem:[%s16482_s29] sm:$0x3]  ;;  %v396_v43 = vld [vmem:[%s20060_s25 + $0x28] sm:$0xff]  ;;  %v394_v48 = vld [vmem:[%s20060_s25 + $0x18] sm:$0xff]  ;;  %s16492_s23 = sld [smem:[%s22257_s0 + %s19980_s20]]   ;;  %s19983_s2 = smov 15  }
   0xe   :  { %19143 = vmatpush3.bf16.msra.mxu1 %v19142_v31  ;;  %v295_v37 = vrot.slane %v217_v36, %v20035_v8  ;;  %v300_v38 = vrot.slane %v217_v36, %v20038_v9  ;;  %v395_v42 = vld [vmem:[%s20060_s25 + $0x20] sm:$0xff]  ;;  %v397_v49 = vld [vmem:[%s20060_s25 + $0x30] sm:$0xff]  ;;  %v19148_v50 = vpack.c.bf16 %v394_v48, %v393_v47  ;;  %v398_v51 = vld [vmem:[%s20060_s25 + $0x38] sm:$0xff]  ;;  %s16490_s27 = sld [smem:[%s22257_s0 + %s19981_s24]]   ;;  %s19984_s6 = smov 16  }
   0xf   :  { %19150 = vmatprep.subr.bf16.mxu1 %v19972_v32  ;;  %v19151_v45 = vpack.c.bf16 %v396_v43, %v395_v42  ;;  %v19154_v52 = vpack.c.bf16 %v398_v51, %v397_v49  ;;  %v305_v53 = vld [vmem:[%s16484_s3] sm:$0x3]  ;;  %v400_v60 = vld [vmem:[%s20060_s25 + $0x48] sm:$0xff]  ;;  %v401_v2 = vld [vmem:[%s20060_s25 + $0x50] sm:$0xff]  ;;  %s16491_s1 = sld [smem:[%s22257_s0 + %s19982_s28]]   ;;  %s19985_s10 = smov 17  }
  0x10   :  { %v383_v54 = vrot.slane %v305_v53, %v20035_v8  ;;  %v388_v55 = vrot.slane %v305_v53, %v20038_v9  ;;  %v399_v57 = vld [vmem:[%s20060_s25 + $0x40] sm:$0xff]  ;;  %v404_v62 = vld [vmem:[%s20060_s25 + $0x68] sm:$0xff]  ;;  %v402_v5 = vld [vmem:[%s20060_s25 + $0x58] sm:$0xff]  ;;  %s20617_s5 = sld [smem:[%s22257_s0 + %s19983_s2]]   ;;  %s19986_s14 = smov 18  }
  0x11   :  { %19818 = vset.pattern.permute.xlu0 %v19964_v1  ;;  %v403_v61 = vld [vmem:[%s20060_s25 + $0x60] sm:$0xff]  ;;  %v19157_v0 = vpack.c.bf16 %v400_v60, %v399_v57  ;;  %v405_v6 = vld [vmem:[%s20060_s25 + $0x70] sm:$0xff]  ;;  %v406_v11 = vld [vmem:[%s20060_s25 + $0x78] sm:$0xff]  ;;  %s20679_s9 = sld [smem:[%s22257_s0 + %s19984_s6]]   ;;  %s19987_s18 = smov 19  }
  0x12   :  { %v19163_v1 = vpack.c.bf16 %v404_v62, %v403_v61  ;;  %v420_v29 = vld [vmem:[%s20060_s25 + $0xe8] sm:$0xff]  ;;  %v417_v33 = vld [vmem:[%s20060_s25 + $0xd0] sm:$0xff]  ;;  %v418_v34 = vld [vmem:[%s20060_s25 + $0xd8] sm:$0xff]  ;;  %s20764_s13 = sld [smem:[%s22257_s0 + %s19985_s10]]   ;;  %s19988_s22 = smov 22  }
  0x13   :  { %v422_v36 = vld [vmem:[%s20060_s25 + $0xf8] sm:$0xff]  ;;  %v428_v42 = vld [vmem:[%s20124_s7 + $0x28] sm:$0xff]  ;;  %v429_v47 = vld [vmem:[%s20124_s7 + $0x30] sm:$0xff]  ;;  %s20888_s17 = sld [smem:[%s22257_s0 + %s19986_s14]]   ;;  %s19989_s26 = smov 20  }
  0x14   :  { %v430_v48 = vld [vmem:[%s20124_s7 + $0x38] sm:$0xff]  ;;  %v431_v51 = vld [vmem:[%s20124_s7 + $0x40] sm:$0xff]  ;;  %v433_v57 = vld [vmem:[%s20124_s7 + $0x50] sm:$0xff]  ;;  %s21069_s21 = sld [smem:[%s22257_s0 + %s19987_s18]]   ;;  %s19990_s30 = smov 21  }
  0x15   :  { %v435_v53 = vld [vmem:[%s20124_s7 + $0x60] sm:$0xff]  ;;  %v438_v60 = vld [vmem:[%s20124_s7 + $0x78] sm:$0xff]  ;;  %s16498_s29 = sld [smem:[%s22257_s0 + %s19989_s26]]   ;;  %s19991_s4 = smov 23  }
  0x16   :  { %s16499_s3 = sld [smem:[%s22257_s0 + %s19990_s30]]   ;;  %s19992_s8 = smov 24  }
  0x17   :  { %s19993_s12 = smov 25   ;;  %s19994_s16 = smov 26  }
  0x18   :  { %s19995_s20 = smov 27   ;;  %s19996_s24 = smov 30  }
  0x19   :  { %s19997_s28 = smov 28   ;;  %s19998_s2 = smov 29  }
  0x1a   :  { %s19999_s6 = smov 31   ;;  %s20000_s10 = smov 32  }
  0x1b   :  { %s20001_s14 = smov 33   ;;  %s20002_s18 = smov 34  }
  0x1c   :  { %s20004_s26 = smov 38   ;;  %s20005_s30 = smov 36  }
  0x87   :  { %v178_v12 = vpop.permute.xlu0 %177  ;;  %v197_v16 = vpop.permute.xlu1 %196 }
  0x88   :  { %v184_v19 = vmul.f32 %v183_v13, %v178_v12  ;;  %v203_v21 = vmul.f32 %v202_v15, %v197_v16  ;;  %v19160_v12 = vpack.c.bf16 %v402_v5, %v401_v2  ;;  %v19166_v13 = vpack.c.bf16 %v406_v11, %v405_v6  ;;  %v408_v15 = vld [vmem:[%s20060_s25 + $0x88] sm:$0xff]  ;;  %v411_v16 = vld [vmem:[%s20060_s25 + $0xa0] sm:$0xff]  ;;  %v441_v11 = vld [vmem:[%s20124_s7 + $0x90] sm:$0xff] }
  0x89   :  { %v444_v2 = vld [vmem:[%s20124_s7 + $0xa8] sm:$0xff] }
  0x8c   :  { %v187_v17 = vpop.permute.xlu0 %186 }
  0x8d   :  { %v193_v20 = vmul.f32 %v192_v14, %v187_v17  ;;  %v407_v14 = vld [vmem:[%s20060_s25 + $0x80] sm:$0xff]  ;;  %v412_v17 = vld [vmem:[%s20060_s25 + $0xa8] sm:$0xff] }
  0x8e   :  { %v19169_v18 = vpack.c.bf16 %v408_v15, %v407_v14  ;;  %v446_v14 = vld [vmem:[%s20124_s7 + $0xb8] sm:$0xff] }
  0x8f   :  { %v194_v22 = vadd.f32 %v193_v20, %v184_v19  ;;  %v19175_v19 = vpack.c.bf16 %v412_v17, %v411_v16  ;;  %v409_v20 = vld [vmem:[%s20060_s25 + $0x90] sm:$0xff]  ;;  %v447_v17 = vld [vmem:[%s20124_s7 + $0xc0] sm:$0xff] }
  0x91   :  { %v204_v25 = vadd.f32 %v203_v21, %v194_v22  ;;  %v410_v21 = vld [vmem:[%s20060_s25 + $0x98] sm:$0xff]  ;;  %v413_v22 = vld [vmem:[%s20060_s25 + $0xb0] sm:$0xff] }
  0x93   :  { %v209_v26 = vmul.f32 %v208_v23, %v204_v25  ;;  %v414_v23 = vld [vmem:[%s20060_s25 + $0xb8] sm:$0xff] }
  0x94   :  { %v19178_v25 = vpack.c.bf16 %v414_v23, %v413_v22  ;;  %v449_v23 = vld [vmem:[%s20124_s7 + $0xd0] sm:$0xff] }
  0x95   :  { %v214_v27 = vadd.f32 %v213_v24, %v209_v26  ;;  %v19172_v24 = vpack.c.bf16 %v410_v21, %v409_v20  ;;  %v415_v26 = vld [vmem:[%s20060_s25 + $0xc0] sm:$0xff]  ;;  %v452_v20 = vld [vmem:[%s20124_s7 + $0xe8] sm:$0xff] }
  0x97   :  { %v215_v28 = vmax.f32 %v214_v27, 0.0  ;;  %v416_v27 = vld [vmem:[%s20060_s25 + $0xc8] sm:$0xff] }
  0x98   :  { %v19181_v30 = vpack.c.bf16 %v416_v27, %v415_v26  ;;  %v454_v26 = vld [vmem:[%s20124_s7 + $0xf8] sm:$0xff] }
  0x99   :  { %17508 = vmatmul.mubr.msk.f32.vlgmr.msra.gmra.mrb[0].mxu0 %vm218_vm1, %v215_v28  ;;  %v419_v28 = vld [vmem:[%s20060_s25 + $0xe0] sm:$0xff] }
  0x9a   :  { %17525 = vmatprep.mubr.msk.f32.mxu0 %vm19968_vm0, %v19967_v4  ;;  %19146 = vmatpush3.bf16.msra.mxu0 %v19145_v35  ;;  %v19187_v31 = vpack.c.bf16 %v420_v29, %v419_v28  ;;  %v421_v35 = vld [vmem:[%s20060_s25 + $0xf0] sm:$0xff]  ;;  %v455_v29 = vld [vmem:[%s20209_s11] sm:$0xff]  ;;  %s16500_s25 = sld [smem:[%s22257_s0 + %s19988_s22]]   ;;  %s20003_s22 = smov 35  }
  0x9b   :  { %19147 = vmatprep.subr.bf16.mxu0 %v19972_v32 }
  0x9e   :  { %19149 = vmatpush3.bf16.msra.mxu0 %v19148_v50  ;;  %v19202_v50 = vpack.c.bf16 %v430_v48, %v429_v47  ;;  %v465_v48 = vld [vmem:[%s20209_s11 + $0x50] sm:$0xff] }
  0x9f   :  { %19156 = vmatprep.subr.bf16.mxu0 %v19972_v32 }
 0x16c   :  { %v288_v39 = vpop.f32.mrb[0].mxu0 }
 0x16d   :  { %v296_v40 = vmul.f32 %v295_v37, %v288_v39  ;;  %v17509_v41 = vpop.f32.mrb[1].mxu0  ;;  %v19184_v37 = vpack.c.bf16 %v418_v34, %v417_v33  ;;  %v423_v39 = vld [vmem:[%s20124_s7] sm:$0xff]  ;;  %v460_v33 = vld [vmem:[%s20209_s11 + $0x28] sm:$0xff] }
 0x16e   :  { %v427_v41 = vld [vmem:[%s20124_s7 + $0x20] sm:$0xff] }
 0x16f   :  { %v301_v44 = vadd.f32 %v300_v38, %v296_v40  ;;  %v19190_v38 = vpack.c.bf16 %v422_v36, %v421_v35  ;;  %v424_v40 = vld [vmem:[%s20124_s7 + $0x8] sm:$0xff]  ;;  %v457_v36 = vld [vmem:[%s20209_s11 + $0x10] sm:$0xff] }
 0x170   :  { %v19193_v43 = vpack.c.bf16 %v424_v40, %v423_v39  ;;  %v462_v39 = vld [vmem:[%s20209_s11 + $0x38] sm:$0xff] }
 0x171   :  { %v302_v46 = vmax.f32 %v301_v44, 0.0  ;;  %v19199_v44 = vpack.c.bf16 %v428_v42, %v427_v41  ;;  %v463_v42 = vld [vmem:[%s20209_s11 + $0x40] sm:$0xff] }
 0x173   :  { %17515 = vmatmul.mubr.msk.f32.vlgmr.msra.gmra.mrb[0].mxu1 %vm306_vm2, %v302_v46  ;;  %v426_v46 = vld [vmem:[%s20124_s7 + $0x18] sm:$0xff] }
 0x174   :  { %19152 = vmatpush3.bf16.msra.mxu1 %v19151_v45  ;;  %17536 = vmatprep.mubr.msk.f32.mxu1 %vm19968_vm0, %v19967_v4  ;;  %v425_v45 = vld [vmem:[%s20124_s7 + $0x10] sm:$0xff] }
 0x175   :  { %19153 = vmatprep.subr.bf16.mxu1 %v19972_v32  ;;  %v19196_v49 = vpack.c.bf16 %v426_v46, %v425_v45  ;;  %v468_v45 = vld [vmem:[%s20209_s11 + $0x68] sm:$0xff] }
 0x178   :  { %19155 = vmatpush3.bf16.msra.mxu1 %v19154_v52  ;;  %v432_v52 = vld [vmem:[%s20124_s7 + $0x48] sm:$0xff] }
 0x179   :  { %19162 = vmatprep.subr.bf16.mxu1 %v19972_v32 }
 0x246   :  { %v376_v56 = vpop.f32.mrb[0].mxu1 }
 0x247   :  { %v384_v58 = vmul.f32 %v383_v54, %v376_v56  ;;  %v17516_v59 = vpop.f32.mrb[1].mxu1  ;;  %v436_v54 = vld [vmem:[%s20124_s7 + $0x68] sm:$0xff] }
 0x248   :  { %v19211_v56 = vpack.c.bf16 %v436_v54, %v435_v53  ;;  %v437_v59 = vld [vmem:[%s20124_s7 + $0x70] sm:$0xff]  ;;  %v471_v54 = vld [vmem:[%s20209_s11 + $0x80] sm:$0xff] }
 0x249   :  { %v389_v63 = vadd.f32 %v388_v55, %v384_v58  ;;  %v19205_v55 = vpack.c.bf16 %v432_v52, %v431_v51  ;;  %v434_v58 = vld [vmem:[%s20124_s7 + $0x58] sm:$0xff]  ;;  %v19214_v62 = vpack.c.bf16 %v438_v60, %v437_v59  ;;  %v473_v60 = vld [vmem:[%s20209_s11 + $0x90] sm:$0xff] }
 0x24a   :  { %v19208_v61 = vpack.c.bf16 %v434_v58, %v433_v57  ;;  %v470_v51 = vld [vmem:[%s20209_s11 + $0x78] sm:$0xff]  ;;  %v476_v57 = vld [vmem:[%s20209_s11 + $0xa8] sm:$0xff] }
 0x24b   :  { %v20091_v3 = vmax.f32 %v389_v63, 0.0  ;;  %v439_v63 = vld [vmem:[%s20124_s7 + $0x80] sm:$0xff] }
 0x24d   :  { %17526 = vmatmul.mubr.msk.f32.vlgmr.msra.gmra.mrb[2].mxu0 %vm544_vm3, %v20091_v3  ;;  %17537 = vmatmul.mubr.msk.f32.vlgmr.msra.gmra.mrb[2].mxu1 %vm544_vm3, %v20091_v3 }
 0x24e   :  { %19158 = vmatpush3.bf16.msra.mxu0 %v19157_v0  ;;  %19164 = vmatpush3.bf16.msra.mxu1 %v19163_v1  ;;  %v440_v0 = vld [vmem:[%s20124_s7 + $0x88] sm:$0xff]  ;;  %v443_v1 = vld [vmem:[%s20124_s7 + $0xa0] sm:$0xff] }
 0x24f   :  { %19159 = vmatprep.subr.bf16.mxu0 %v19972_v32  ;;  %19165 = vmatprep.subr.bf16.mxu1 %v19972_v32  ;;  %v19217_v5 = vpack.c.bf16 %v440_v0, %v439_v63  ;;  %v19223_v6 = vpack.c.bf16 %v444_v2, %v443_v1  ;;  %v478_v63 = vld [vmem:[%s20209_s11 + $0xb8] sm:$0xff]  ;;  %v479_v2 = vld [vmem:[%s20209_s11 + $0xc0] sm:$0xff] }
 0x250   :  { %17547 = vmatprep.mubr.msk.f32.mxu0 %vm19968_vm0, %v19967_v4  ;;  %17558 = vmatprep.mubr.msk.f32.mxu1 %vm19968_vm0, %v19967_v4 }
 0x252   :  { %19161 = vmatpush3.bf16.msra.mxu0 %v19160_v12  ;;  %19167 = vmatpush3.bf16.msra.mxu1 %v19166_v13  ;;  %v442_v12 = vld [vmem:[%s20124_s7 + $0x98] sm:$0xff]  ;;  %v445_v13 = vld [vmem:[%s20124_s7 + $0xb0] sm:$0xff] }
 0x253   :  { %19168 = vmatprep.subr.bf16.mxu0 %v19972_v32  ;;  %19174 = vmatprep.subr.bf16.mxu1 %v19972_v32  ;;  %v19220_v15 = vpack.c.bf16 %v442_v12, %v441_v11  ;;  %v19226_v16 = vpack.c.bf16 %v446_v14, %v445_v13  ;;  %v484_v11 = vld [vmem:[%s20209_s11 + $0xe8] sm:$0xff]  ;;  %v481_v14 = vld [vmem:[%s20209_s11 + $0xd0] sm:$0xff] }
 0x255   :  { %17548 = vmatmul.mubr.msk.f32.vlgmr.msra.gmra.mrb[4].mxu0 %vm544_vm3, %v20091_v3  ;;  %17559 = vmatmul.mubr.msk.f32.vlgmr.msra.gmra.mrb[4].mxu1 %vm544_vm3, %v20091_v3 }
 0x256   :  { %19170 = vmatpush3.bf16.msra.mxu0 %v19169_v18  ;;  %19176 = vmatpush3.bf16.msra.mxu1 %v19175_v19  ;;  %v448_v18 = vld [vmem:[%s20124_s7 + $0xc8] sm:$0xff]  ;;  %v451_v19 = vld [vmem:[%s20124_s7 + $0xe0] sm:$0xff] }
 0x257   :  { %19171 = vmatprep.subr.bf16.mxu0 %v19972_v32  ;;  %19177 = vmatprep.subr.bf16.mxu1 %v19972_v32  ;;  %v19229_v21 = vpack.c.bf16 %v448_v18, %v447_v17  ;;  %v19235_v22 = vpack.c.bf16 %v452_v20, %v451_v19  ;;  %v486_v17 = vld [vmem:[%s20209_s11 + $0xf8] sm:$0xff] }
 0x258   :  { %17569 = vmatprep.mubr.msk.f32.mxu0 %vm19968_vm0, %v19967_v4  ;;  %17580 = vmatprep.mubr.msk.f32.mxu1 %vm19968_vm0, %v19967_v4 }
 0x25a   :  { %19173 = vmatpush3.bf16.msra.mxu0 %v19172_v24  ;;  %19179 = vmatpush3.bf16.msra.mxu1 %v19178_v25  ;;  %v450_v24 = vld [vmem:[%s20124_s7 + $0xd8] sm:$0xff]  ;;  %v453_v25 = vld [vmem:[%s20124_s7 + $0xf0] sm:$0xff]  ;;  %s21166_s7 = sld [smem:[%s22257_s0 + %s19991_s4]]   ;;  %s20006_s4 = smov 37  }
 0x25b   :  { %19180 = vmatprep.subr.bf16.mxu0 %v19972_v32  ;;  %19186 = vmatprep.subr.bf16.mxu1 %v19972_v32  ;;  %v19232_v27 = vpack.c.bf16 %v450_v24, %v449_v23  ;;  %v19238_v28 = vpack.c.bf16 %v454_v26, %v453_v25 }
 0x25d   :  { %17570 = vmatmul.mubr.msk.f32.vlgmr.msra.gmra.mrb[6].mxu0 %vm544_vm3, %v20091_v3  ;;  %17581 = vmatmul.mubr.msk.f32.vlgmr.msra.gmra.mrb[6].mxu1 %vm544_vm3, %v20091_v3 }
 0x25e   :  { %19182 = vmatpush3.bf16.msra.mxu0 %v19181_v30  ;;  %19188 = vmatpush3.bf16.msra.mxu1 %v19187_v31  ;;  %v456_v30 = vld [vmem:[%s20209_s11 + $0x8] sm:$0xff]  ;;  %v459_v31 = vld [vmem:[%s20209_s11 + $0x20] sm:$0xff] }
 0x25f   :  { %19183 = vmatprep.subr.bf16.mxu0 %v19972_v32  ;;  %19189 = vmatprep.subr.bf16.mxu1 %v19972_v32  ;;  %v19241_v34 = vpack.c.bf16 %v456_v30, %v455_v29  ;;  %v19247_v35 = vpack.c.bf16 %v460_v33, %v459_v31 }
 0x260   :  { %17591 = vmatprep.mubr.msk.f32.mxu0 %vm19968_vm0, %v19967_v4  ;;  %17602 = vmatprep.mubr.msk.f32.mxu1 %vm19968_vm0, %v19967_v4 }
 0x262   :  { %19185 = vmatpush3.bf16.msra.mxu0 %v19184_v37  ;;  %19191 = vmatpush3.bf16.msra.mxu1 %v19190_v38  ;;  %v458_v37 = vld [vmem:[%s20209_s11 + $0x18] sm:$0xff]  ;;  %v461_v38 = vld [vmem:[%s20209_s11 + $0x30] sm:$0xff] }
 0x263   :  { %19192 = vmatprep.subr.bf16.mxu0 %v19972_v32  ;;  %19198 = vmatprep.subr.bf16.mxu1 %v19972_v32  ;;  %v19244_v40 = vpack.c.bf16 %v458_v37, %v457_v36  ;;  %v19250_v41 = vpack.c.bf16 %v462_v39, %v461_v38  ;;  %v20340_v37 = vld [vmem:[%s20333_s15] sm:$0x7]  ;;  %v20343_v38 = vld [vmem:[%s20333_s15 + $0x4] sm:$0x7] }
 0x264   :  { %v1111_v39 = vrot.slane %v20340_v37, %v20038_v9 }
 0x265   :  { %17592 = vmatmul.mubr.msk.f32.vlgmr.msra.gmra.mrb[8].mxu0 %vm544_vm3, %v20091_v3  ;;  %17603 = vmatmul.mubr.msk.f32.vlgmr.msra.gmra.mrb[8].mxu1 %vm544_vm3, %v20091_v3 }
 0x266   :  { %19194 = vmatpush3.bf16.msra.mxu0 %v19193_v43  ;;  %19200 = vmatpush3.bf16.msra.mxu1 %v19199_v44  ;;  %v464_v43 = vld [vmem:[%s20209_s11 + $0x48] sm:$0xff]  ;;  %v467_v44 = vld [vmem:[%s20209_s11 + $0x60] sm:$0xff] }
 0x267   :  { %19195 = vmatprep.subr.bf16.mxu0 %v19972_v32  ;;  %19201 = vmatprep.subr.bf16.mxu1 %v19972_v32  ;;  %v19253_v46 = vpack.c.bf16 %v464_v43, %v463_v42  ;;  %v19259_v47 = vpack.c.bf16 %v468_v45, %v467_v44  ;;  %v519_v42 = vrot.slane %v20343_v38, %v20035_v8 }
 0x268   :  { %17613 = vmatprep.mubr.msk.f32.mxu0 %vm19968_vm0, %v19967_v4  ;;  %17624 = vmatprep.mubr.msk.f32.mxu1 %vm19968_vm0, %v19967_v4 }
 0x26a   :  { %19197 = vmatpush3.bf16.msra.mxu0 %v19196_v49  ;;  %19203 = vmatpush3.bf16.msra.mxu1 %v19202_v50  ;;  %v466_v49 = vld [vmem:[%s20209_s11 + $0x58] sm:$0xff]  ;;  %v469_v50 = vld [vmem:[%s20209_s11 + $0x70] sm:$0xff] }
 0x26b   :  { %19204 = vmatprep.subr.bf16.mxu0 %v19972_v32  ;;  %19210 = vmatprep.subr.bf16.mxu1 %v19972_v32  ;;  %v19256_v52 = vpack.c.bf16 %v466_v49, %v465_v48  ;;  %v19262_v53 = vpack.c.bf16 %v470_v51, %v469_v50  ;;  %v20356_v51 = vld [vmem:[%s20333_s15 + $0x8] sm:$0x7] }
 0x26d   :  { %17614 = vmatmul.mubr.msk.f32.vlgmr.msra.gmra.mrb[10].mxu0 %vm544_vm3, %v20091_v3  ;;  %17625 = vmatmul.mubr.msk.f32.vlgmr.msra.gmra.mrb[10].mxu1 %vm544_vm3, %v20091_v3 }
 0x26e   :  { %19206 = vmatpush3.bf16.msra.mxu0 %v19205_v55  ;;  %19212 = vmatpush3.bf16.msra.mxu1 %v19211_v56  ;;  %v472_v55 = vld [vmem:[%s20209_s11 + $0x88] sm:$0xff]  ;;  %v475_v56 = vld [vmem:[%s20209_s11 + $0xa0] sm:$0xff] }
 0x26f   :  { %19207 = vmatprep.subr.bf16.mxu0 %v19972_v32  ;;  %19213 = vmatprep.subr.bf16.mxu1 %v19972_v32  ;;  %v19265_v58 = vpack.c.bf16 %v472_v55, %v471_v54  ;;  %v19271_v59 = vpack.c.bf16 %v476_v57, %v475_v56  ;;  %v523_v55 = vrot.slane %v20356_v51, %v20035_v8 }
 0x270   :  { %17635 = vmatprep.mubr.msk.f32.mxu0 %vm19968_vm0, %v19967_v4  ;;  %17646 = vmatprep.mubr.msk.f32.mxu1 %vm19968_vm0, %v19967_v4 }
 0x272   :  { %19209 = vmatpush3.bf16.msra.mxu0 %v19208_v61  ;;  %19215 = vmatpush3.bf16.msra.mxu1 %v19214_v62  ;;  %v474_v61 = vld [vmem:[%s20209_s11 + $0x98] sm:$0xff]  ;;  %v477_v62 = vld [vmem:[%s20209_s11 + $0xb0] sm:$0xff] }
 0x273   :  { %19216 = vmatprep.subr.bf16.mxu0 %v19972_v32  ;;  %19222 = vmatprep.subr.bf16.mxu1 %v19972_v32  ;;  %v19268_v0 = vpack.c.bf16 %v474_v61, %v473_v60  ;;  %v19274_v1 = vpack.c.bf16 %v478_v63, %v477_v62 }
 0x275   :  { %17636 = vmatmul.mubr.msk.f32.vlgmr.msra.gmra.mrb[12].mxu0 %vm544_vm3, %v20091_v3  ;;  %17647 = vmatmul.mubr.msk.f32.vlgmr.msra.gmra.mrb[12].mxu1 %vm544_vm3, %v20091_v3 }
 0x276   :  { %19218 = vmatpush3.bf16.msra.mxu0 %v19217_v5  ;;  %19224 = vmatpush3.bf16.msra.mxu1 %v19223_v6  ;;  %v480_v5 = vld [vmem:[%s20209_s11 + $0xc8] sm:$0xff]  ;;  %v483_v6 = vld [vmem:[%s20209_s11 + $0xe0] sm:$0xff] }
 0x277   :  { %19219 = vmatprep.subr.bf16.mxu0 %v19972_v32  ;;  %19225 = vmatprep.subr.bf16.mxu1 %v19972_v32  ;;  %v19277_v12 = vpack.c.bf16 %v480_v5, %v479_v2  ;;  %v19283_v13 = vpack.c.bf16 %v484_v11, %v483_v6  ;;  %v20383_v2 = vld [vmem:[%s20333_s15 + $0x14] sm:$0x7] }
 0x278   :  { %17657 = vmatprep.mubr.msk.f32.mxu0 %vm19968_vm0, %v19967_v4  ;;  %17668 = vmatprep.mubr.msk.f32.mxu1 %vm19968_vm0, %v19967_v4  ;;  %v1131_v6 = vrot.slane %v20383_v2, %v20038_v9 }
 0x27a   :  { %19221 = vmatpush3.bf16.msra.mxu0 %v19220_v15  ;;  %19227 = vmatpush3.bf16.msra.mxu1 %v19226_v16  ;;  %v482_v15 = vld [vmem:[%s20209_s11 + $0xd8] sm:$0xff]  ;;  %v485_v16 = vld [vmem:[%s20209_s11 + $0xf0] sm:$0xff]  ;;  %s21222_s11 = sld [smem:[%s22257_s0 + %s19992_s8]]   ;;  %s20007_s8 = smov 40  }
 0x27b   :  { %19228 = vmatprep.subr.bf16.mxu0 %v19972_v32  ;;  %19234 = vmatprep.subr.bf16.mxu1 %v19972_v32  ;;  %v19280_v18 = vpack.c.bf16 %v482_v15, %v481_v14  ;;  %v19286_v19 = vpack.c.bf16 %v486_v17, %v485_v16 }
 0x27d   :  { %17658 = vmatmul.mubr.msk.f32.vlgmr.msra.gmra.mrb[14].mxu0 %vm544_vm3, %v20091_v3  ;;  %17669 = vmatmul.mubr.msk.f32.vlgmr.msra.gmra.mrb[14].mxu1 %vm544_vm3, %v20091_v3 }
 0x27e   :  { %19230 = vmatpush3.bf16.msra.mxu0 %v19229_v21  ;;  %19236 = vmatpush3.bf16.msra.mxu1 %v19235_v22 }
 0x27f   :  { %19231 = vmatprep.subr.bf16.mxu0 %v19972_v32  ;;  %19237 = vmatprep.subr.bf16.mxu1 %v19972_v32 }
 0x280   :  { %17679 = vmatprep.mubr.msk.f32.mxu0 %vm19968_vm0, %v19967_v4  ;;  %17690 = vmatprep.mubr.msk.f32.mxu1 %vm19968_vm0, %v19967_v4 }
 0x282   :  { %19233 = vmatpush3.bf16.msra.mxu0 %v19232_v27  ;;  %19239 = vmatpush3.bf16.msra.mxu1 %v19238_v28 }
 0x283   :  { %19240 = vmatprep.subr.bf16.mxu0 %v19972_v32  ;;  %19246 = vmatprep.subr.bf16.mxu1 %v19972_v32 }
 0x285   :  { %17680 = vmatmul.mubr.msk.f32.vlgmr.msra.gmra.mrb[16].mxu0 %vm544_vm3, %v20091_v3  ;;  %17691 = vmatmul.mubr.msk.f32.vlgmr.msra.gmra.mrb[16].mxu1 %vm544_vm3, %v20091_v3 }
 0x286   :  { %19242 = vmatpush3.bf16.msra.mxu0 %v19241_v34  ;;  %19248 = vmatpush3.bf16.msra.mxu1 %v19247_v35 }
 0x287   :  { %19243 = vmatprep.subr.bf16.mxu0 %v19972_v32  ;;  %19249 = vmatprep.subr.bf16.mxu1 %v19972_v32 }
 0x288   :  { %17701 = vmatprep.mubr.msk.f32.mxu0 %vm19968_vm0, %v19967_v4  ;;  %17712 = vmatprep.mubr.msk.f32.mxu1 %vm19968_vm0, %v19967_v4 }
 0x28a   :  { %19245 = vmatpush3.bf16.msra.mxu0 %v19244_v40  ;;  %19251 = vmatpush3.bf16.msra.mxu1 %v19250_v41  ;;  %v1115_v40 = vrot.slane %v20343_v38, %v20038_v9  ;;  %v515_v41 = vrot.slane %v20340_v37, %v20035_v8 }
 0x28b   :  { %19252 = vmatprep.subr.bf16.mxu0 %v19972_v32  ;;  %19258 = vmatprep.subr.bf16.mxu1 %v19972_v32 }
 0x28d   :  { %17702 = vmatmul.mubr.msk.f32.vlgmr.msra.gmra.mrb[18].mxu0 %vm544_vm3, %v20091_v3  ;;  %17713 = vmatmul.mubr.msk.f32.vlgmr.msra.gmra.mrb[18].mxu1 %vm544_vm3, %v20091_v3 }
 0x28e   :  { %19254 = vmatpush3.bf16.msra.mxu0 %v19253_v46  ;;  %19260 = vmatpush3.bf16.msra.mxu1 %v19259_v47 }
 0x28f   :  { %19255 = vmatprep.subr.bf16.mxu0 %v19972_v32  ;;  %19261 = vmatprep.subr.bf16.mxu1 %v19972_v32 }
 0x290   :  { %17723 = vmatprep.mubr.msk.f32.mxu0 %vm19968_vm0, %v19967_v4  ;;  %17734 = vmatprep.mubr.msk.f32.mxu1 %vm19968_vm0, %v19967_v4 }
 0x292   :  { %19257 = vmatpush3.bf16.msra.mxu0 %v19256_v52  ;;  %19263 = vmatpush3.bf16.msra.mxu1 %v19262_v53  ;;  %v20359_v52 = vld [vmem:[%s20333_s15 + $0xc] sm:$0x7]  ;;  %v1119_v53 = vrot.slane %v20356_v51, %v20038_v9 }
 0x293   :  { %19264 = vmatprep.subr.bf16.mxu0 %v19972_v32  ;;  %19270 = vmatprep.subr.bf16.mxu1 %v19972_v32  ;;  %v1123_v54 = vrot.slane %v20359_v52, %v20038_v9  ;;  %v527_v56 = vrot.slane %v20359_v52, %v20035_v8 }
 0x295   :  { %17724 = vmatmul.mubr.msk.f32.vlgmr.msra.gmra.mrb[20].mxu0 %vm544_vm3, %v20091_v3  ;;  %17735 = vmatmul.mubr.msk.f32.vlgmr.msra.gmra.mrb[20].mxu1 %vm544_vm3, %v20091_v3 }
 0x296   :  { %19266 = vmatpush3.bf16.msra.mxu0 %v19265_v58  ;;  %19272 = vmatpush3.bf16.msra.mxu1 %v19271_v59 }
 0x297   :  { %19267 = vmatprep.subr.bf16.mxu0 %v19972_v32  ;;  %19273 = vmatprep.subr.bf16.mxu1 %v19972_v32 }
 0x298   :  { %17745 = vmatprep.mubr.msk.f32.mxu0 %vm19968_vm0, %v19967_v4  ;;  %17756 = vmatprep.mubr.msk.f32.mxu1 %vm19968_vm0, %v19967_v4 }
 0x29a   :  { %19269 = vmatpush3.bf16.msra.mxu0 %v19268_v0  ;;  %19275 = vmatpush3.bf16.msra.mxu1 %v19274_v1  ;;  %v20380_v1 = vld [vmem:[%s20333_s15 + $0x10] sm:$0x7] }
 0x29b   :  { %19276 = vmatprep.subr.bf16.mxu0 %v19972_v32  ;;  %19282 = vmatprep.subr.bf16.mxu1 %v19972_v32  ;;  %v1127_v5 = vrot.slane %v20380_v1, %v20038_v9  ;;  %v531_v11 = vrot.slane %v20380_v1, %v20035_v8 }
 0x29d   :  { %17746 = vmatmul.mubr.msk.f32.vlgmr.msra.gmra.mrb[22].mxu0 %vm544_vm3, %v20091_v3  ;;  %17757 = vmatmul.mubr.msk.f32.vlgmr.msra.gmra.mrb[22].mxu1 %vm544_vm3, %v20091_v3 }
 0x29e   :  { %19278 = vmatpush3.bf16.msra.mxu0 %v19277_v12  ;;  %19284 = vmatpush3.bf16.msra.mxu1 %v19283_v13  ;;  %v535_v12 = vrot.slane %v20383_v2, %v20035_v8 }
 0x29f   :  { %19279 = vmatprep.subr.bf16.mxu0 %v19972_v32  ;;  %19285 = vmatprep.subr.bf16.mxu1 %v19972_v32 }
 0x2a0   :  { %17767 = vmatprep.mubr.msk.f32.mxu0 %vm19968_vm0, %v19967_v4  ;;  %17778 = vmatprep.mubr.msk.f32.mxu1 %vm19968_vm0, %v19967_v4 }
 0x2a2   :  { %19281 = vmatpush3.bf16.msra.mxu0 %v19280_v18  ;;  %19287 = vmatpush3.bf16.msra.mxu1 %v19286_v19 }
 0x2a3   :  { %17781 = vmatprep.subr.mxu0 %v19967_v4  ;;  %17786 = vmatprep.subr.mxu1 %v19967_v4 }
 0x2a5   :  { %17768 = vmatmul.mubr.msk.f32.vlgmr.msra.gmra.mrb[24].mxu0 %vm544_vm3, %v20091_v3  ;;  %17779 = vmatmul.mubr.msk.f32.vlgmr.msra.gmra.mrb[24].mxu1 %vm544_vm3, %v20091_v3 }
 0x2a6   :  { %17783 = vmatprep.mubr.msk.f32.mxu0 %vm19968_vm0, %v19967_v4  ;;  %17788 = vmatprep.mubr.msk.f32.mxu1 %vm19968_vm0, %v19967_v4 }
 0x320   :  { %v614_v20 = vpop.f32.mrb[2].mxu0  ;;  %v684_v21 = vpop.f32.mrb[2].mxu1 }
 0x321   :  { %v17527_v22 = vpop.f32.mrb[3].mxu0  ;;  %v17538_v23 = vpop.f32.mrb[3].mxu1  ;;  %v615_v49 = vadd.f32 %v614_v20, %v515_v41  ;;  %v685_v50 = vadd.f32 %v684_v21, %v519_v42  ;;  %v493_v21 = vld [vmem:[%s20333_s15 + $0x18] sm:$0x7]  ;;  %v1707_v41 = vrot.slane %v20343_v38, %v20041_v10 }
 0x322   :  { %v494_v22 = vld [vmem:[%s20333_s15 + $0x1c] sm:$0x7]  ;;  %v1135_v23 = vrot.slane %v493_v21, %v20038_v9  ;;  %s21307_s15 = sld [smem:[%s22257_s0 + %s19993_s12]]   ;;  %s20008_s12 = smov 39  }
 0x328   :  { %v754_v24 = vpop.f32.mrb[4].mxu0  ;;  %v824_v25 = vpop.f32.mrb[4].mxu1 }
 0x329   :  { %v17549_v26 = vpop.f32.mrb[5].mxu0  ;;  %v17560_v27 = vpop.f32.mrb[5].mxu1  ;;  %v755_v63 = vadd.f32 %v754_v24, %v523_v55  ;;  %v825_v0 = vadd.f32 %v824_v25, %v527_v56  ;;  %v1139_v24 = vrot.slane %v494_v22, %v20038_v9  ;;  %v539_v25 = vrot.slane %v493_v21, %v20035_v8 }
 0x32a   :  { %v543_v26 = vrot.slane %v494_v22, %v20035_v8 }
 0x330   :  { %v20326_v28 = vpop.f32.mrb[6].mxu0  ;;  %v20328_v29 = vpop.f32.mrb[6].mxu1 }
 0x331   :  { %v17571_v30 = vpop.f32.mrb[7].mxu0  ;;  %v17582_v31 = vpop.f32.mrb[7].mxu1  ;;  %v895_v19 = vadd.f32 %v20326_v28, %v531_v11  ;;  %v965_v20 = vadd.f32 %v20328_v29, %v535_v12 }
 0x338   :  { %v20335_v33 = vpop.f32.mrb[8].mxu0  ;;  %v20337_v34 = vpop.f32.mrb[8].mxu1 }
 0x339   :  { %v17593_v35 = vpop.f32.mrb[9].mxu0  ;;  %v17604_v36 = vpop.f32.mrb[9].mxu1 }
 0x33a   :  { %v1035_v36 = vadd.f32 %v20335_v33, %v539_v25 }
 0x340   :  { %v1206_v43 = vpop.f32.mrb[10].mxu0  ;;  %v1276_v44 = vpop.f32.mrb[10].mxu1 }
 0x341   :  { %v1207_v45 = vadd.f32 %v1206_v43, %v1111_v39  ;;  %v1277_v46 = vadd.f32 %v1276_v44, %v1115_v40  ;;  %v17615_v47 = vpop.f32.mrb[11].mxu0  ;;  %v17626_v48 = vpop.f32.mrb[11].mxu1  ;;  %v1105_v39 = vadd.f32 %v20337_v34, %v543_v26  ;;  %v1703_v40 = vrot.slane %v20340_v37, %v20041_v10 }
 0x342   :  { %v1715_v37 = vrot.slane %v20359_v52, %v20041_v10 }
 0x343   :  { %17782 = vmatpush3.xpose.msk.msra.mxu0 %vm2292_vm4, %v1207_v45  ;;  %17787 = vmatpush3.xpose.msk.msra.mxu1 %vm2292_vm4, %v1277_v46 }
 0x344   :  { %17791 = vmatprep.subr.mxu0 %v19967_v4  ;;  %17796 = vmatprep.subr.mxu1 %v19967_v4 }
 0x346   :  { %17784 = vmatmul.mubr.msk.f32.vlgmr.msra.gmra.mrb[26].mxu0 %vm2292_vm4, %v615_v49  ;;  %17789 = vmatmul.mubr.msk.f32.vlgmr.msra.gmra.mrb[26].mxu1 %vm2292_vm4, %v685_v50  ;;  %v1719_v50 = vrot.slane %v20380_v1, %v20041_v10 }
 0x347   :  { %17793 = vmatprep.mubr.msk.f32.mxu0 %vm19968_vm0, %v19967_v4  ;;  %17798 = vmatprep.mubr.msk.f32.mxu1 %vm19968_vm0, %v19967_v4 }
 0x348   :  { %v1346_v57 = vpop.f32.mrb[12].mxu0  ;;  %v1416_v58 = vpop.f32.mrb[12].mxu1 }
 0x349   :  { %v1347_v59 = vadd.f32 %v1346_v57, %v1119_v53  ;;  %v1417_v60 = vadd.f32 %v1416_v58, %v1123_v54  ;;  %v17637_v61 = vpop.f32.mrb[13].mxu0  ;;  %v17648_v62 = vpop.f32.mrb[13].mxu1  ;;  %v1723_v53 = vrot.slane %v20383_v2, %v20041_v10 }
 0x34b   :  { %17792 = vmatpush3.xpose.msk.msra.mxu0 %vm2292_vm4, %v1347_v59  ;;  %17797 = vmatpush3.xpose.msk.msra.mxu1 %vm2292_vm4, %v1417_v60  ;;  %v1727_v59 = vrot.slane %v493_v21, %v20041_v10  ;;  %v1731_v60 = vrot.slane %v494_v22, %v20041_v10 }
 0x34c   :  { %17801 = vmatprep.subr.mxu0 %v19967_v4  ;;  %17806 = vmatprep.subr.mxu1 %v19967_v4 }
 0x34e   :  { %17794 = vmatmul.mubr.msk.f32.vlgmr.msra.gmra.mrb[28].mxu0 %vm2292_vm4, %v755_v63  ;;  %17799 = vmatmul.mubr.msk.f32.vlgmr.msra.gmra.mrb[28].mxu1 %vm2292_vm4, %v825_v0 }
 0x34f   :  { %17803 = vmatprep.mubr.msk.f32.mxu0 %vm19968_vm0, %v19967_v4  ;;  %17808 = vmatprep.mubr.msk.f32.mxu1 %vm19968_vm0, %v19967_v4 }
 0x350   :  { %v1486_v13 = vpop.f32.mrb[14].mxu0  ;;  %v1556_v14 = vpop.f32.mrb[14].mxu1 }
 0x351   :  { %v1487_v15 = vadd.f32 %v1486_v13, %v1127_v5  ;;  %v1557_v16 = vadd.f32 %v1556_v14, %v1131_v6  ;;  %v17659_v17 = vpop.f32.mrb[15].mxu0  ;;  %v17670_v18 = vpop.f32.mrb[15].mxu1 }
 0x353   :  { %17802 = vmatpush3.xpose.msk.msra.mxu0 %vm2292_vm4, %v1487_v15  ;;  %17807 = vmatpush3.xpose.msk.msra.mxu1 %vm2292_vm4, %v1557_v16 }
 0x354   :  { %17811 = vmatprep.subr.mxu0 %v19967_v4  ;;  %17816 = vmatprep.subr.mxu1 %v19967_v4 }
 0x356   :  { %17804 = vmatmul.mubr.msk.f32.vlgmr.msra.gmra.mrb[30].mxu0 %vm2292_vm4, %v895_v19  ;;  %17809 = vmatmul.mubr.msk.f32.vlgmr.msra.gmra.mrb[30].mxu1 %vm2292_vm4, %v965_v20 }
 0x357   :  { %17813 = vmatprep.mubr.msk.f32.mxu0 %vm19968_vm0, %v19967_v4  ;;  %17818 = vmatprep.mubr.msk.f32.mxu1 %vm19968_vm0, %v19967_v4 }
 0x358   :  { %v1626_v27 = vpop.f32.mrb[16].mxu0  ;;  %v1696_v28 = vpop.f32.mrb[16].mxu1 }
 0x359   :  { %v1627_v29 = vadd.f32 %v1626_v27, %v1135_v23  ;;  %v1697_v30 = vadd.f32 %v1696_v28, %v1139_v24  ;;  %v17681_v31 = vpop.f32.mrb[17].mxu0  ;;  %v17692_v35 = vpop.f32.mrb[17].mxu1 }
 0x35b   :  { %17812 = vmatpush3.xpose.msk.msra.mxu0 %vm2292_vm4, %v1627_v29  ;;  %17817 = vmatpush3.xpose.msk.msra.mxu1 %vm2292_vm4, %v1697_v30 }
 0x35c   :  { %17821 = vmatprep.subr.mxu0 %v19967_v4  ;;  %17826 = vmatprep.subr.mxu1 %v19967_v4 }
 0x35e   :  { %17814 = vmatmul.mubr.msk.f32.vlgmr.msra.gmra.mrb[32].mxu0 %vm2292_vm4, %v1035_v36  ;;  %17819 = vmatmul.mubr.msk.f32.vlgmr.msra.gmra.mrb[32].mxu1 %vm2292_vm4, %v1105_v39 }
 0x35f   :  { %17823 = vmatprep.mubr.msk.f32.mxu0 %vm19968_vm0, %v19967_v4  ;;  %17828 = vmatprep.mubr.msk.f32.mxu1 %vm19968_vm0, %v19967_v4 }
 0x360   :  { %v1798_v33 = vpop.f32.mrb[18].mxu0  ;;  %v1868_v34 = vpop.f32.mrb[18].mxu1 }
 0x361   :  { %v1799_v42 = vadd.f32 %v1798_v33, %v1703_v40  ;;  %v1869_v43 = vadd.f32 %v1868_v34, %v1707_v41  ;;  %v17703_v44 = vpop.f32.mrb[19].mxu0  ;;  %v17714_v45 = vpop.f32.mrb[19].mxu1 }
 0x363   :  { %17822 = vmatpush3.msra.mxu0 %v1799_v42  ;;  %17827 = vmatpush3.msra.mxu1 %v1869_v43 }
 0x364   :  { %17831 = vmatprep.subr.mxu0 %v19967_v4  ;;  %17836 = vmatprep.subr.mxu1 %v19967_v4 }
 0x368   :  { %v20439_v38 = vpop.f32.mrb[20].mxu0  ;;  %v2008_v46 = vpop.f32.mrb[20].mxu1 }
 0x369   :  { %v20441_v47 = vadd.f32 %v2008_v46, %v1715_v37  ;;  %v17725_v48 = vpop.f32.mrb[21].mxu0  ;;  %v17736_v49 = vpop.f32.mrb[21].mxu1 }
 0x370   :  { %v2078_v54 = vpop.f32.mrb[22].mxu0  ;;  %v2148_v55 = vpop.f32.mrb[22].mxu1 }
 0x371   :  { %v20447_v56 = vadd.f32 %v2078_v54, %v1719_v50  ;;  %v20449_v57 = vadd.f32 %v2148_v55, %v1723_v53  ;;  %v17747_v52 = vpop.f32.mrb[23].mxu0  ;;  %v17758_v58 = vpop.f32.mrb[23].mxu1 }
 0x378   :  { %v2218_v61 = vpop.f32.mrb[24].mxu0  ;;  %v2288_v62 = vpop.f32.mrb[24].mxu1 }
 0x379   :  { %v20453_v63 = vadd.f32 %v2218_v61, %v1727_v59  ;;  %v20455_v0 = vadd.f32 %v2288_v62, %v1731_v60  ;;  %v17769_v1 = vpop.f32.mrb[25].mxu0  ;;  %v17780_v2 = vpop.f32.mrb[25].mxu1 }
 0x419   :  { %v2365_v5 = vpop.f32.mrb[26].mxu0  ;;  %v2441_v6 = vpop.f32.mrb[26].mxu1 }
 0x41a   :  { %v17785_v11 = vpop.f32.mrb[27].mxu0  ;;  %v17790_v12 = vpop.f32.mrb[27].mxu1  ;;  %v2904_v13 = vsel %vm218_vm1, %v2441_v6, -inf  ;;  %v2901_v14 = vsel %vm218_vm1, %v2365_v5, -inf }
 0x41b   :  { %2905 = vmax.xlane.f32.xlu0 %v2904_v13  ;;  %2902 = vmax.xlane.f32.xlu1 %v2901_v14 }
 0x421   :  { %v2517_v15 = vpop.f32.mrb[28].mxu0  ;;  %v2593_v16 = vpop.f32.mrb[28].mxu1 }
 0x422   :  { %v17795_v17 = vpop.f32.mrb[29].mxu0  ;;  %v17800_v18 = vpop.f32.mrb[29].mxu1  ;;  %v2910_v19 = vsel %vm218_vm1, %v2593_v16, -inf  ;;  %v2907_v20 = vsel %vm218_vm1, %v2517_v15, -inf }
 0x423   :  { %2911 = vmax.xlane.f32.xlu0 %v2910_v19  ;;  %2908 = vmax.xlane.f32.xlu1 %v2907_v20 }
 0x429   :  { %v2669_v21 = vpop.f32.mrb[30].mxu0  ;;  %v2745_v22 = vpop.f32.mrb[30].mxu1 }
 0x42a   :  { %v17805_v23 = vpop.f32.mrb[31].mxu0  ;;  %v17810_v24 = vpop.f32.mrb[31].mxu1  ;;  %v2916_v25 = vsel %vm218_vm1, %v2745_v22, -inf  ;;  %v2913_v26 = vsel %vm218_vm1, %v2669_v21, -inf }
 0x42b   :  { %2917 = vmax.xlane.f32.xlu0 %v2916_v25  ;;  %2914 = vmax.xlane.f32.xlu1 %v2913_v26 }
 0x431   :  { %v2821_v27 = vpop.f32.mrb[32].mxu0  ;;  %v2897_v28 = vpop.f32.mrb[32].mxu1 }
 0x432   :  { %v17815_v29 = vpop.f32.mrb[33].mxu0  ;;  %v17820_v30 = vpop.f32.mrb[33].mxu1  ;;  %v2922_v31 = vsel %vm218_vm1, %v2897_v28, -inf  ;;  %v2919_v35 = vsel %vm218_vm1, %v2821_v27, -inf }
 0x433   :  { %2923 = vmax.xlane.f32.xlu0 %v2922_v31  ;;  %2920 = vmax.xlane.f32.xlu1 %v2919_v35 }
 0x4a8   :  { %v2906_v36 = vpop.xlane.xlu0 %2905  ;;  %v2903_v39 = vpop.xlane.xlu1 %2902 }
 0x4a9   :  { %v2926_v40 = vsub.f32 %v2441_v6, %v2906_v36  ;;  %v2925_v41 = vsub.f32 %v2365_v5, %v2903_v39 }
 0x4ab   :  { %v2935_v33 = vmul.f32 1.442695, %v2926_v40  ;;  %v2933_v34 = vmul.f32 1.442695, %v2925_v41 }
 0x4ad   :  { %19819 = vpow2.f32 %v2935_v33 }
 0x4ae   :  { %19821 = vpow2.f32 %v2933_v34 }
 0x4b0   :  { %v2912_v42 = vpop.xlane.xlu0 %2911  ;;  %v2909_v43 = vpop.xlane.xlu1 %2908 }
 0x4b1   :  { %v2928_v44 = vsub.f32 %v2593_v16, %v2912_v42  ;;  %v2927_v45 = vsub.f32 %v2517_v15, %v2909_v43 }
 0x4b3   :  { %v2939_v37 = vmul.f32 1.442695, %v2928_v44  ;;  %v2937_v46 = vmul.f32 1.442695, %v2927_v45 }
 0x4b5   :  { %19823 = vpow2.f32 %v2939_v37 }
 0x4b6   :  { %19825 = vpow2.f32 %v2937_v46  ;;  %v498_v46 = vld [vmem:[%s20514_s19 + $0xc] sm:$0xf] }
 0x4b7   :  { %v19820_v48 = vpop.eup %19819 }
 0x4b8   :  { %v19822_v49 = vpop.eup %19821  ;;  %v2918_v50 = vpop.xlane.xlu0 %2917  ;;  %v2952_v54 = vsel %vm218_vm1, %v19820_v48, 0.0 }
 0x4b9   :  { %v2915_v53 = vpop.xlane.xlu1 %2914  ;;  %v2930_v55 = vsub.f32 %v2745_v22, %v2918_v50  ;;  %2953 = vadd.xlane.f32.xlu0 %v2952_v54  ;;  %v2949_v58 = vsel %vm218_vm1, %v19822_v49, 0.0 }
 0x4ba   :  { %v2929_v52 = vsub.f32 %v2669_v21, %v2915_v53  ;;  %2950 = vadd.xlane.f32.xlu1 %v2949_v58  ;;  %v499_v58 = vld [vmem:[%s20514_s19 + $0x10] sm:$0xf] }
 0x4bb   :  { %v2943_v59 = vmul.f32 1.442695, %v2930_v55  ;;  %v500_v55 = vld [vmem:[%s20514_s19 + $0x14] sm:$0xf] }
 0x4bc   :  { %v2941_v60 = vmul.f32 1.442695, %v2929_v52 }
 0x4bd   :  { %19827 = vpow2.f32 %v2943_v59 }
 0x4be   :  { %19829 = vpow2.f32 %v2941_v60 }
 0x4bf   :  { %v19824_v61 = vpop.eup %19823 }
 0x4c0   :  { %v19826_v62 = vpop.eup %19825  ;;  %v2924_v1 = vpop.xlane.xlu0 %2923  ;;  %v2958_v5 = vsel %vm218_vm1, %v19824_v61, 0.0 }
 0x4c1   :  { %v2921_v2 = vpop.xlane.xlu1 %2920  ;;  %v2932_v6 = vsub.f32 %v2897_v28, %v2924_v1  ;;  %2959 = vadd.xlane.f32.xlu0 %v2958_v5  ;;  %v2955_v12 = vsel %vm218_vm1, %v19826_v62, 0.0 }
 0x4c2   :  { %v2931_v11 = vsub.f32 %v2821_v27, %v2921_v2  ;;  %2956 = vadd.xlane.f32.xlu1 %v2955_v12  ;;  %v1711_v27 = vrot.slane %v20356_v51, %v20041_v10  ;;  %v501_v2 = vld [vmem:[%s20514_s19 + $0x18] sm:$0xf] }
 0x4c3   :  { %v2947_v13 = vmul.f32 1.442695, %v2932_v6 }
 0x4c4   :  { %v2945_v14 = vmul.f32 1.442695, %v2931_v11  ;;  %v1939_v35 = vadd.f32 %v20439_v38, %v1711_v27 }
 0x4c5   :  { %19831 = vpow2.f32 %v2947_v13 }
 0x4c6   :  { %19833 = vpow2.f32 %v2945_v14 }
 0x4c7   :  { %v19828_v15 = vpop.eup %19827 }
 0x4c8   :  { %v19830_v16 = vpop.eup %19829  ;;  %v2964_v17 = vsel %vm218_vm1, %v19828_v15, 0.0 }
 0x4c9   :  { %2965 = vadd.xlane.f32.xlu0 %v2964_v17  ;;  %v2961_v18 = vsel %vm218_vm1, %v19830_v16, 0.0 }
 0x4ca   :  { %2962 = vadd.xlane.f32.xlu1 %v2961_v18 }
 0x4cf   :  { %v19832_v19 = vpop.eup %19831 }
 0x4d0   :  { %v19834_v20 = vpop.eup %19833  ;;  %v2970_v21 = vsel %vm218_vm1, %v19832_v19, 0.0 }
 0x4d1   :  { %2971 = vadd.xlane.f32.xlu0 %v2970_v21  ;;  %v2967_v22 = vsel %vm218_vm1, %v19834_v20, 0.0 }
 0x4d2   :  { %2968 = vadd.xlane.f32.xlu1 %v2967_v22 }
 0x546   :  { %v2954_v23 = vpop.xlane.xlu0 %2953 }
 0x547   :  { %19835 = vrcp.f32 %v2954_v23  ;;  %v2951_v24 = vpop.xlane.xlu1 %2950 }
 0x548   :  { %19837 = vrcp.f32 %v2951_v24 }
 0x54e   :  { %v2960_v25 = vpop.xlane.xlu0 %2959 }
 0x54f   :  { %19839 = vrcp.f32 %v2960_v25  ;;  %v2957_v26 = vpop.xlane.xlu1 %2956 }
 0x550   :  { %19841 = vrcp.f32 %v2957_v26 }
 0x551   :  { %v19836_v28 = vpop.eup %19835 }
 0x552   :  { %v19838_v29 = vpop.eup %19837  ;;  %v2982_v30 = vmul.f32 %v19836_v28, %v19820_v48 }
 0x553   :  { %v2981_v31 = vmul.f32 %v19838_v29, %v19822_v49  ;;  %v497_v49 = vld [vmem:[%s20514_s19 + $0x8] sm:$0xf] }
 0x554   :  { %17829 = vmatmul.mubr.msk.f32.vlgmr.msra.gmra.mrb[34].mxu1 %vm218_vm1, %v2982_v30 }
 0x555   :  { %17824 = vmatmul.mubr.msk.f32.vlgmr.msra.gmra.mrb[34].mxu0 %vm218_vm1, %v2981_v31  ;;  %17837 = vmatpush3.msra.mxu1 %v20441_v47 }
 0x556   :  { %17832 = vmatpush3.msra.mxu0 %v1939_v35  ;;  %v2966_v36 = vpop.xlane.xlu0 %2965  ;;  %17833 = vmatprep.mubr.msk.f32.mxu0 %vm19968_vm0, %v19967_v4 }
 0x557   :  { %19843 = vrcp.f32 %v2966_v36  ;;  %v2963_v51 = vpop.xlane.xlu1 %2962  ;;  %17838 = vmatprep.mubr.msk.f32.mxu1 %vm19968_vm0, %v19967_v4  ;;  %17841 = vmatprep.subr.mxu0 %v19967_v4 }
 0x558   :  { %19845 = vrcp.f32 %v2963_v51  ;;  %17846 = vmatprep.subr.mxu1 %v19967_v4 }
 0x559   :  { %v19840_v38 = vpop.eup %19839 }
 0x55a   :  { %v19842_v39 = vpop.eup %19841  ;;  %v2984_v40 = vmul.f32 %v19840_v38, %v19824_v61 }
 0x55b   :  { %v2983_v41 = vmul.f32 %v19842_v39, %v19826_v62  ;;  %v502_v62 = vld [vmem:[%s20514_s19 + $0x1c] sm:$0xf] }
 0x55c   :  { %17839 = vmatmul.mubr.msk.f32.vlgmr.msra.gmra.mrb[36].mxu1 %vm218_vm1, %v2984_v40 }
 0x55d   :  { %17834 = vmatmul.mubr.msk.f32.vlgmr.msra.gmra.mrb[36].mxu0 %vm218_vm1, %v2983_v41  ;;  %17847 = vmatpush3.msra.mxu1 %v20449_v57 }
 0x55e   :  { %17842 = vmatpush3.msra.mxu0 %v20447_v56  ;;  %v2972_v47 = vpop.xlane.xlu0 %2971  ;;  %17843 = vmatprep.mubr.msk.f32.mxu0 %vm19968_vm0, %v19967_v4 }
 0x55f   :  { %19847 = vrcp.f32 %v2972_v47  ;;  %v2969_v33 = vpop.xlane.xlu1 %2968  ;;  %17848 = vmatprep.mubr.msk.f32.mxu1 %vm19968_vm0, %v19967_v4  ;;  %17851 = vmatprep.subr.mxu0 %v19967_v4  ;;  %v20573_v47 = vld [vmem:[%s16492_s23] sm:$0x7f]  ;;  %s21612_s23 = sld [smem:[%s22257_s0 + %s19995_s20]]  }
 0x560   :  { %19849 = vrcp.f32 %v2969_v33  ;;  %17856 = vmatprep.subr.mxu1 %v19967_v4 }
 0x561   :  { %v19844_v34 = vpop.eup %19843 }
 0x562   :  { %v19846_v42 = vpop.eup %19845  ;;  %v2986_v43 = vmul.f32 %v19844_v34, %v19828_v15 }
 0x563   :  { %v2985_v57 = vmul.f32 %v19846_v42, %v19830_v16 }
 0x564   :  { %17849 = vmatmul.mubr.msk.f32.vlgmr.msra.gmra.mrb[38].mxu1 %vm218_vm1, %v2986_v43 }
 0x565   :  { %17844 = vmatmul.mubr.msk.f32.vlgmr.msra.gmra.mrb[38].mxu0 %vm218_vm1, %v2985_v57  ;;  %17857 = vmatpush3.msra.mxu1 %v20455_v0  ;;  %v496_v0 = vld [vmem:[%s20514_s19 + $0x4] sm:$0xf] }
 0x566   :  { %17852 = vmatpush3.msra.mxu0 %v20453_v63  ;;  %17853 = vmatprep.mubr.msk.f32.mxu0 %vm19968_vm0, %v19967_v4  ;;  %v495_v63 = vld [vmem:[%s20514_s19] sm:$0xf]  ;;  %s21431_s19 = sld [smem:[%s22257_s0 + %s19994_s16]]   ;;  %s20009_s16 = smov 41  }
 0x567   :  { %17858 = vmatprep.mubr.msk.f32.mxu1 %vm19968_vm0, %v19967_v4  ;;  %17861 = vmatprep.subr.mxu0 %v19967_v4 }
 0x568   :  { %17866 = vmatprep.subr.mxu1 %v19967_v4 }
 0x569   :  { %v19848_v56 = vpop.eup %19847 }
 0x56a   :  { %v19850_v44 = vpop.eup %19849  ;;  %v2988_v45 = vmul.f32 %v19848_v56, %v19832_v19 }
 0x56b   :  { %v2987_v37 = vmul.f32 %v19850_v44, %v19834_v20  ;;  %v4200_v44 = vrot.slane %v20573_v47, %v20035_v8 }
 0x56c   :  { %17859 = vmatmul.mubr.msk.f32.vlgmr.msra.gmra.mrb[40].mxu1 %vm218_vm1, %v2988_v45 }
 0x56d   :  { %17854 = vmatmul.mubr.msk.f32.vlgmr.msra.gmra.mrb[40].mxu0 %vm218_vm1, %v2987_v37  ;;  %17868 = vmatprep.mubr.msk.f32.mxu1 %vm19968_vm0, %v19967_v4 }
 0x56e   :  { %17863 = vmatprep.mubr.msk.f32.mxu0 %vm19968_vm0, %v19967_v4  ;;  %17862 = vmatpush3.msk.msra.mxu0 %vm3576_vm5, %v495_v63 }
 0x56f   :  { %17867 = vmatpush3.msk.msra.mxu1 %vm3576_vm5, %v496_v0  ;;  %17871 = vmatprep.subr.mxu0 %v19967_v4 }
 0x570   :  { %17876 = vmatprep.subr.mxu1 %v19967_v4 }
 0x627   :  { %v3131_v48 = vpop.f32.mrb[34].mxu1 }
 0x628   :  { %v3058_v50 = vpop.f32.mrb[34].mxu0  ;;  %v17830_v53 = vpop.f32.mrb[35].mxu1  ;;  %17869 = vmatmul.mubr.msk.f32.vlgmr.msra.gmra.mrb[42].mxu1 %vm2292_vm4, %v3131_v48 }
 0x629   :  { %v17825_v54 = vpop.f32.mrb[35].mxu0  ;;  %17864 = vmatmul.mubr.msk.f32.vlgmr.msra.gmra.mrb[42].mxu0 %vm2292_vm4, %v3058_v50  ;;  %17877 = vmatpush3.msk.msra.mxu1 %vm3576_vm5, %v498_v46  ;;  %v503_v50 = vld [vmem:[%s16490_s27] sm:$0xff]  ;;  %v504_v53 = vld [vmem:[%s16490_s27 + $0x8] sm:$0xff] }
 0x62a   :  { %17872 = vmatpush3.msk.msra.mxu0 %vm3576_vm5, %v497_v49  ;;  %17873 = vmatprep.mubr.msk.f32.mxu0 %vm19968_vm0, %v19967_v4  ;;  %v19289_v54 = vpack.c.bf16 %v504_v53, %v503_v50 }
 0x62b   :  { %17878 = vmatprep.mubr.msk.f32.mxu1 %vm19968_vm0, %v19967_v4  ;;  %17881 = vmatprep.subr.mxu0 %v19967_v4 }
 0x62c   :  { %17886 = vmatprep.subr.mxu1 %v19967_v4 }
 0x62f   :  { %v3277_v52 = vpop.f32.mrb[36].mxu1 }
 0x630   :  { %v3204_v59 = vpop.f32.mrb[36].mxu0  ;;  %v17840_v60 = vpop.f32.mrb[37].mxu1  ;;  %17879 = vmatmul.mubr.msk.f32.vlgmr.msra.gmra.mrb[44].mxu1 %vm2292_vm4, %v3277_v52  ;;  %v506_v52 = vld [vmem:[%s16490_s27 + $0x18] sm:$0xff] }
 0x631   :  { %v17835_v61 = vpop.f32.mrb[37].mxu0  ;;  %17874 = vmatmul.mubr.msk.f32.vlgmr.msra.gmra.mrb[44].mxu0 %vm2292_vm4, %v3204_v59  ;;  %17887 = vmatpush3.msk.msra.mxu1 %vm3576_vm5, %v500_v55  ;;  %v505_v55 = vld [vmem:[%s16490_s27 + $0x10] sm:$0xff]  ;;  %v508_v59 = vld [vmem:[%s16491_s1 + $0x8] sm:$0xff]  ;;  %s16508_s27 = sld [smem:[%s22257_s0 + %s19996_s24]]  }
 0x632   :  { %17882 = vmatpush3.msk.msra.mxu0 %vm3576_vm5, %v499_v58  ;;  %17883 = vmatprep.mubr.msk.f32.mxu0 %vm19968_vm0, %v19967_v4  ;;  %v507_v58 = vld [vmem:[%s16491_s1] sm:$0xff] }
 0x633   :  { %17888 = vmatprep.mubr.msk.f32.mxu1 %vm19968_vm0, %v19967_v4  ;;  %17891 = vmatprep.subr.mxu0 %v19967_v4  ;;  %v19295_v60 = vpack.c.bf16 %v508_v59, %v507_v58 }
 0x634   :  { %17896 = vmatprep.subr.mxu1 %v19967_v4 }
 0x637   :  { %v3423_v1 = vpop.f32.mrb[38].mxu1 }
 0x638   :  { %v3350_v5 = vpop.f32.mrb[38].mxu0  ;;  %v17850_v6 = vpop.f32.mrb[39].mxu1  ;;  %17889 = vmatmul.mubr.msk.f32.vlgmr.msra.gmra.mrb[46].mxu1 %vm2292_vm4, %v3423_v1 }
 0x639   :  { %v17845_v11 = vpop.f32.mrb[39].mxu0  ;;  %17884 = vmatmul.mubr.msk.f32.vlgmr.msra.gmra.mrb[46].mxu0 %vm2292_vm4, %v3350_v5  ;;  %17897 = vmatpush3.msk.msra.mxu1 %vm3576_vm5, %v502_v62 }
 0x63a   :  { %17892 = vmatpush3.msk.msra.mxu0 %vm3576_vm5, %v501_v2  ;;  %17893 = vmatprep.mubr.msk.f32.mxu0 %vm19968_vm0, %v19967_v4 }
 0x63b   :  { %17898 = vmatprep.mubr.msk.f32.mxu1 %vm19968_vm0, %v19967_v4  ;;  %19288 = vmatprep.subr.bf16.mxu0 %v19972_v32 }
 0x63c   :  { %19294 = vmatprep.subr.bf16.mxu1 %v19972_v32 }
 0x63f   :  { %v3569_v12 = vpop.f32.mrb[40].mxu1 }
 0x640   :  { %v3496_v13 = vpop.f32.mrb[40].mxu0  ;;  %v17860_v14 = vpop.f32.mrb[41].mxu1  ;;  %17899 = vmatmul.mubr.msk.f32.vlgmr.msra.gmra.mrb[48].mxu1 %vm2292_vm4, %v3569_v12 }
 0x641   :  { %v17855_v15 = vpop.f32.mrb[41].mxu0  ;;  %17894 = vmatmul.mubr.msk.f32.vlgmr.msra.gmra.mrb[48].mxu0 %vm2292_vm4, %v3496_v13  ;;  %17920 = vmatprep.mubr.msk.f32.mxu1 %vm19968_vm0, %v19967_v4  ;;  %v4221_v13 = vrot.slane %v20573_v47, %v20038_v9 }
 0x642   :  { %17909 = vmatprep.mubr.msk.f32.mxu0 %vm19968_vm0, %v19967_v4  ;;  %19290 = vmatpush3.bf16.msra.mxu0 %v19289_v54 }
 0x643   :  { %19291 = vmatprep.subr.bf16.mxu0 %v19972_v32  ;;  %19296 = vmatpush3.bf16.msra.mxu1 %v19295_v60  ;;  %v4417_v60 = vld [vmem:[%s20617_s5 + $0x40] sm:$0xff] }
 0x644   :  { %19297 = vmatprep.subr.bf16.mxu1 %v19972_v32 }
 0x6fb   :  { %v3722_v16 = vpop.f32.mrb[42].mxu1 }
 0x6fc   :  { %v3646_v17 = vpop.f32.mrb[42].mxu0  ;;  %v4183_v18 = vsel %vm544_vm3, %v3722_v16, 0.0  ;;  %v17870_v19 = vpop.f32.mrb[43].mxu1  ;;  %v4226_v16 = vrot.slane %v20573_v47, %v20041_v10 }
 0x6fd   :  { %v4182_v20 = vsel %vm544_vm3, %v3646_v17, 0.0  ;;  %v17865_v21 = vpop.f32.mrb[43].mxu0  ;;  %v509_v19 = vld [vmem:[%s16491_s1 + $0x10] sm:$0xff] }
 0x6fe   :  { %v4184_v22 = vadd.f32 %v4183_v18, %v4182_v20  ;;  %v510_v20 = vld [vmem:[%s16491_s1 + $0x18] sm:$0xff]  ;;  %s16506_s1 = sld [smem:[%s22257_s0 + %s19997_s28]]  }
 0x6ff   :  { %v19298_v21 = vpack.c.bf16 %v510_v20, %v509_v19  ;;  %v4426_v19 = vld [vmem:[%s20617_s5 + $0x88] sm:$0xff]  ;;  %v4429_v20 = vld [vmem:[%s20617_s5 + $0xa0] sm:$0xff] }
 0x701   :  { %19299 = vmatpush3.bf16.msra.mxu1 %v19298_v21  ;;  %v4430_v21 = vld [vmem:[%s20617_s5 + $0xa8] sm:$0xff] }
 0x702   :  { %19306 = vmatprep.subr.bf16.mxu1 %v19972_v32 }
 0x703   :  { %v3874_v23 = vpop.f32.mrb[44].mxu1 }
 0x704   :  { %v3798_v24 = vpop.f32.mrb[44].mxu0  ;;  %v17880_v25 = vpop.f32.mrb[45].mxu1  ;;  %v4187_v29 = vsel %vm544_vm3, %v3874_v23, 0.0 }
 0x705   :  { %v4185_v26 = vsel %vm544_vm3, %v3798_v24, 0.0  ;;  %v17875_v27 = vpop.f32.mrb[45].mxu0 }
 0x706   :  { %v4186_v28 = vadd.f32 %v4185_v26, %v4184_v22  ;;  %v20600_v22 = vsub.s32 3, %v20029_v7 }
 0x708   :  { %v4188_v30 = vadd.f32 %v4187_v29, %v4186_v28  ;;  %v4231_v23 = vrot.slane %v20573_v47, %v20600_v22  ;;  %v20608_v28 = vsub.s32 4, %v20029_v7 }
 0x70a   :  { %v4309_v29 = vrot.slane %v20573_v47, %v20608_v28 }
 0x70b   :  { %v4026_v31 = vpop.f32.mrb[46].mxu1 }
 0x70c   :  { %v3950_v35 = vpop.f32.mrb[46].mxu0  ;;  %v17890_v36 = vpop.f32.mrb[47].mxu1  ;;  %v4191_v40 = vsel %vm544_vm3, %v4026_v31, 0.0 }
 0x70d   :  { %v4189_v51 = vsel %vm544_vm3, %v3950_v35, 0.0  ;;  %v17885_v38 = vpop.f32.mrb[47].mxu0 }
 0x70e   :  { %v4190_v39 = vadd.f32 %v4189_v51, %v4188_v30 }
 0x710   :  { %v4192_v41 = vadd.f32 %v4191_v40, %v4190_v39  ;;  %v4409_v40 = vld [vmem:[%s20617_s5] sm:$0xff] }
 0x713   :  { %v4178_v33 = vpop.f32.mrb[48].mxu1 }
 0x714   :  { %v4102_v34 = vpop.f32.mrb[48].mxu0  ;;  %v17900_v42 = vpop.f32.mrb[49].mxu1  ;;  %v4195_v45 = vsel %vm544_vm3, %v4178_v33, 0.0  ;;  %v4413_v33 = vld [vmem:[%s20617_s5 + $0x20] sm:$0xff] }
 0x715   :  { %v4193_v43 = vsel %vm544_vm3, %v4102_v34, 0.0  ;;  %v17895_v57 = vpop.f32.mrb[49].mxu0  ;;  %v4414_v42 = vld [vmem:[%s20617_s5 + $0x28] sm:$0xff] }
 0x716   :  { %v4194_v56 = vadd.f32 %v4193_v43, %v4192_v41  ;;  %v4410_v41 = vld [vmem:[%s20617_s5 + $0x8] sm:$0xff]  ;;  %v19307_v43 = vpack.c.bf16 %v4414_v42, %v4413_v33  ;;  %v4411_v57 = vld [vmem:[%s20617_s5 + $0x10] sm:$0xff]  ;;  %v4436_v33 = vld [vmem:[%s20617_s5 + $0xd8] sm:$0xff] }
 0x717   :  { %v19301_v34 = vpack.c.bf16 %v4410_v41, %v4409_v40  ;;  %v4435_v41 = vld [vmem:[%s20617_s5 + $0xd0] sm:$0xff]  ;;  %v4440_v42 = vld [vmem:[%s20617_s5 + $0xf8] sm:$0xff] }
 0x718   :  { %v4196_v37 = vadd.f32 %v4195_v45, %v4194_v56  ;;  %v4412_v56 = vld [vmem:[%s20617_s5 + $0x18] sm:$0xff] }
 0x719   :  { %v19304_v45 = vpack.c.bf16 %v4412_v56, %v4411_v57  ;;  %v4441_v56 = vld [vmem:[%s20679_s9] sm:$0xff] }
 0x71a   :  { %v4201_v63 = vadd.f32 %v4200_v44, %v4196_v37  ;;  %v4415_v44 = vld [vmem:[%s20617_s5 + $0x30] sm:$0xff]  ;;  %v4416_v37 = vld [vmem:[%s20617_s5 + $0x38] sm:$0xff] }
 0x71c   :  { %v4202_v0 = vadd.f32 %v4201_v63, %v20091_v3  ;;  %v19292_v3 = vpack.c.bf16 %v506_v52, %v505_v55  ;;  %v19310_v63 = vpack.c.bf16 %v4416_v37, %v4415_v44  ;;  %v20632_v55 = vsub.s32 5, %v20029_v7  ;;  %v4442_v44 = vld [vmem:[%s20679_s9 + $0x8] sm:$0xff] }
 0x71d   :  { %v20635_v52 = vsub.s32 6, %v20029_v7  ;;  %v4446_v37 = vld [vmem:[%s20679_s9 + $0x28] sm:$0xff] }
 0x71e   :  { %v4203_v46 = vsel %vm544_vm3, %v4202_v0, 0.0  ;;  %v4206_v48 = vmul.f32 %v4202_v0, %v4202_v0  ;;  %19293 = vmatpush3.bf16.msra.mxu0 %v19292_v3  ;;  %v4402_v58 = vrot.slane %v20573_v47, %v20632_v55 }
 0x71f   :  { %4204 = vadd.xlane.f32.xlu1 %v4203_v46  ;;  %19300 = vmatprep.subr.bf16.mxu0 %v19972_v32 }
 0x720   :  { %v4207_v49 = vsel %vm544_vm3, %v4206_v48, 0.0 }
 0x721   :  { %4208 = vadd.xlane.f32.xlu0 %v4207_v49 }
 0x7ac   :  { %v4205_v61 = vpop.xlane.xlu1 %4204 }
 0x7ad   :  { %v4210_v62 = vmul.f32 0.03125, %v4205_v61  ;;  %v4407_v61 = vrot.slane %v20573_v47, %v20635_v52 }
 0x7ae   :  { %v4209_v1 = vpop.xlane.xlu0 %4208 }
 0x7af   :  { %v4212_v2 = vmul.f32 %v4210_v62, %v4210_v62  ;;  %v4211_v5 = vmul.f32 0.03125, %v4209_v1  ;;  %v4214_v12 = vsub.f32 %v4202_v0, %v4210_v62  ;;  %v4418_v1 = vld [vmem:[%s20617_s5 + $0x48] sm:$0xff] }
 0x7b1   :  { %v4213_v6 = vsub.f32 %v4211_v5, %v4212_v2  ;;  %v4421_v2 = vld [vmem:[%s20617_s5 + $0x60] sm:$0xff]  ;;  %v4422_v5 = vld [vmem:[%s20617_s5 + $0x68] sm:$0xff] }
 0x7b2   :  { %v19319_v7 = vpack.c.bf16 %v4422_v5, %v4421_v2  ;;  %v4452_v2 = vld [vmem:[%s20679_s9 + $0x58] sm:$0xff]  ;;  %v4455_v5 = vld [vmem:[%s20679_s9 + $0x70] sm:$0xff] }
 0x7b3   :  { %v4215_v11 = vadd.f32 1e-05, %v4213_v6 }
 0x7b5   :  { %19851 = vrsqrt.f32 %v4215_v11  ;;  %v19313_v11 = vpack.c.bf16 %v4418_v1, %v4417_v60  ;;  %v4454_v60 = vld [vmem:[%s20679_s9 + $0x68] sm:$0xff]  ;;  %v4451_v1 = vld [vmem:[%s20679_s9 + $0x50] sm:$0xff] }
 0x7bf   :  { %v19852_v14 = vpop.eup %19851 }
 0x7c0   :  { %v4217_v15 = vmul.f32 %v19852_v14, %v4214_v12  ;;  %v4419_v12 = vld [vmem:[%s20617_s5 + $0x50] sm:$0xff]  ;;  %v4420_v14 = vld [vmem:[%s20617_s5 + $0x58] sm:$0xff] }
 0x7c1   :  { %v19316_v47 = vpack.c.bf16 %v4420_v14, %v4419_v12  ;;  %v4457_v12 = vld [vmem:[%s20679_s9 + $0x80] sm:$0xff]  ;;  %v4458_v14 = vld [vmem:[%s20679_s9 + $0x88] sm:$0xff] }
 0x7c2   :  { %v4222_v17 = vmul.f32 %v4221_v13, %v4217_v15  ;;  %v4423_v15 = vld [vmem:[%s20617_s5 + $0x70] sm:$0xff] }
 0x7c4   :  { %v4227_v18 = vadd.f32 %v4226_v16, %v4222_v17  ;;  %v4424_v16 = vld [vmem:[%s20617_s5 + $0x78] sm:$0xff] }
 0x7c5   :  { %v19322_v17 = vpack.c.bf16 %v4424_v16, %v4423_v15  ;;  %v4461_v15 = vld [vmem:[%s20679_s9 + $0xa0] sm:$0xff]  ;;  %v4462_v16 = vld [vmem:[%s20679_s9 + $0xa8] sm:$0xff] }
 0x7c6   :  { %17910 = vmatmul.mubr.msk.f32.vlgmr.msra.gmra.mrb[50].mxu0 %vm544_vm3, %v4227_v18 }
 0x7c7   :  { %17931 = vmatprep.mubr.msk.f32.mxu0 %vm19968_vm0, %v19967_v4  ;;  %19302 = vmatpush3.bf16.msra.mxu0 %v19301_v34  ;;  %v4439_v34 = vld [vmem:[%s20617_s5 + $0xf0] sm:$0xff] }
 0x7c8   :  { %19303 = vmatprep.subr.bf16.mxu0 %v19972_v32  ;;  %v19346_v57 = vpack.c.bf16 %v4440_v42, %v4439_v34  ;;  %v4477_v34 = vld [vmem:[%s20764_s13 + $0x20] sm:$0xff]  ;;  %v4478_v42 = vld [vmem:[%s20764_s13 + $0x28] sm:$0xff] }
 0x7cb   :  { %19305 = vmatpush3.bf16.msra.mxu0 %v19304_v45  ;;  %v4445_v45 = vld [vmem:[%s20679_s9 + $0x20] sm:$0xff] }
 0x7cc   :  { %19312 = vmatprep.subr.bf16.mxu0 %v19972_v32 }
 0x899   :  { %v4301_v24 = vpop.f32.mrb[50].mxu0 }
 0x89a   :  { %v4302_v25 = vadd.f32 %v4301_v24, %v4231_v23  ;;  %v17911_v26 = vpop.f32.mrb[51].mxu0  ;;  %v19331_v24 = vpack.c.bf16 %v4430_v21, %v4429_v20  ;;  %v4463_v20 = vld [vmem:[%s20679_s9 + $0xb0] sm:$0xff]  ;;  %v4464_v21 = vld [vmem:[%s20679_s9 + $0xb8] sm:$0xff] }
 0x89b   :  { %v4428_v26 = vld [vmem:[%s20617_s5 + $0x98] sm:$0xff] }
 0x89c   :  { %v4305_v27 = vmax.f32 %v4302_v25, 0.0  ;;  %v4427_v25 = vld [vmem:[%s20617_s5 + $0x90] sm:$0xff] }
 0x89e   :  { %17921 = vmatmul.mubr.msk.f32.vlgmr.msra.gmra.mrb[50].mxu1 %vm544_vm3, %v4305_v27  ;;  %v4431_v27 = vld [vmem:[%s20617_s5 + $0xb0] sm:$0xff] }
 0x89f   :  { %17942 = vmatprep.mubr.msk.f32.mxu1 %vm19968_vm0, %v19967_v4  ;;  %19308 = vmatpush3.bf16.msra.mxu1 %v19307_v43  ;;  %v19340_v43 = vpack.c.bf16 %v4436_v33, %v4435_v41  ;;  %v4473_v41 = vld [vmem:[%s20764_s13] sm:$0xff]  ;;  %v4474_v33 = vld [vmem:[%s20764_s13 + $0x8] sm:$0xff] }
 0x8a0   :  { %19309 = vmatprep.subr.bf16.mxu1 %v19972_v32 }
 0x8a3   :  { %19311 = vmatpush3.bf16.msra.mxu1 %v19310_v63  ;;  %v19349_v63 = vpack.c.bf16 %v4442_v44, %v4441_v56  ;;  %v4475_v56 = vld [vmem:[%s20764_s13 + $0x10] sm:$0xff]  ;;  %v4476_v44 = vld [vmem:[%s20764_s13 + $0x18] sm:$0xff] }
 0x8a4   :  { %19318 = vmatprep.subr.bf16.mxu1 %v19972_v32 }
 0x971   :  { %v4379_v30 = vpop.f32.mrb[50].mxu1 }
 0x972   :  { %v4380_v31 = vadd.f32 %v4379_v30, %v4309_v29  ;;  %v17922_v35 = vpop.f32.mrb[51].mxu1  ;;  %v4432_v29 = vld [vmem:[%s20617_s5 + $0xb8] sm:$0xff]  ;;  %v19328_v30 = vpack.c.bf16 %v4428_v26, %v4427_v25  ;;  %v4465_v25 = vld [vmem:[%s20679_s9 + $0xc0] sm:$0xff]  ;;  %v4466_v26 = vld [vmem:[%s20679_s9 + $0xc8] sm:$0xff] }
 0x973   :  { %v4433_v35 = vld [vmem:[%s20617_s5 + $0xc0] sm:$0xff] }
 0x974   :  { %v4383_v36 = vadd.f32 %v4380_v31, %v4227_v18  ;;  %v4425_v18 = vld [vmem:[%s20617_s5 + $0x80] sm:$0xff]  ;;  %v19334_v31 = vpack.c.bf16 %v4432_v29, %v4431_v27  ;;  %v4470_v29 = vld [vmem:[%s20679_s9 + $0xe8] sm:$0xff] }
 0x975   :  { %v19325_v23 = vpack.c.bf16 %v4426_v19, %v4425_v18  ;;  %v4459_v18 = vld [vmem:[%s20679_s9 + $0x90] sm:$0xff]  ;;  %v4460_v19 = vld [vmem:[%s20679_s9 + $0x98] sm:$0xff]  ;;  %v4469_v27 = vld [vmem:[%s20679_s9 + $0xe0] sm:$0xff] }
 0x976   :  { %v4384_v51 = vsel %vm544_vm3, %v4383_v36, 0.0  ;;  %v4387_v38 = vmul.f32 %v4383_v36, %v4383_v36 }
 0x977   :  { %4385 = vadd.xlane.f32.xlu1 %v4384_v51  ;;  %v4437_v51 = vld [vmem:[%s20617_s5 + $0xe0] sm:$0xff] }
 0x978   :  { %v4388_v39 = vsel %vm544_vm3, %v4387_v38, 0.0  ;;  %v4438_v38 = vld [vmem:[%s20617_s5 + $0xe8] sm:$0xff] }
 0x979   :  { %4389 = vadd.xlane.f32.xlu0 %v4388_v39  ;;  %v19343_v40 = vpack.c.bf16 %v4438_v38, %v4437_v51  ;;  %v4471_v51 = vld [vmem:[%s20679_s9 + $0xf0] sm:$0xff]  ;;  %v4472_v38 = vld [vmem:[%s20679_s9 + $0xf8] sm:$0xff] }
 0xa04   :  { %v4386_v0 = vpop.xlane.xlu1 %4385 }
 0xa05   :  { %v4391_v46 = vmul.f32 0.03125, %v4386_v0  ;;  %v19355_v0 = vpack.c.bf16 %v4446_v37, %v4445_v45  ;;  %v4479_v45 = vld [vmem:[%s20764_s13 + $0x30] sm:$0xff]  ;;  %v4480_v37 = vld [vmem:[%s20764_s13 + $0x38] sm:$0xff] }
 0xa06   :  { %v4390_v48 = vpop.xlane.xlu0 %4389 }
 0xa07   :  { %v4393_v49 = vmul.f32 %v4391_v46, %v4391_v46  ;;  %v4392_v50 = vmul.f32 0.03125, %v4390_v48  ;;  %v4395_v3 = vsub.f32 %v4383_v36, %v4391_v46  ;;  %v4434_v36 = vld [vmem:[%s20617_s5 + $0xc8] sm:$0xff]  ;;  %v4443_v46 = vld [vmem:[%s20679_s9 + $0x10] sm:$0xff]  ;;  %v4444_v48 = vld [vmem:[%s20679_s9 + $0x18] sm:$0xff]  ;;  %s16507_s5 = sld [smem:[%s22257_s0 + %s19998_s2]]  }
 0xa08   :  { %v19337_v39 = vpack.c.bf16 %v4434_v36, %v4433_v35  ;;  %v4467_v35 = vld [vmem:[%s20679_s9 + $0xd0] sm:$0xff]  ;;  %v4468_v36 = vld [vmem:[%s20679_s9 + $0xd8] sm:$0xff] }
 0xa09   :  { %v4394_v53 = vsub.f32 %v4392_v50, %v4393_v49  ;;  %v4447_v49 = vld [vmem:[%s20679_s9 + $0x30] sm:$0xff]  ;;  %v4448_v50 = vld [vmem:[%s20679_s9 + $0x38] sm:$0xff] }
 0xa0b   :  { %v4396_v54 = vadd.f32 1e-05, %v4394_v53  ;;  %v19352_v53 = vpack.c.bf16 %v4444_v48, %v4443_v46  ;;  %v4481_v46 = vld [vmem:[%s20764_s13 + $0x40] sm:$0xff]  ;;  %v4482_v48 = vld [vmem:[%s20764_s13 + $0x48] sm:$0xff] }
 0xa0d   :  { %19853 = vrsqrt.f32 %v4396_v54  ;;  %v19358_v54 = vpack.c.bf16 %v4448_v50, %v4447_v49  ;;  %v4485_v49 = vld [vmem:[%s20764_s13 + $0x60] sm:$0xff]  ;;  %v4486_v50 = vld [vmem:[%s20764_s13 + $0x68] sm:$0xff] }
 0xa17   :  { %v19854_v59 = vpop.eup %19853 }
 0xa18   :  { %v4398_v62 = vmul.f32 %v19854_v59, %v4395_v3  ;;  %v4449_v3 = vld [vmem:[%s20679_s9 + $0x40] sm:$0xff] }
 0xa19   :  { %v4453_v59 = vld [vmem:[%s20679_s9 + $0x60] sm:$0xff] }
 0xa1a   :  { %v4403_v6 = vmul.f32 %v4402_v58, %v4398_v62  ;;  %v4450_v58 = vld [vmem:[%s20679_s9 + $0x48] sm:$0xff]  ;;  %v19367_v62 = vpack.c.bf16 %v4454_v60, %v4453_v59  ;;  %v4487_v59 = vld [vmem:[%s20764_s13 + $0x70] sm:$0xff]  ;;  %v4488_v60 = vld [vmem:[%s20764_s13 + $0x78] sm:$0xff] }
 0xa1c   :  { %v20646_v13 = vadd.f32 %v4407_v61, %v4403_v6  ;;  %v19361_v61 = vpack.c.bf16 %v4450_v58, %v4449_v3  ;;  %v4456_v6 = vld [vmem:[%s20679_s9 + $0x78] sm:$0xff]  ;;  %v4483_v3 = vld [vmem:[%s20764_s13 + $0x50] sm:$0xff]  ;;  %s21709_s9 = sld [smem:[%s22257_s0 + %s19999_s6]]  }
 0xa1d   :  { %v4484_v58 = vld [vmem:[%s20764_s13 + $0x58] sm:$0xff] }
 0xa1e   :  { %17932 = vmatmul.mubr.msk.f32.vlgmr.msra.gmra.mrb[52].mxu0 %vm544_vm3, %v20646_v13  ;;  %17943 = vmatmul.mubr.msk.f32.vlgmr.msra.gmra.mrb[52].mxu1 %vm544_vm3, %v20646_v13 }
 0xa1f   :  { %19314 = vmatpush3.bf16.msra.mxu0 %v19313_v11  ;;  %19320 = vmatpush3.bf16.msra.mxu1 %v19319_v7  ;;  %v19364_v11 = vpack.c.bf16 %v4452_v2, %v4451_v1  ;;  %v19370_v7 = vpack.c.bf16 %v4456_v6, %v4455_v5  ;;  %v4489_v1 = vld [vmem:[%s20764_s13 + $0x80] sm:$0xff]  ;;  %v4490_v2 = vld [vmem:[%s20764_s13 + $0x88] sm:$0xff] }
 0xa20   :  { %19315 = vmatprep.subr.bf16.mxu0 %v19972_v32  ;;  %19321 = vmatprep.subr.bf16.mxu1 %v19972_v32  ;;  %v4493_v5 = vld [vmem:[%s20764_s13 + $0xa0] sm:$0xff]  ;;  %v4494_v6 = vld [vmem:[%s20764_s13 + $0xa8] sm:$0xff] }
 0xa21   :  { %17953 = vmatprep.mubr.msk.f32.mxu0 %vm19968_vm0, %v19967_v4  ;;  %17964 = vmatprep.mubr.msk.f32.mxu1 %vm19968_vm0, %v19967_v4 }
 0xa23   :  { %19317 = vmatpush3.bf16.msra.mxu0 %v19316_v47  ;;  %19323 = vmatpush3.bf16.msra.mxu1 %v19322_v17  ;;  %v19373_v47 = vpack.c.bf16 %v4458_v14, %v4457_v12  ;;  %v19379_v17 = vpack.c.bf16 %v4462_v16, %v4461_v15  ;;  %v4491_v12 = vld [vmem:[%s20764_s13 + $0x90] sm:$0xff]  ;;  %v4492_v14 = vld [vmem:[%s20764_s13 + $0x98] sm:$0xff] }
 0xa24   :  { %19324 = vmatprep.subr.bf16.mxu0 %v19972_v32  ;;  %19330 = vmatprep.subr.bf16.mxu1 %v19972_v32  ;;  %v4495_v15 = vld [vmem:[%s20764_s13 + $0xb0] sm:$0xff]  ;;  %v4496_v16 = vld [vmem:[%s20764_s13 + $0xb8] sm:$0xff] }
 0xa26   :  { %17954 = vmatmul.mubr.msk.f32.vlgmr.msra.gmra.mrb[54].mxu0 %vm544_vm3, %v20646_v13  ;;  %17965 = vmatmul.mubr.msk.f32.vlgmr.msra.gmra.mrb[54].mxu1 %vm544_vm3, %v20646_v13 }
 0xa27   :  { %19326 = vmatpush3.bf16.msra.mxu0 %v19325_v23  ;;  %19332 = vmatpush3.bf16.msra.mxu1 %v19331_v24  ;;  %v19376_v23 = vpack.c.bf16 %v4460_v19, %v4459_v18  ;;  %v19382_v24 = vpack.c.bf16 %v4464_v21, %v4463_v20  ;;  %v4497_v18 = vld [vmem:[%s20764_s13 + $0xc0] sm:$0xff]  ;;  %v4498_v19 = vld [vmem:[%s20764_s13 + $0xc8] sm:$0xff] }
 0xa28   :  { %19327 = vmatprep.subr.bf16.mxu0 %v19972_v32  ;;  %19333 = vmatprep.subr.bf16.mxu1 %v19972_v32  ;;  %v4501_v20 = vld [vmem:[%s20764_s13 + $0xe0] sm:$0xff]  ;;  %v4502_v21 = vld [vmem:[%s20764_s13 + $0xe8] sm:$0xff] }
 0xa29   :  { %17975 = vmatprep.mubr.msk.f32.mxu0 %vm19968_vm0, %v19967_v4  ;;  %17986 = vmatprep.mubr.msk.f32.mxu1 %vm19968_vm0, %v19967_v4 }
 0xa2b   :  { %19329 = vmatpush3.bf16.msra.mxu0 %v19328_v30  ;;  %19335 = vmatpush3.bf16.msra.mxu1 %v19334_v31  ;;  %v19385_v30 = vpack.c.bf16 %v4466_v26, %v4465_v25  ;;  %v19391_v31 = vpack.c.bf16 %v4470_v29, %v4469_v27  ;;  %v4499_v25 = vld [vmem:[%s20764_s13 + $0xd0] sm:$0xff]  ;;  %v4500_v26 = vld [vmem:[%s20764_s13 + $0xd8] sm:$0xff] }
 0xa2c   :  { %19336 = vmatprep.subr.bf16.mxu0 %v19972_v32  ;;  %19342 = vmatprep.subr.bf16.mxu1 %v19972_v32  ;;  %v4503_v27 = vld [vmem:[%s20764_s13 + $0xf0] sm:$0xff]  ;;  %v4504_v29 = vld [vmem:[%s20764_s13 + $0xf8] sm:$0xff]  ;;  %s21765_s13 = sld [smem:[%s22257_s0 + %s20000_s10]]  }
 0xa2e   :  { %17976 = vmatmul.mubr.msk.f32.vlgmr.msra.gmra.mrb[56].mxu0 %vm544_vm3, %v20646_v13  ;;  %17987 = vmatmul.mubr.msk.f32.vlgmr.msra.gmra.mrb[56].mxu1 %vm544_vm3, %v20646_v13 }
 0xa2f   :  { %19338 = vmatpush3.bf16.msra.mxu0 %v19337_v39  ;;  %19344 = vmatpush3.bf16.msra.mxu1 %v19343_v40  ;;  %v19388_v39 = vpack.c.bf16 %v4468_v36, %v4467_v35  ;;  %v19394_v40 = vpack.c.bf16 %v4472_v38, %v4471_v51 }
 0xa30   :  { %19339 = vmatprep.subr.bf16.mxu0 %v19972_v32  ;;  %19345 = vmatprep.subr.bf16.mxu1 %v19972_v32 }
 0xa31   :  { %17997 = vmatprep.mubr.msk.f32.mxu0 %vm19968_vm0, %v19967_v4  ;;  %18008 = vmatprep.mubr.msk.f32.mxu1 %vm19968_vm0, %v19967_v4 }
 0xa33   :  { %19341 = vmatpush3.bf16.msra.mxu0 %v19340_v43  ;;  %19347 = vmatpush3.bf16.msra.mxu1 %v19346_v57  ;;  %v19397_v43 = vpack.c.bf16 %v4474_v33, %v4473_v41  ;;  %v19403_v57 = vpack.c.bf16 %v4478_v42, %v4477_v34 }
 0xa34   :  { %19348 = vmatprep.subr.bf16.mxu0 %v19972_v32  ;;  %19354 = vmatprep.subr.bf16.mxu1 %v19972_v32 }
 0xa36   :  { %17998 = vmatmul.mubr.msk.f32.vlgmr.msra.gmra.mrb[58].mxu0 %vm544_vm3, %v20646_v13  ;;  %18009 = vmatmul.mubr.msk.f32.vlgmr.msra.gmra.mrb[58].mxu1 %vm544_vm3, %v20646_v13 }
 0xa37   :  { %19350 = vmatpush3.bf16.msra.mxu0 %v19349_v63  ;;  %19356 = vmatpush3.bf16.msra.mxu1 %v19355_v0  ;;  %v19400_v63 = vpack.c.bf16 %v4476_v44, %v4475_v56  ;;  %v19406_v0 = vpack.c.bf16 %v4480_v37, %v4479_v45 }
 0xa38   :  { %19351 = vmatprep.subr.bf16.mxu0 %v19972_v32  ;;  %19357 = vmatprep.subr.bf16.mxu1 %v19972_v32 }
 0xa39   :  { %18019 = vmatprep.mubr.msk.f32.mxu0 %vm19968_vm0, %v19967_v4  ;;  %18030 = vmatprep.mubr.msk.f32.mxu1 %vm19968_vm0, %v19967_v4 }
 0xa3b   :  { %19353 = vmatpush3.bf16.msra.mxu0 %v19352_v53  ;;  %19359 = vmatpush3.bf16.msra.mxu1 %v19358_v54  ;;  %v19409_v53 = vpack.c.bf16 %v4482_v48, %v4481_v46  ;;  %v19415_v54 = vpack.c.bf16 %v4486_v50, %v4485_v49 }
 0xa3c   :  { %19360 = vmatprep.subr.bf16.mxu0 %v19972_v32  ;;  %19366 = vmatprep.subr.bf16.mxu1 %v19972_v32 }
 0xa3e   :  { %18020 = vmatmul.mubr.msk.f32.vlgmr.msra.gmra.mrb[60].mxu0 %vm544_vm3, %v20646_v13  ;;  %18031 = vmatmul.mubr.msk.f32.vlgmr.msra.gmra.mrb[60].mxu1 %vm544_vm3, %v20646_v13 }
 0xa3f   :  { %19362 = vmatpush3.bf16.msra.mxu0 %v19361_v61  ;;  %19368 = vmatpush3.bf16.msra.mxu1 %v19367_v62  ;;  %v19412_v61 = vpack.c.bf16 %v4484_v58, %v4483_v3  ;;  %v19418_v62 = vpack.c.bf16 %v4488_v60, %v4487_v59 }
 0xa40   :  { %19363 = vmatprep.subr.bf16.mxu0 %v19972_v32  ;;  %19369 = vmatprep.subr.bf16.mxu1 %v19972_v32 }
 0xa41   :  { %18041 = vmatprep.mubr.msk.f32.mxu0 %vm19968_vm0, %v19967_v4  ;;  %18052 = vmatprep.mubr.msk.f32.mxu1 %vm19968_vm0, %v19967_v4 }
 0xa43   :  { %19365 = vmatpush3.bf16.msra.mxu0 %v19364_v11  ;;  %19371 = vmatpush3.bf16.msra.mxu1 %v19370_v7  ;;  %v19421_v11 = vpack.c.bf16 %v4490_v2, %v4489_v1  ;;  %v19427_v7 = vpack.c.bf16 %v4494_v6, %v4493_v5  ;;  %v20911_v1 = vld [vmem:[%s20888_s17 + $0x8] sm:$0x7]  ;;  %v20914_v2 = vld [vmem:[%s20888_s17 + $0xc] sm:$0x7] }
 0xa44   :  { %19372 = vmatprep.subr.bf16.mxu0 %v19972_v32  ;;  %19378 = vmatprep.subr.bf16.mxu1 %v19972_v32  ;;  %v5136_v5 = vrot.slane %v20911_v1, %v20038_v9  ;;  %v5140_v6 = vrot.slane %v20914_v2, %v20038_v9 }
 0xa46   :  { %18042 = vmatmul.mubr.msk.f32.vlgmr.msra.gmra.mrb[62].mxu0 %vm544_vm3, %v20646_v13  ;;  %18053 = vmatmul.mubr.msk.f32.vlgmr.msra.gmra.mrb[62].mxu1 %vm544_vm3, %v20646_v13 }
 0xa47   :  { %19374 = vmatpush3.bf16.msra.mxu0 %v19373_v47  ;;  %19380 = vmatpush3.bf16.msra.mxu1 %v19379_v17  ;;  %v19424_v47 = vpack.c.bf16 %v4492_v14, %v4491_v12  ;;  %v19430_v17 = vpack.c.bf16 %v4496_v16, %v4495_v15 }
 0xa48   :  { %19375 = vmatprep.subr.bf16.mxu0 %v19972_v32  ;;  %19381 = vmatprep.subr.bf16.mxu1 %v19972_v32 }
 0xa49   :  { %18063 = vmatprep.mubr.msk.f32.mxu0 %vm19968_vm0, %v19967_v4  ;;  %18074 = vmatprep.mubr.msk.f32.mxu1 %vm19968_vm0, %v19967_v4 }
 0xa4b   :  { %19377 = vmatpush3.bf16.msra.mxu0 %v19376_v23  ;;  %19383 = vmatpush3.bf16.msra.mxu1 %v19382_v24  ;;  %v19433_v23 = vpack.c.bf16 %v4498_v19, %v4497_v18  ;;  %v19439_v24 = vpack.c.bf16 %v4502_v21, %v4501_v20  ;;  %v20935_v20 = vld [vmem:[%s20888_s17 + $0x10] sm:$0x7]  ;;  %v20938_v21 = vld [vmem:[%s20888_s17 + $0x14] sm:$0x7] }
 0xa4c   :  { %19384 = vmatprep.subr.bf16.mxu0 %v19972_v32  ;;  %19390 = vmatprep.subr.bf16.mxu1 %v19972_v32 }
 0xa4e   :  { %18064 = vmatmul.mubr.msk.f32.vlgmr.msra.gmra.mrb[64].mxu0 %vm544_vm3, %v20646_v13  ;;  %18075 = vmatmul.mubr.msk.f32.vlgmr.msra.gmra.mrb[64].mxu1 %vm544_vm3, %v20646_v13 }
 0xa4f   :  { %19386 = vmatpush3.bf16.msra.mxu0 %v19385_v30  ;;  %19392 = vmatpush3.bf16.msra.mxu1 %v19391_v31  ;;  %v19436_v30 = vpack.c.bf16 %v4500_v26, %v4499_v25  ;;  %v19442_v31 = vpack.c.bf16 %v4504_v29, %v4503_v27  ;;  %v4549_v25 = vrot.slane %v20935_v20, %v20035_v8 }
 0xa50   :  { %19387 = vmatprep.subr.bf16.mxu0 %v19972_v32  ;;  %19393 = vmatprep.subr.bf16.mxu1 %v19972_v32  ;;  %v4553_v26 = vrot.slane %v20938_v21, %v20035_v8 }
 0xa51   :  { %18085 = vmatprep.mubr.msk.f32.mxu0 %vm19968_vm0, %v19967_v4  ;;  %18096 = vmatprep.mubr.msk.f32.mxu1 %vm19968_vm0, %v19967_v4 }
 0xa53   :  { %19389 = vmatpush3.bf16.msra.mxu0 %v19388_v39  ;;  %19395 = vmatpush3.bf16.msra.mxu1 %v19394_v40 }
 0xa54   :  { %19396 = vmatprep.subr.bf16.mxu0 %v19972_v32  ;;  %19402 = vmatprep.subr.bf16.mxu1 %v19972_v32 }
 0xa56   :  { %18086 = vmatmul.mubr.msk.f32.vlgmr.msra.gmra.mrb[66].mxu0 %vm544_vm3, %v20646_v13  ;;  %18097 = vmatmul.mubr.msk.f32.vlgmr.msra.gmra.mrb[66].mxu1 %vm544_vm3, %v20646_v13 }
 0xa57   :  { %19398 = vmatpush3.bf16.msra.mxu0 %v19397_v43  ;;  %19404 = vmatpush3.bf16.msra.mxu1 %v19403_v57 }
 0xa58   :  { %19399 = vmatprep.subr.bf16.mxu0 %v19972_v32  ;;  %19405 = vmatprep.subr.bf16.mxu1 %v19972_v32 }
 0xa59   :  { %18107 = vmatprep.mubr.msk.f32.mxu0 %vm19968_vm0, %v19967_v4  ;;  %18118 = vmatprep.mubr.msk.f32.mxu1 %vm19968_vm0, %v19967_v4 }
 0xa5b   :  { %19401 = vmatpush3.bf16.msra.mxu0 %v19400_v63  ;;  %19407 = vmatpush3.bf16.msra.mxu1 %v19406_v0  ;;  %v20895_v63 = vld [vmem:[%s20888_s17] sm:$0x7]  ;;  %v20898_v0 = vld [vmem:[%s20888_s17 + $0x4] sm:$0x7] }
 0xa5c   :  { %19408 = vmatprep.subr.bf16.mxu0 %v19972_v32  ;;  %19414 = vmatprep.subr.bf16.mxu1 %v19972_v32  ;;  %v5128_v46 = vrot.slane %v20895_v63, %v20038_v9  ;;  %v5132_v48 = vrot.slane %v20898_v0, %v20038_v9  ;;  %v4533_v49 = vrot.slane %v20895_v63, %v20035_v8 }
 0xa5d   :  { %v4537_v50 = vrot.slane %v20898_v0, %v20035_v8 }
 0xa5e   :  { %18108 = vmatmul.mubr.msk.f32.vlgmr.msra.gmra.mrb[68].mxu0 %vm544_vm3, %v20646_v13  ;;  %18119 = vmatmul.mubr.msk.f32.vlgmr.msra.gmra.mrb[68].mxu1 %vm544_vm3, %v20646_v13 }
 0xa5f   :  { %19410 = vmatpush3.bf16.msra.mxu0 %v19409_v53  ;;  %19416 = vmatpush3.bf16.msra.mxu1 %v19415_v54 }
 0xa60   :  { %19411 = vmatprep.subr.bf16.mxu0 %v19972_v32  ;;  %19417 = vmatprep.subr.bf16.mxu1 %v19972_v32 }
 0xa61   :  { %18129 = vmatprep.mubr.msk.f32.mxu0 %vm19968_vm0, %v19967_v4  ;;  %18140 = vmatprep.mubr.msk.f32.mxu1 %vm19968_vm0, %v19967_v4 }
 0xa63   :  { %19413 = vmatpush3.bf16.msra.mxu0 %v19412_v61  ;;  %19419 = vmatpush3.bf16.msra.mxu1 %v19418_v62 }
 0xa64   :  { %19420 = vmatprep.subr.bf16.mxu0 %v19972_v32  ;;  %19426 = vmatprep.subr.bf16.mxu1 %v19972_v32 }
 0xa66   :  { %18130 = vmatmul.mubr.msk.f32.vlgmr.msra.gmra.mrb[70].mxu0 %vm544_vm3, %v20646_v13  ;;  %18141 = vmatmul.mubr.msk.f32.vlgmr.msra.gmra.mrb[70].mxu1 %vm544_vm3, %v20646_v13 }
 0xa67   :  { %19422 = vmatpush3.bf16.msra.mxu0 %v19421_v11  ;;  %19428 = vmatpush3.bf16.msra.mxu1 %v19427_v7  ;;  %v4541_v11 = vrot.slane %v20911_v1, %v20035_v8  ;;  %v4545_v7 = vrot.slane %v20914_v2, %v20035_v8 }
 0xa68   :  { %19423 = vmatprep.subr.bf16.mxu0 %v19972_v32  ;;  %19429 = vmatprep.subr.bf16.mxu1 %v19972_v32 }
 0xa69   :  { %18151 = vmatprep.mubr.msk.f32.mxu0 %vm19968_vm0, %v19967_v4  ;;  %18162 = vmatprep.mubr.msk.f32.mxu1 %vm19968_vm0, %v19967_v4 }
 0xa6b   :  { %19425 = vmatpush3.bf16.msra.mxu0 %v19424_v47  ;;  %19431 = vmatpush3.bf16.msra.mxu1 %v19430_v17 }
 0xa6c   :  { %19432 = vmatprep.subr.bf16.mxu0 %v19972_v32  ;;  %19438 = vmatprep.subr.bf16.mxu1 %v19972_v32 }
 0xa6e   :  { %18152 = vmatmul.mubr.msk.f32.vlgmr.msra.gmra.mrb[72].mxu0 %vm544_vm3, %v20646_v13  ;;  %18163 = vmatmul.mubr.msk.f32.vlgmr.msra.gmra.mrb[72].mxu1 %vm544_vm3, %v20646_v13 }
 0xa6f   :  { %19434 = vmatpush3.bf16.msra.mxu0 %v19433_v23  ;;  %19440 = vmatpush3.bf16.msra.mxu1 %v19439_v24  ;;  %v5144_v23 = vrot.slane %v20935_v20, %v20038_v9  ;;  %v5148_v24 = vrot.slane %v20938_v21, %v20038_v9 }
 0xa70   :  { %19435 = vmatprep.subr.bf16.mxu0 %v19972_v32  ;;  %19441 = vmatprep.subr.bf16.mxu1 %v19972_v32 }
 0xa71   :  { %18173 = vmatprep.mubr.msk.f32.mxu0 %vm19968_vm0, %v19967_v4  ;;  %18184 = vmatprep.mubr.msk.f32.mxu1 %vm19968_vm0, %v19967_v4 }
 0xa73   :  { %19437 = vmatpush3.bf16.msra.mxu0 %v19436_v30  ;;  %19443 = vmatpush3.bf16.msra.mxu1 %v19442_v31 }
 0xa74   :  { %18187 = vmatprep.subr.mxu0 %v19967_v4  ;;  %18192 = vmatprep.subr.mxu1 %v19967_v4 }
 0xa76   :  { %18174 = vmatmul.mubr.msk.f32.vlgmr.msra.gmra.mrb[74].mxu0 %vm544_vm3, %v20646_v13  ;;  %18185 = vmatmul.mubr.msk.f32.vlgmr.msra.gmra.mrb[74].mxu1 %vm544_vm3, %v20646_v13 }
 0xa77   :  { %18189 = vmatprep.mubr.msk.f32.mxu0 %vm19968_vm0, %v19967_v4  ;;  %18194 = vmatprep.mubr.msk.f32.mxu1 %vm19968_vm0, %v19967_v4 }
 0xaf1   :  { %v4631_v35 = vpop.f32.mrb[52].mxu0  ;;  %v4701_v36 = vpop.f32.mrb[52].mxu1 }
 0xaf2   :  { %v17933_v51 = vpop.f32.mrb[53].mxu0  ;;  %v17944_v38 = vpop.f32.mrb[53].mxu1  ;;  %v4632_v61 = vadd.f32 %v4631_v35, %v4533_v49  ;;  %v4702_v62 = vadd.f32 %v4701_v36, %v4537_v50 }
 0xaf9   :  { %v4771_v39 = vpop.f32.mrb[54].mxu0  ;;  %v4841_v40 = vpop.f32.mrb[54].mxu1 }
 0xafa   :  { %v17955_v41 = vpop.f32.mrb[55].mxu0  ;;  %v17966_v33 = vpop.f32.mrb[55].mxu1  ;;  %v4772_v18 = vadd.f32 %v4771_v39, %v4541_v11  ;;  %v4842_v19 = vadd.f32 %v4841_v40, %v4545_v7  ;;  %v4511_v39 = vld [vmem:[%s20888_s17 + $0x18] sm:$0x7]  ;;  %v4512_v40 = vld [vmem:[%s20888_s17 + $0x1c] sm:$0x7]  ;;  %v5736_v11 = vrot.slane %v20935_v20, %v20041_v10  ;;  %v5740_v7 = vrot.slane %v20938_v21, %v20041_v10  ;;  %s21850_s17 = sld [smem:[%s22257_s0 + %s20001_s14]]  }
 0xafb   :  { %v5152_v41 = vrot.slane %v4511_v39, %v20038_v9  ;;  %v5156_v33 = vrot.slane %v4512_v40, %v20038_v9 }
 0xb01   :  { %v20881_v34 = vpop.f32.mrb[56].mxu0  ;;  %v20883_v42 = vpop.f32.mrb[56].mxu1 }
 0xb02   :  { %v17977_v43 = vpop.f32.mrb[57].mxu0  ;;  %v17988_v57 = vpop.f32.mrb[57].mxu1  ;;  %v4912_v51 = vadd.f32 %v20881_v34, %v4549_v25  ;;  %v4982_v38 = vadd.f32 %v20883_v42, %v4553_v26  ;;  %v4557_v34 = vrot.slane %v4511_v39, %v20035_v8  ;;  %v4561_v42 = vrot.slane %v4512_v40, %v20035_v8 }
 0xb09   :  { %v20890_v56 = vpop.f32.mrb[58].mxu0  ;;  %v20892_v44 = vpop.f32.mrb[58].mxu1 }
 0xb0a   :  { %v17999_v45 = vpop.f32.mrb[59].mxu0  ;;  %v18010_v37 = vpop.f32.mrb[59].mxu1  ;;  %v5052_v49 = vadd.f32 %v20890_v56, %v4557_v34  ;;  %v5122_v50 = vadd.f32 %v20892_v44, %v4561_v42 }
 0xb11   :  { %v5223_v53 = vpop.f32.mrb[60].mxu0  ;;  %v5293_v54 = vpop.f32.mrb[60].mxu1 }
 0xb12   :  { %v5224_v3 = vadd.f32 %v5223_v53, %v5128_v46  ;;  %v5294_v58 = vadd.f32 %v5293_v54, %v5132_v48  ;;  %v18021_v59 = vpop.f32.mrb[61].mxu0  ;;  %v18032_v60 = vpop.f32.mrb[61].mxu1  ;;  %v5720_v53 = vrot.slane %v20895_v63, %v20041_v10  ;;  %v5724_v54 = vrot.slane %v20898_v0, %v20041_v10 }
 0xb13   :  { %v5732_v63 = vrot.slane %v20914_v2, %v20041_v10 }
 0xb14   :  { %18188 = vmatpush3.xpose.msk.msra.mxu0 %vm2292_vm4, %v5224_v3  ;;  %18193 = vmatpush3.xpose.msk.msra.mxu1 %vm2292_vm4, %v5294_v58 }
 0xb15   :  { %18197 = vmatprep.subr.mxu0 %v19967_v4  ;;  %18202 = vmatprep.subr.mxu1 %v19967_v4 }
 0xb17   :  { %18190 = vmatmul.mubr.msk.f32.vlgmr.msra.gmra.mrb[76].mxu0 %vm2292_vm4, %v4632_v61  ;;  %18195 = vmatmul.mubr.msk.f32.vlgmr.msra.gmra.mrb[76].mxu1 %vm2292_vm4, %v4702_v62 }
 0xb18   :  { %18199 = vmatprep.mubr.msk.f32.mxu0 %vm19968_vm0, %v19967_v4  ;;  %18204 = vmatprep.mubr.msk.f32.mxu1 %vm19968_vm0, %v19967_v4 }
 0xb19   :  { %v5363_v12 = vpop.f32.mrb[62].mxu0  ;;  %v5433_v14 = vpop.f32.mrb[62].mxu1 }
 0xb1a   :  { %v5364_v15 = vadd.f32 %v5363_v12, %v5136_v5  ;;  %v5434_v16 = vadd.f32 %v5433_v14, %v5140_v6  ;;  %v18043_v47 = vpop.f32.mrb[63].mxu0  ;;  %v18054_v17 = vpop.f32.mrb[63].mxu1 }
 0xb1b   :  { %v5744_v17 = vrot.slane %v4511_v39, %v20041_v10 }
 0xb1c   :  { %18198 = vmatpush3.xpose.msk.msra.mxu0 %vm2292_vm4, %v5364_v15  ;;  %18203 = vmatpush3.xpose.msk.msra.mxu1 %vm2292_vm4, %v5434_v16 }
 0xb1d   :  { %18207 = vmatprep.subr.mxu0 %v19967_v4  ;;  %18212 = vmatprep.subr.mxu1 %v19967_v4 }
 0xb1f   :  { %18200 = vmatmul.mubr.msk.f32.vlgmr.msra.gmra.mrb[78].mxu0 %vm2292_vm4, %v4772_v18  ;;  %18205 = vmatmul.mubr.msk.f32.vlgmr.msra.gmra.mrb[78].mxu1 %vm2292_vm4, %v4842_v19  ;;  %v5748_v18 = vrot.slane %v4512_v40, %v20041_v10 }
 0xb20   :  { %18209 = vmatprep.mubr.msk.f32.mxu0 %vm19968_vm0, %v19967_v4  ;;  %18214 = vmatprep.mubr.msk.f32.mxu1 %vm19968_vm0, %v19967_v4 }
 0xb21   :  { %v5503_v27 = vpop.f32.mrb[64].mxu0  ;;  %v5573_v29 = vpop.f32.mrb[64].mxu1 }
 0xb22   :  { %v5504_v30 = vadd.f32 %v5503_v27, %v5144_v23  ;;  %v5574_v31 = vadd.f32 %v5573_v29, %v5148_v24  ;;  %v18065_v35 = vpop.f32.mrb[65].mxu0  ;;  %v18076_v36 = vpop.f32.mrb[65].mxu1 }
 0xb24   :  { %18208 = vmatpush3.xpose.msk.msra.mxu0 %vm2292_vm4, %v5504_v30  ;;  %18213 = vmatpush3.xpose.msk.msra.mxu1 %vm2292_vm4, %v5574_v31 }
 0xb25   :  { %18217 = vmatprep.subr.mxu0 %v19967_v4  ;;  %18222 = vmatprep.subr.mxu1 %v19967_v4 }
 0xb27   :  { %18210 = vmatmul.mubr.msk.f32.vlgmr.msra.gmra.mrb[80].mxu0 %vm2292_vm4, %v4912_v51  ;;  %18215 = vmatmul.mubr.msk.f32.vlgmr.msra.gmra.mrb[80].mxu1 %vm2292_vm4, %v4982_v38 }
 0xb28   :  { %18219 = vmatprep.mubr.msk.f32.mxu0 %vm19968_vm0, %v19967_v4  ;;  %18224 = vmatprep.mubr.msk.f32.mxu1 %vm19968_vm0, %v19967_v4 }
 0xb29   :  { %v5643_v43 = vpop.f32.mrb[66].mxu0  ;;  %v5713_v57 = vpop.f32.mrb[66].mxu1 }
 0xb2a   :  { %v5644_v45 = vadd.f32 %v5643_v43, %v5152_v41  ;;  %v5714_v37 = vadd.f32 %v5713_v57, %v5156_v33  ;;  %v18087_v46 = vpop.f32.mrb[67].mxu0  ;;  %v18098_v48 = vpop.f32.mrb[67].mxu1 }
 0xb2c   :  { %18218 = vmatpush3.xpose.msk.msra.mxu0 %vm2292_vm4, %v5644_v45  ;;  %18223 = vmatpush3.xpose.msk.msra.mxu1 %vm2292_vm4, %v5714_v37 }
 0xb2d   :  { %18227 = vmatprep.subr.mxu0 %v19967_v4  ;;  %18232 = vmatprep.subr.mxu1 %v19967_v4 }
 0xb2f   :  { %18220 = vmatmul.mubr.msk.f32.vlgmr.msra.gmra.mrb[82].mxu0 %vm2292_vm4, %v5052_v49  ;;  %18225 = vmatmul.mubr.msk.f32.vlgmr.msra.gmra.mrb[82].mxu1 %vm2292_vm4, %v5122_v50 }
 0xb30   :  { %18229 = vmatprep.mubr.msk.f32.mxu0 %vm19968_vm0, %v19967_v4  ;;  %18234 = vmatprep.mubr.msk.f32.mxu1 %vm19968_vm0, %v19967_v4 }
 0xb31   :  { %v5815_v56 = vpop.f32.mrb[68].mxu0  ;;  %v5885_v44 = vpop.f32.mrb[68].mxu1 }
 0xb32   :  { %v5816_v3 = vadd.f32 %v5815_v56, %v5720_v53  ;;  %v5886_v58 = vadd.f32 %v5885_v44, %v5724_v54  ;;  %v18109_v59 = vpop.f32.mrb[69].mxu0  ;;  %v18120_v60 = vpop.f32.mrb[69].mxu1 }
 0xb34   :  { %18228 = vmatpush3.msra.mxu0 %v5816_v3  ;;  %18233 = vmatpush3.msra.mxu1 %v5886_v58 }
 0xb35   :  { %18237 = vmatprep.subr.mxu0 %v19967_v4  ;;  %18242 = vmatprep.subr.mxu1 %v19967_v4 }
 0xb39   :  { %v20994_v0 = vpop.f32.mrb[70].mxu0  ;;  %v6025_v61 = vpop.f32.mrb[70].mxu1 }
 0xb3a   :  { %v20996_v62 = vadd.f32 %v6025_v61, %v5732_v63  ;;  %v18131_v5 = vpop.f32.mrb[71].mxu0  ;;  %v18142_v6 = vpop.f32.mrb[71].mxu1 }
 0xb41   :  { %v6095_v12 = vpop.f32.mrb[72].mxu0  ;;  %v6165_v14 = vpop.f32.mrb[72].mxu1 }
 0xb42   :  { %v21002_v15 = vadd.f32 %v6095_v12, %v5736_v11  ;;  %v21004_v16 = vadd.f32 %v6165_v14, %v5740_v7  ;;  %v18153_v2 = vpop.f32.mrb[73].mxu0  ;;  %v18164_v47 = vpop.f32.mrb[73].mxu1 }
 0xb49   :  { %v6235_v19 = vpop.f32.mrb[74].mxu0  ;;  %v6305_v23 = vpop.f32.mrb[74].mxu1 }
 0xb4a   :  { %v21008_v24 = vadd.f32 %v6235_v19, %v5744_v17  ;;  %v21010_v20 = vadd.f32 %v6305_v23, %v5748_v18  ;;  %v18175_v25 = vpop.f32.mrb[75].mxu0  ;;  %v18186_v21 = vpop.f32.mrb[75].mxu1 }
 0xbea   :  { %v6381_v26 = vpop.f32.mrb[76].mxu0  ;;  %v6457_v27 = vpop.f32.mrb[76].mxu1 }
 0xbeb   :  { %v18191_v29 = vpop.f32.mrb[77].mxu0  ;;  %v18196_v30 = vpop.f32.mrb[77].mxu1  ;;  %v6920_v31 = vsel %vm218_vm1, %v6457_v27, -inf  ;;  %v6917_v35 = vsel %vm218_vm1, %v6381_v26, -inf }
 0xbec   :  { %6921 = vmax.xlane.f32.xlu0 %v6920_v31  ;;  %6918 = vmax.xlane.f32.xlu1 %v6917_v35 }
 0xbf2   :  { %v6533_v36 = vpop.f32.mrb[78].mxu0  ;;  %v6609_v51 = vpop.f32.mrb[78].mxu1 }
 0xbf3   :  { %v18201_v38 = vpop.f32.mrb[79].mxu0  ;;  %v18206_v39 = vpop.f32.mrb[79].mxu1  ;;  %v6926_v40 = vsel %vm218_vm1, %v6609_v51, -inf  ;;  %v6923_v41 = vsel %vm218_vm1, %v6533_v36, -inf }
 0xbf4   :  { %6927 = vmax.xlane.f32.xlu0 %v6926_v40  ;;  %6924 = vmax.xlane.f32.xlu1 %v6923_v41 }
 0xbfa   :  { %v6685_v33 = vpop.f32.mrb[80].mxu0  ;;  %v6761_v34 = vpop.f32.mrb[80].mxu1 }
 0xbfb   :  { %v18211_v42 = vpop.f32.mrb[81].mxu0  ;;  %v18216_v43 = vpop.f32.mrb[81].mxu1  ;;  %v6932_v57 = vsel %vm218_vm1, %v6761_v34, -inf  ;;  %v6929_v45 = vsel %vm218_vm1, %v6685_v33, -inf }
 0xbfc   :  { %6933 = vmax.xlane.f32.xlu0 %v6932_v57  ;;  %6930 = vmax.xlane.f32.xlu1 %v6929_v45 }
 0xc02   :  { %v6837_v37 = vpop.f32.mrb[82].mxu0  ;;  %v6913_v46 = vpop.f32.mrb[82].mxu1 }
 0xc03   :  { %v18221_v48 = vpop.f32.mrb[83].mxu0  ;;  %v18226_v49 = vpop.f32.mrb[83].mxu1  ;;  %v6938_v50 = vsel %vm218_vm1, %v6913_v46, -inf  ;;  %v6935_v53 = vsel %vm218_vm1, %v6837_v37, -inf }
 0xc04   :  { %6939 = vmax.xlane.f32.xlu0 %v6938_v50  ;;  %6936 = vmax.xlane.f32.xlu1 %v6935_v53  ;;  %v5728_v49 = vrot.slane %v20911_v1, %v20041_v10 }
 0xc79   :  { %v6922_v54 = vpop.xlane.xlu0 %6921  ;;  %v6919_v56 = vpop.xlane.xlu1 %6918 }
 0xc7a   :  { %v6942_v44 = vsub.f32 %v6457_v27, %v6922_v54  ;;  %v6941_v3 = vsub.f32 %v6381_v26, %v6919_v56 }
 0xc7c   :  { %v6951_v58 = vmul.f32 1.442695, %v6942_v44  ;;  %v6949_v59 = vmul.f32 1.442695, %v6941_v3  ;;  %v5956_v44 = vadd.f32 %v20994_v0, %v5728_v49 }
 0xc7e   :  { %19855 = vpow2.f32 %v6951_v58 }
 0xc7f   :  { %19857 = vpow2.f32 %v6949_v59 }
 0xc81   :  { %v6928_v60 = vpop.xlane.xlu0 %6927  ;;  %v6925_v63 = vpop.xlane.xlu1 %6924 }
 0xc82   :  { %v6944_v61 = vsub.f32 %v6609_v51, %v6928_v60  ;;  %v6943_v5 = vsub.f32 %v6533_v36, %v6925_v63 }
 0xc84   :  { %v6955_v6 = vmul.f32 1.442695, %v6944_v61  ;;  %v6953_v11 = vmul.f32 1.442695, %v6943_v5 }
 0xc86   :  { %19859 = vpow2.f32 %v6955_v6 }
 0xc87   :  { %19861 = vpow2.f32 %v6953_v11 }
 0xc88   :  { %v19856_v7 = vpop.eup %19855 }
 0xc89   :  { %v19858_v12 = vpop.eup %19857  ;;  %v6934_v14 = vpop.xlane.xlu0 %6933  ;;  %v6968_v47 = vsel %vm218_vm1, %v19856_v7, 0.0 }
 0xc8a   :  { %v6931_v2 = vpop.xlane.xlu1 %6930  ;;  %v6946_v17 = vsub.f32 %v6761_v34, %v6934_v14  ;;  %6969 = vadd.xlane.f32.xlu0 %v6968_v47  ;;  %v6965_v19 = vsel %vm218_vm1, %v19858_v12, 0.0  ;;  %v4516_v14 = vld [vmem:[%s21069_s21 + $0xc] sm:$0xf]  ;;  %v4515_v47 = vld [vmem:[%s21069_s21 + $0x8] sm:$0xf] }
 0xc8b   :  { %v6945_v18 = vsub.f32 %v6685_v33, %v6931_v2  ;;  %6966 = vadd.xlane.f32.xlu1 %v6965_v19 }
 0xc8c   :  { %v6959_v23 = vmul.f32 1.442695, %v6946_v17 }
 0xc8d   :  { %v6957_v25 = vmul.f32 1.442695, %v6945_v18 }
 0xc8e   :  { %19863 = vpow2.f32 %v6959_v23  ;;  %v4518_v23 = vld [vmem:[%s21069_s21 + $0x14] sm:$0xf] }
 0xc8f   :  { %19865 = vpow2.f32 %v6957_v25 }
 0xc90   :  { %v19860_v21 = vpop.eup %19859 }
 0xc91   :  { %v19862_v26 = vpop.eup %19861  ;;  %v6940_v27 = vpop.xlane.xlu0 %6939  ;;  %v6974_v30 = vsel %vm218_vm1, %v19860_v21, 0.0 }
 0xc92   :  { %v6937_v29 = vpop.xlane.xlu1 %6936  ;;  %v6948_v31 = vsub.f32 %v6913_v46, %v6940_v27  ;;  %6975 = vadd.xlane.f32.xlu0 %v6974_v30  ;;  %v6971_v36 = vsel %vm218_vm1, %v19862_v26, 0.0  ;;  %v4520_v30 = vld [vmem:[%s21069_s21 + $0x1c] sm:$0xf] }
 0xc93   :  { %v6947_v35 = vsub.f32 %v6837_v37, %v6937_v29  ;;  %6972 = vadd.xlane.f32.xlu1 %v6971_v36 }
 0xc94   :  { %v6963_v51 = vmul.f32 1.442695, %v6948_v31 }
 0xc95   :  { %v6961_v38 = vmul.f32 1.442695, %v6947_v35  ;;  %v4519_v35 = vld [vmem:[%s21069_s21 + $0x18] sm:$0xf] }
 0xc96   :  { %19867 = vpow2.f32 %v6963_v51 }
 0xc97   :  { %19869 = vpow2.f32 %v6961_v38 }
 0xc98   :  { %v19864_v39 = vpop.eup %19863 }
 0xc99   :  { %v19866_v40 = vpop.eup %19865  ;;  %v6980_v41 = vsel %vm218_vm1, %v19864_v39, 0.0 }
 0xc9a   :  { %6981 = vadd.xlane.f32.xlu0 %v6980_v41  ;;  %v6977_v33 = vsel %vm218_vm1, %v19866_v40, 0.0 }
 0xc9b   :  { %6978 = vadd.xlane.f32.xlu1 %v6977_v33 }
 0xca0   :  { %v19868_v34 = vpop.eup %19867 }
 0xca1   :  { %v19870_v42 = vpop.eup %19869  ;;  %v6986_v43 = vsel %vm218_vm1, %v19868_v34, 0.0 }
 0xca2   :  { %6987 = vadd.xlane.f32.xlu0 %v6986_v43  ;;  %v6983_v57 = vsel %vm218_vm1, %v19870_v42, 0.0 }
 0xca3   :  { %6984 = vadd.xlane.f32.xlu1 %v6983_v57 }
 0xd17   :  { %v6970_v45 = vpop.xlane.xlu0 %6969 }
 0xd18   :  { %19871 = vrcp.f32 %v6970_v45  ;;  %v6967_v37 = vpop.xlane.xlu1 %6966 }
 0xd19   :  { %19873 = vrcp.f32 %v6967_v37 }
 0xd1f   :  { %v6976_v46 = vpop.xlane.xlu0 %6975 }
 0xd20   :  { %19875 = vrcp.f32 %v6976_v46  ;;  %v6973_v48 = vpop.xlane.xlu1 %6972 }
 0xd21   :  { %19877 = vrcp.f32 %v6973_v48 }
 0xd22   :  { %v19872_v50 = vpop.eup %19871 }
 0xd23   :  { %v19874_v53 = vpop.eup %19873  ;;  %v6998_v54 = vmul.f32 %v19872_v50, %v19856_v7 }
 0xd24   :  { %v6997_v56 = vmul.f32 %v19874_v53, %v19858_v12 }
 0xd25   :  { %18235 = vmatmul.mubr.msk.f32.vlgmr.msra.gmra.mrb[84].mxu1 %vm218_vm1, %v6998_v54 }
 0xd26   :  { %18230 = vmatmul.mubr.msk.f32.vlgmr.msra.gmra.mrb[84].mxu0 %vm218_vm1, %v6997_v56  ;;  %18243 = vmatpush3.msra.mxu1 %v20996_v62 }
 0xd27   :  { %18238 = vmatpush3.msra.mxu0 %v5956_v44  ;;  %v6982_v3 = vpop.xlane.xlu0 %6981  ;;  %18239 = vmatprep.mubr.msk.f32.mxu0 %vm19968_vm0, %v19967_v4 }
 0xd28   :  { %19879 = vrcp.f32 %v6982_v3  ;;  %v6979_v1 = vpop.xlane.xlu1 %6978  ;;  %18244 = vmatprep.mubr.msk.f32.mxu1 %vm19968_vm0, %v19967_v4  ;;  %18247 = vmatprep.subr.mxu0 %v19967_v4 }
 0xd29   :  { %19881 = vrcp.f32 %v6979_v1  ;;  %18252 = vmatprep.subr.mxu1 %v19967_v4 }
 0xd2a   :  { %v19876_v0 = vpop.eup %19875 }
 0xd2b   :  { %v19878_v58 = vpop.eup %19877  ;;  %v7000_v59 = vmul.f32 %v19876_v0, %v19860_v21  ;;  %v4517_v21 = vld [vmem:[%s21069_s21 + $0x10] sm:$0xf] }
 0xd2c   :  { %v6999_v60 = vmul.f32 %v19878_v58, %v19862_v26 }
 0xd2d   :  { %18245 = vmatmul.mubr.msk.f32.vlgmr.msra.gmra.mrb[86].mxu1 %vm218_vm1, %v7000_v59 }
 0xd2e   :  { %18240 = vmatmul.mubr.msk.f32.vlgmr.msra.gmra.mrb[86].mxu0 %vm218_vm1, %v6999_v60  ;;  %18253 = vmatpush3.msra.mxu1 %v21004_v16 }
 0xd2f   :  { %18248 = vmatpush3.msra.mxu0 %v21002_v15  ;;  %v6988_v62 = vpop.xlane.xlu0 %6987  ;;  %18249 = vmatprep.mubr.msk.f32.mxu0 %vm19968_vm0, %v19967_v4 }
 0xd30   :  { %19883 = vrcp.f32 %v6988_v62  ;;  %v6985_v63 = vpop.xlane.xlu1 %6984  ;;  %18254 = vmatprep.mubr.msk.f32.mxu1 %vm19968_vm0, %v19967_v4  ;;  %18257 = vmatprep.subr.mxu0 %v19967_v4 }
 0xd31   :  { %19885 = vrcp.f32 %v6985_v63  ;;  %18262 = vmatprep.subr.mxu1 %v19967_v4 }
 0xd32   :  { %v19880_v61 = vpop.eup %19879 }
 0xd33   :  { %v19882_v5 = vpop.eup %19881  ;;  %v7002_v6 = vmul.f32 %v19880_v61, %v19864_v39 }
 0xd34   :  { %v7001_v16 = vmul.f32 %v19882_v5, %v19866_v40  ;;  %v21128_v5 = vld [vmem:[%s16500_s25] sm:$0x7f]  ;;  %s22155_s25 = sld [smem:[%s22257_s0 + %s20003_s22]]  }
 0xd35   :  { %18255 = vmatmul.mubr.msk.f32.vlgmr.msra.gmra.mrb[88].mxu1 %vm218_vm1, %v7002_v6 }
 0xd36   :  { %18250 = vmatmul.mubr.msk.f32.vlgmr.msra.gmra.mrb[88].mxu0 %vm218_vm1, %v7001_v16  ;;  %18263 = vmatpush3.msra.mxu1 %v21010_v20  ;;  %v4514_v20 = vld [vmem:[%s21069_s21 + $0x4] sm:$0xf] }
 0xd37   :  { %18258 = vmatpush3.msra.mxu0 %v21008_v24  ;;  %18259 = vmatprep.mubr.msk.f32.mxu0 %vm19968_vm0, %v19967_v4  ;;  %v4513_v24 = vld [vmem:[%s21069_s21] sm:$0xf]  ;;  %s21974_s21 = sld [smem:[%s22257_s0 + %s20002_s18]]  }
 0xd38   :  { %18264 = vmatprep.mubr.msk.f32.mxu1 %vm19968_vm0, %v19967_v4  ;;  %18267 = vmatprep.subr.mxu0 %v19967_v4 }
 0xd39   :  { %18272 = vmatprep.subr.mxu1 %v19967_v4 }
 0xd3a   :  { %v19884_v15 = vpop.eup %19883 }
 0xd3b   :  { %v19886_v11 = vpop.eup %19885  ;;  %v7004_v7 = vmul.f32 %v19884_v15, %v19868_v34 }
 0xd3c   :  { %v7003_v12 = vmul.f32 %v19886_v11, %v19870_v42 }
 0xd3d   :  { %18265 = vmatmul.mubr.msk.f32.vlgmr.msra.gmra.mrb[90].mxu1 %vm218_vm1, %v7004_v7 }
 0xd3e   :  { %18260 = vmatmul.mubr.msk.f32.vlgmr.msra.gmra.mrb[90].mxu0 %vm218_vm1, %v7003_v12  ;;  %18274 = vmatprep.mubr.msk.f32.mxu1 %vm19968_vm0, %v19967_v4 }
 0xd3f   :  { %18269 = vmatprep.mubr.msk.f32.mxu0 %vm19968_vm0, %v19967_v4  ;;  %18268 = vmatpush3.msk.msra.mxu0 %vm3576_vm5, %v4513_v24  ;;  %v8215_v24 = vrot.slane %v21128_v5, %v20035_v8 }
 0xd40   :  { %18273 = vmatpush3.msk.msra.mxu1 %vm3576_vm5, %v4514_v20  ;;  %18277 = vmatprep.subr.mxu0 %v19967_v4 }
 0xd41   :  { %18282 = vmatprep.subr.mxu1 %v19967_v4 }
 0xdf8   :  { %v7147_v2 = vpop.f32.mrb[84].mxu1 }
 0xdf9   :  { %v7074_v17 = vpop.f32.mrb[84].mxu0  ;;  %v18236_v18 = vpop.f32.mrb[85].mxu1  ;;  %18275 = vmatmul.mubr.msk.f32.vlgmr.msra.gmra.mrb[92].mxu1 %vm2292_vm4, %v7147_v2 }
 0xdfa   :  { %v18231_v19 = vpop.f32.mrb[85].mxu0  ;;  %18270 = vmatmul.mubr.msk.f32.vlgmr.msra.gmra.mrb[92].mxu0 %vm2292_vm4, %v7074_v17  ;;  %18283 = vmatpush3.msk.msra.mxu1 %vm3576_vm5, %v4516_v14 }
 0xdfb   :  { %18278 = vmatpush3.msk.msra.mxu0 %vm3576_vm5, %v4515_v47  ;;  %18279 = vmatprep.mubr.msk.f32.mxu0 %vm19968_vm0, %v19967_v4 }
 0xdfc   :  { %18284 = vmatprep.mubr.msk.f32.mxu1 %vm19968_vm0, %v19967_v4  ;;  %18287 = vmatprep.subr.mxu0 %v19967_v4 }
 0xdfd   :  { %18292 = vmatprep.subr.mxu1 %v19967_v4 }
 0xe00   :  { %v7293_v25 = vpop.f32.mrb[86].mxu1 }
 0xe01   :  { %v7220_v26 = vpop.f32.mrb[86].mxu0  ;;  %v18246_v27 = vpop.f32.mrb[87].mxu1  ;;  %18285 = vmatmul.mubr.msk.f32.vlgmr.msra.gmra.mrb[94].mxu1 %vm2292_vm4, %v7293_v25  ;;  %v4522_v25 = vld [vmem:[%s16498_s29 + $0x8] sm:$0xff] }
 0xe02   :  { %v18241_v29 = vpop.f32.mrb[87].mxu0  ;;  %18280 = vmatmul.mubr.msk.f32.vlgmr.msra.gmra.mrb[94].mxu0 %vm2292_vm4, %v7220_v26  ;;  %18293 = vmatpush3.msk.msra.mxu1 %vm3576_vm5, %v4518_v23  ;;  %v4521_v23 = vld [vmem:[%s16498_s29] sm:$0xff]  ;;  %v4523_v26 = vld [vmem:[%s16498_s29 + $0x10] sm:$0xff]  ;;  %v4524_v27 = vld [vmem:[%s16498_s29 + $0x18] sm:$0xff]  ;;  %s16516_s29 = sld [smem:[%s22257_s0 + %s20004_s26]]  }
 0xe03   :  { %18288 = vmatpush3.msk.msra.mxu0 %vm3576_vm5, %v4517_v21  ;;  %18289 = vmatprep.mubr.msk.f32.mxu0 %vm19968_vm0, %v19967_v4  ;;  %v19445_v21 = vpack.c.bf16 %v4522_v25, %v4521_v23  ;;  %v4525_v29 = vld [vmem:[%s16499_s3] sm:$0xff] }
 0xe04   :  { %18294 = vmatprep.mubr.msk.f32.mxu1 %vm19968_vm0, %v19967_v4  ;;  %18297 = vmatprep.subr.mxu0 %v19967_v4 }
 0xe05   :  { %18302 = vmatprep.subr.mxu1 %v19967_v4 }
 0xe08   :  { %v7439_v31 = vpop.f32.mrb[88].mxu1 }
 0xe09   :  { %v7366_v36 = vpop.f32.mrb[88].mxu0  ;;  %v18256_v51 = vpop.f32.mrb[89].mxu1  ;;  %18295 = vmatmul.mubr.msk.f32.vlgmr.msra.gmra.mrb[96].mxu1 %vm2292_vm4, %v7439_v31 }
 0xe0a   :  { %v18251_v38 = vpop.f32.mrb[89].mxu0  ;;  %18290 = vmatmul.mubr.msk.f32.vlgmr.msra.gmra.mrb[96].mxu0 %vm2292_vm4, %v7366_v36  ;;  %18303 = vmatpush3.msk.msra.mxu1 %vm3576_vm5, %v4520_v30  ;;  %v4526_v30 = vld [vmem:[%s16499_s3 + $0x8] sm:$0xff] }
 0xe0b   :  { %18298 = vmatpush3.msk.msra.mxu0 %vm3576_vm5, %v4519_v35  ;;  %18299 = vmatprep.mubr.msk.f32.mxu0 %vm19968_vm0, %v19967_v4  ;;  %v19451_v31 = vpack.c.bf16 %v4526_v30, %v4525_v29  ;;  %v8432_v30 = vld [vmem:[%s21166_s7 + $0x40] sm:$0xff] }
 0xe0c   :  { %18304 = vmatprep.mubr.msk.f32.mxu1 %vm19968_vm0, %v19967_v4  ;;  %19444 = vmatprep.subr.bf16.mxu0 %v19972_v32 }
 0xe0d   :  { %19450 = vmatprep.subr.bf16.mxu1 %v19972_v32 }
 0xe10   :  { %v7585_v39 = vpop.f32.mrb[90].mxu1 }
 0xe11   :  { %v7512_v40 = vpop.f32.mrb[90].mxu0  ;;  %v18266_v41 = vpop.f32.mrb[91].mxu1  ;;  %18305 = vmatmul.mubr.msk.f32.vlgmr.msra.gmra.mrb[98].mxu1 %vm2292_vm4, %v7585_v39 }
 0xe12   :  { %v18261_v33 = vpop.f32.mrb[91].mxu0  ;;  %18300 = vmatmul.mubr.msk.f32.vlgmr.msra.gmra.mrb[98].mxu0 %vm2292_vm4, %v7512_v40  ;;  %18326 = vmatprep.mubr.msk.f32.mxu1 %vm19968_vm0, %v19967_v4 }
 0xe13   :  { %18315 = vmatprep.mubr.msk.f32.mxu0 %vm19968_vm0, %v19967_v4  ;;  %19446 = vmatpush3.bf16.msra.mxu0 %v19445_v21 }
 0xe14   :  { %19447 = vmatprep.subr.bf16.mxu0 %v19972_v32  ;;  %19452 = vmatpush3.bf16.msra.mxu1 %v19451_v31  ;;  %v8422_v31 = vrot.slane %v21128_v5, %v20635_v52 }
 0xe15   :  { %19453 = vmatprep.subr.bf16.mxu1 %v19972_v32 }
 0xecc   :  { %v7737_v34 = vpop.f32.mrb[92].mxu1 }
 0xecd   :  { %v7661_v42 = vpop.f32.mrb[92].mxu0  ;;  %v8198_v43 = vsel %vm544_vm3, %v7737_v34, 0.0  ;;  %v18276_v57 = vpop.f32.mrb[93].mxu1  ;;  %v8236_v34 = vrot.slane %v21128_v5, %v20038_v9 }
 0xece   :  { %v8197_v45 = vsel %vm544_vm3, %v7661_v42, 0.0  ;;  %v18271_v37 = vpop.f32.mrb[93].mxu0  ;;  %v8241_v57 = vrot.slane %v21128_v5, %v20041_v10 }
 0xecf   :  { %v8199_v46 = vadd.f32 %v8198_v43, %v8197_v45 }
 0xed4   :  { %v7889_v48 = vpop.f32.mrb[94].mxu1 }
 0xed5   :  { %v7813_v49 = vpop.f32.mrb[94].mxu0  ;;  %v18286_v50 = vpop.f32.mrb[95].mxu1  ;;  %v8202_v44 = vsel %vm544_vm3, %v7889_v48, 0.0  ;;  %v4528_v48 = vld [vmem:[%s16499_s3 + $0x18] sm:$0xff] }
 0xed6   :  { %v8200_v53 = vsel %vm544_vm3, %v7813_v49, 0.0  ;;  %v18281_v54 = vpop.f32.mrb[95].mxu0  ;;  %v8246_v50 = vrot.slane %v21128_v5, %v20600_v22 }
 0xed7   :  { %v8201_v56 = vadd.f32 %v8200_v53, %v8199_v46  ;;  %v4527_v46 = vld [vmem:[%s16499_s3 + $0x10] sm:$0xff]  ;;  %s16514_s3 = sld [smem:[%s22257_s0 + %s20005_s30]]  }
 0xed8   :  { %v19454_v49 = vpack.c.bf16 %v4528_v48, %v4527_v46  ;;  %v8441_v46 = vld [vmem:[%s21166_s7 + $0x88] sm:$0xff]  ;;  %v8444_v48 = vld [vmem:[%s21166_s7 + $0xa0] sm:$0xff] }
 0xed9   :  { %v8203_v3 = vadd.f32 %v8202_v44, %v8201_v56 }
 0xeda   :  { %19455 = vmatpush3.bf16.msra.mxu1 %v19454_v49  ;;  %v8445_v49 = vld [vmem:[%s21166_s7 + $0xa8] sm:$0xff] }
 0xedb   :  { %19462 = vmatprep.subr.bf16.mxu1 %v19972_v32 }
 0xedc   :  { %v8041_v1 = vpop.f32.mrb[96].mxu1 }
 0xedd   :  { %v7965_v0 = vpop.f32.mrb[96].mxu0  ;;  %v18296_v58 = vpop.f32.mrb[97].mxu1  ;;  %v8206_v63 = vsel %vm544_vm3, %v8041_v1, 0.0 }
 0xede   :  { %v8204_v59 = vsel %vm544_vm3, %v7965_v0, 0.0  ;;  %v18291_v60 = vpop.f32.mrb[97].mxu0 }
 0xedf   :  { %v8205_v62 = vadd.f32 %v8204_v59, %v8203_v3  ;;  %v8324_v3 = vrot.slane %v21128_v5, %v20608_v28 }
 0xee1   :  { %v8207_v61 = vadd.f32 %v8206_v63, %v8205_v62 }
 0xee4   :  { %v8193_v6 = vpop.f32.mrb[98].mxu1 }
 0xee5   :  { %v8117_v16 = vpop.f32.mrb[98].mxu0  ;;  %v18306_v15 = vpop.f32.mrb[99].mxu1  ;;  %v8210_v20 = vsel %vm544_vm3, %v8193_v6, 0.0  ;;  %v8425_v6 = vld [vmem:[%s21166_s7 + $0x8] sm:$0xff] }
 0xee6   :  { %v8208_v11 = vsel %vm544_vm3, %v8117_v16, 0.0  ;;  %v18301_v7 = vpop.f32.mrb[99].mxu0  ;;  %v8428_v16 = vld [vmem:[%s21166_s7 + $0x20] sm:$0xff] }
 0xee7   :  { %v8209_v12 = vadd.f32 %v8208_v11, %v8207_v61  ;;  %v8424_v61 = vld [vmem:[%s21166_s7] sm:$0xff]  ;;  %v8429_v11 = vld [vmem:[%s21166_s7 + $0x28] sm:$0xff] }
 0xee8   :  { %v19457_v15 = vpack.c.bf16 %v8425_v6, %v8424_v61  ;;  %v19463_v7 = vpack.c.bf16 %v8429_v11, %v8428_v16  ;;  %v8450_v6 = vld [vmem:[%s21166_s7 + $0xd0] sm:$0xff]  ;;  %v8451_v16 = vld [vmem:[%s21166_s7 + $0xd8] sm:$0xff] }
 0xee9   :  { %v8211_v14 = vadd.f32 %v8210_v20, %v8209_v12  ;;  %v8426_v12 = vld [vmem:[%s21166_s7 + $0x10] sm:$0xff]  ;;  %v8455_v11 = vld [vmem:[%s21166_s7 + $0xf8] sm:$0xff] }
 0xeea   :  { %v8430_v20 = vld [vmem:[%s21166_s7 + $0x30] sm:$0xff] }
 0xeeb   :  { %v8216_v2 = vadd.f32 %v8215_v24, %v8211_v14  ;;  %v8427_v24 = vld [vmem:[%s21166_s7 + $0x18] sm:$0xff] }
 0xeec   :  { %v19460_v14 = vpack.c.bf16 %v8427_v24, %v8426_v12  ;;  %v8456_v24 = vld [vmem:[%s21222_s11] sm:$0xff] }
 0xeed   :  { %v8217_v47 = vadd.f32 %v8216_v2, %v20646_v13  ;;  %v19448_v13 = vpack.c.bf16 %v4524_v27, %v4523_v26  ;;  %v8431_v2 = vld [vmem:[%s21166_s7 + $0x38] sm:$0xff] }
 0xeef   :  { %v8218_v17 = vsel %vm544_vm3, %v8217_v47, 0.0  ;;  %v8221_v18 = vmul.f32 %v8217_v47, %v8217_v47  ;;  %19449 = vmatpush3.bf16.msra.mxu0 %v19448_v13  ;;  %v8417_v13 = vrot.slane %v21128_v5, %v20632_v55 }
 0xef0   :  { %8219 = vadd.xlane.f32.xlu1 %v8218_v17  ;;  %19456 = vmatprep.subr.bf16.mxu0 %v19972_v32 }
 0xef1   :  { %v8222_v19 = vsel %vm544_vm3, %v8221_v18, 0.0 }
 0xef2   :  { %8223 = vadd.xlane.f32.xlu0 %v8222_v19 }
 0xf7d   :  { %v8220_v35 = vpop.xlane.xlu1 %8219 }
 0xf7e   :  { %v8225_v36 = vmul.f32 0.03125, %v8220_v35 }
 0xf7f   :  { %v8224_v51 = vpop.xlane.xlu0 %8223 }
 0xf80   :  { %v8227_v38 = vmul.f32 %v8225_v36, %v8225_v36  ;;  %v8226_v39 = vmul.f32 0.03125, %v8224_v51  ;;  %v8229_v33 = vsub.f32 %v8217_v47, %v8225_v36  ;;  %v19466_v47 = vpack.c.bf16 %v8431_v2, %v8430_v20  ;;  %v8433_v36 = vld [vmem:[%s21166_s7 + $0x48] sm:$0xff]  ;;  %v8436_v51 = vld [vmem:[%s21166_s7 + $0x60] sm:$0xff] }
 0xf81   :  { %v8457_v20 = vld [vmem:[%s21222_s11 + $0x8] sm:$0xff] }
 0xf82   :  { %v8228_v40 = vsub.f32 %v8226_v39, %v8227_v38  ;;  %v8437_v38 = vld [vmem:[%s21166_s7 + $0x68] sm:$0xff] }
 0xf83   :  { %v8461_v2 = vld [vmem:[%s21222_s11 + $0x28] sm:$0xff] }
 0xf84   :  { %v8230_v41 = vadd.f32 1e-05, %v8228_v40  ;;  %v19469_v40 = vpack.c.bf16 %v8433_v36, %v8432_v30  ;;  %v8469_v30 = vld [vmem:[%s21222_s11 + $0x68] sm:$0xff]  ;;  %v8466_v36 = vld [vmem:[%s21222_s11 + $0x50] sm:$0xff] }
 0xf86   :  { %19887 = vrsqrt.f32 %v8230_v41  ;;  %v19475_v41 = vpack.c.bf16 %v8437_v38, %v8436_v51  ;;  %v8467_v51 = vld [vmem:[%s21222_s11 + $0x58] sm:$0xff]  ;;  %v8470_v38 = vld [vmem:[%s21222_s11 + $0x70] sm:$0xff] }
 0xf90   :  { %v19888_v42 = vpop.eup %19887 }
 0xf91   :  { %v8232_v43 = vmul.f32 %v19888_v42, %v8229_v33  ;;  %v8434_v33 = vld [vmem:[%s21166_s7 + $0x50] sm:$0xff]  ;;  %v8435_v42 = vld [vmem:[%s21166_s7 + $0x58] sm:$0xff] }
 0xf92   :  { %v19472_v5 = vpack.c.bf16 %v8435_v42, %v8434_v33  ;;  %v8472_v33 = vld [vmem:[%s21222_s11 + $0x80] sm:$0xff]  ;;  %v8473_v42 = vld [vmem:[%s21222_s11 + $0x88] sm:$0xff] }
 0xf93   :  { %v8237_v45 = vmul.f32 %v8236_v34, %v8232_v43  ;;  %v8438_v43 = vld [vmem:[%s21166_s7 + $0x70] sm:$0xff] }
 0xf95   :  { %v8242_v37 = vadd.f32 %v8241_v57, %v8237_v45  ;;  %v8439_v57 = vld [vmem:[%s21166_s7 + $0x78] sm:$0xff] }
 0xf96   :  { %v19478_v45 = vpack.c.bf16 %v8439_v57, %v8438_v43  ;;  %v8476_v43 = vld [vmem:[%s21222_s11 + $0xa0] sm:$0xff]  ;;  %v8477_v57 = vld [vmem:[%s21222_s11 + $0xa8] sm:$0xff] }
 0xf97   :  { %18316 = vmatmul.mubr.msk.f32.vlgmr.msra.gmra.mrb[100].mxu0 %vm544_vm3, %v8242_v37 }
 0xf98   :  { %18337 = vmatprep.mubr.msk.f32.mxu0 %vm19968_vm0, %v19967_v4  ;;  %19458 = vmatpush3.bf16.msra.mxu0 %v19457_v15  ;;  %v8454_v15 = vld [vmem:[%s21166_s7 + $0xf0] sm:$0xff] }
 0xf99   :  { %19459 = vmatprep.subr.bf16.mxu0 %v19972_v32  ;;  %v19502_v12 = vpack.c.bf16 %v8455_v11, %v8454_v15  ;;  %v8492_v15 = vld [vmem:[%s21307_s15 + $0x20] sm:$0xff]  ;;  %v8493_v11 = vld [vmem:[%s21307_s15 + $0x28] sm:$0xff] }
 0xf9c   :  { %19461 = vmatpush3.bf16.msra.mxu0 %v19460_v14  ;;  %v8460_v14 = vld [vmem:[%s21222_s11 + $0x20] sm:$0xff] }
 0xf9d   :  { %19468 = vmatprep.subr.bf16.mxu0 %v19972_v32 }
0x106a   :  { %v8316_v53 = vpop.f32.mrb[100].mxu0 }
0x106b   :  { %v8317_v54 = vadd.f32 %v8316_v53, %v8246_v50  ;;  %v18317_v56 = vpop.f32.mrb[101].mxu0  ;;  %v19487_v53 = vpack.c.bf16 %v8445_v49, %v8444_v48  ;;  %v8478_v48 = vld [vmem:[%s21222_s11 + $0xb0] sm:$0xff]  ;;  %v8479_v49 = vld [vmem:[%s21222_s11 + $0xb8] sm:$0xff] }
0x106c   :  { %v8443_v56 = vld [vmem:[%s21166_s7 + $0x98] sm:$0xff] }
0x106d   :  { %v8320_v44 = vmax.f32 %v8317_v54, 0.0  ;;  %v8442_v54 = vld [vmem:[%s21166_s7 + $0x90] sm:$0xff] }
0x106f   :  { %18327 = vmatmul.mubr.msk.f32.vlgmr.msra.gmra.mrb[100].mxu1 %vm544_vm3, %v8320_v44  ;;  %v8446_v44 = vld [vmem:[%s21166_s7 + $0xb0] sm:$0xff] }
0x1070   :  { %18348 = vmatprep.mubr.msk.f32.mxu1 %vm19968_vm0, %v19967_v4  ;;  %19464 = vmatpush3.bf16.msra.mxu1 %v19463_v7  ;;  %v19496_v7 = vpack.c.bf16 %v8451_v16, %v8450_v6  ;;  %v8488_v6 = vld [vmem:[%s21307_s15] sm:$0xff]  ;;  %v8489_v16 = vld [vmem:[%s21307_s15 + $0x8] sm:$0xff] }
0x1071   :  { %19465 = vmatprep.subr.bf16.mxu1 %v19972_v32 }
0x1074   :  { %19467 = vmatpush3.bf16.msra.mxu1 %v19466_v47  ;;  %v19505_v47 = vpack.c.bf16 %v8457_v20, %v8456_v24  ;;  %v8490_v24 = vld [vmem:[%s21307_s15 + $0x10] sm:$0xff]  ;;  %v8491_v20 = vld [vmem:[%s21307_s15 + $0x18] sm:$0xff] }
0x1075   :  { %19474 = vmatprep.subr.bf16.mxu1 %v19972_v32 }
0x1142   :  { %v8394_v1 = vpop.f32.mrb[100].mxu1 }
0x1143   :  { %v8395_v0 = vadd.f32 %v8394_v1, %v8324_v3  ;;  %v18328_v58 = vpop.f32.mrb[101].mxu1  ;;  %v8447_v3 = vld [vmem:[%s21166_s7 + $0xb8] sm:$0xff]  ;;  %v19484_v1 = vpack.c.bf16 %v8443_v56, %v8442_v54  ;;  %v8480_v54 = vld [vmem:[%s21222_s11 + $0xc0] sm:$0xff]  ;;  %v8481_v56 = vld [vmem:[%s21222_s11 + $0xc8] sm:$0xff] }
0x1144   :  { %v8448_v58 = vld [vmem:[%s21166_s7 + $0xc0] sm:$0xff] }
0x1145   :  { %v8398_v59 = vadd.f32 %v8395_v0, %v8242_v37  ;;  %v8440_v37 = vld [vmem:[%s21166_s7 + $0x80] sm:$0xff]  ;;  %v19490_v0 = vpack.c.bf16 %v8447_v3, %v8446_v44  ;;  %v8485_v3 = vld [vmem:[%s21222_s11 + $0xe8] sm:$0xff] }
0x1146   :  { %v19481_v50 = vpack.c.bf16 %v8441_v46, %v8440_v37  ;;  %v8474_v37 = vld [vmem:[%s21222_s11 + $0x90] sm:$0xff]  ;;  %v8475_v46 = vld [vmem:[%s21222_s11 + $0x98] sm:$0xff]  ;;  %v8484_v44 = vld [vmem:[%s21222_s11 + $0xe0] sm:$0xff] }
0x1147   :  { %v8399_v60 = vsel %vm544_vm3, %v8398_v59, 0.0  ;;  %v8402_v62 = vmul.f32 %v8398_v59, %v8398_v59 }
0x1148   :  { %8400 = vadd.xlane.f32.xlu1 %v8399_v60  ;;  %v8452_v60 = vld [vmem:[%s21166_s7 + $0xe0] sm:$0xff] }
0x1149   :  { %v8403_v63 = vsel %vm544_vm3, %v8402_v62, 0.0  ;;  %v8453_v62 = vld [vmem:[%s21166_s7 + $0xe8] sm:$0xff] }
0x114a   :  { %8404 = vadd.xlane.f32.xlu0 %v8403_v63  ;;  %v19499_v61 = vpack.c.bf16 %v8453_v62, %v8452_v60  ;;  %v8486_v60 = vld [vmem:[%s21222_s11 + $0xf0] sm:$0xff]  ;;  %v8487_v62 = vld [vmem:[%s21222_s11 + $0xf8] sm:$0xff] }
0x11d5   :  { %v8401_v17 = vpop.xlane.xlu1 %8400 }
0x11d6   :  { %v8406_v18 = vmul.f32 0.03125, %v8401_v17  ;;  %v19511_v17 = vpack.c.bf16 %v8461_v2, %v8460_v14  ;;  %v8494_v14 = vld [vmem:[%s21307_s15 + $0x30] sm:$0xff]  ;;  %v8495_v2 = vld [vmem:[%s21307_s15 + $0x38] sm:$0xff] }
0x11d7   :  { %v8405_v19 = vpop.xlane.xlu0 %8404 }
0x11d8   :  { %v8408_v23 = vmul.f32 %v8406_v18, %v8406_v18  ;;  %v8407_v25 = vmul.f32 0.03125, %v8405_v19  ;;  %v8410_v27 = vsub.f32 %v8398_v59, %v8406_v18  ;;  %v8449_v59 = vld [vmem:[%s21166_s7 + $0xc8] sm:$0xff]  ;;  %v8458_v18 = vld [vmem:[%s21222_s11 + $0x10] sm:$0xff]  ;;  %v8459_v19 = vld [vmem:[%s21222_s11 + $0x18] sm:$0xff]  ;;  %s16515_s7 = sld [smem:[%s22257_s0 + %s20006_s4]]  }
0x11d9   :  { %v19493_v63 = vpack.c.bf16 %v8449_v59, %v8448_v58  ;;  %v8482_v58 = vld [vmem:[%s21222_s11 + $0xd0] sm:$0xff]  ;;  %v8483_v59 = vld [vmem:[%s21222_s11 + $0xd8] sm:$0xff] }
0x11da   :  { %v8409_v21 = vsub.f32 %v8407_v25, %v8408_v23  ;;  %v8462_v23 = vld [vmem:[%s21222_s11 + $0x30] sm:$0xff]  ;;  %v8463_v25 = vld [vmem:[%s21222_s11 + $0x38] sm:$0xff] }
0x11dc   :  { %v8411_v26 = vadd.f32 1e-05, %v8409_v21  ;;  %v19508_v21 = vpack.c.bf16 %v8459_v19, %v8458_v18  ;;  %v8496_v18 = vld [vmem:[%s21307_s15 + $0x40] sm:$0xff]  ;;  %v8497_v19 = vld [vmem:[%s21307_s15 + $0x48] sm:$0xff] }
0x11de   :  { %19889 = vrsqrt.f32 %v8411_v26  ;;  %v19514_v26 = vpack.c.bf16 %v8463_v25, %v8462_v23  ;;  %v8500_v23 = vld [vmem:[%s21307_s15 + $0x60] sm:$0xff]  ;;  %v8501_v25 = vld [vmem:[%s21307_s15 + $0x68] sm:$0xff] }
0x11e8   :  { %v19890_v29 = vpop.eup %19889 }
0x11e9   :  { %v8413_v35 = vmul.f32 %v19890_v29, %v8410_v27  ;;  %v8464_v27 = vld [vmem:[%s21222_s11 + $0x40] sm:$0xff] }
0x11ea   :  { %v8468_v29 = vld [vmem:[%s21222_s11 + $0x60] sm:$0xff] }
0x11eb   :  { %v8418_v39 = vmul.f32 %v8417_v13, %v8413_v35  ;;  %v8465_v13 = vld [vmem:[%s21222_s11 + $0x48] sm:$0xff]  ;;  %v19523_v35 = vpack.c.bf16 %v8469_v30, %v8468_v29  ;;  %v8502_v29 = vld [vmem:[%s21307_s15 + $0x70] sm:$0xff]  ;;  %v8503_v30 = vld [vmem:[%s21307_s15 + $0x78] sm:$0xff] }
0x11ed   :  { %v21189_v34 = vadd.f32 %v8422_v31, %v8418_v39  ;;  %v19517_v31 = vpack.c.bf16 %v8465_v13, %v8464_v27  ;;  %v8471_v39 = vld [vmem:[%s21222_s11 + $0x78] sm:$0xff]  ;;  %v8498_v27 = vld [vmem:[%s21307_s15 + $0x50] sm:$0xff]  ;;  %s16518_s11 = sld [smem:[%s22257_s0 + %s20007_s8]]  }
0x11ee   :  { %v8499_v13 = vld [vmem:[%s21307_s15 + $0x58] sm:$0xff] }
0x11ef   :  { %18338 = vmatmul.mubr.msk.f32.vlgmr.msra.gmra.mrb[102].mxu0 %vm544_vm3, %v21189_v34  ;;  %18349 = vmatmul.mubr.msk.f32.vlgmr.msra.gmra.mrb[102].mxu1 %vm544_vm3, %v21189_v34 }
0x11f0   :  { %19470 = vmatpush3.bf16.msra.mxu0 %v19469_v40  ;;  %19476 = vmatpush3.bf16.msra.mxu1 %v19475_v41  ;;  %v19520_v40 = vpack.c.bf16 %v8467_v51, %v8466_v36  ;;  %v19526_v41 = vpack.c.bf16 %v8471_v39, %v8470_v38  ;;  %v8504_v36 = vld [vmem:[%s21307_s15 + $0x80] sm:$0xff]  ;;  %v8505_v51 = vld [vmem:[%s21307_s15 + $0x88] sm:$0xff] }
0x11f1   :  { %19471 = vmatprep.subr.bf16.mxu0 %v19972_v32  ;;  %19477 = vmatprep.subr.bf16.mxu1 %v19972_v32  ;;  %v8508_v38 = vld [vmem:[%s21307_s15 + $0xa0] sm:$0xff]  ;;  %v8509_v39 = vld [vmem:[%s21307_s15 + $0xa8] sm:$0xff] }
0x11f2   :  { %18359 = vmatprep.mubr.msk.f32.mxu0 %vm19968_vm0, %v19967_v4  ;;  %18370 = vmatprep.mubr.msk.f32.mxu1 %vm19968_vm0, %v19967_v4 }
0x11f4   :  { %19473 = vmatpush3.bf16.msra.mxu0 %v19472_v5  ;;  %19479 = vmatpush3.bf16.msra.mxu1 %v19478_v45  ;;  %v19529_v5 = vpack.c.bf16 %v8473_v42, %v8472_v33  ;;  %v19535_v45 = vpack.c.bf16 %v8477_v57, %v8476_v43  ;;  %v8506_v33 = vld [vmem:[%s21307_s15 + $0x90] sm:$0xff]  ;;  %v8507_v42 = vld [vmem:[%s21307_s15 + $0x98] sm:$0xff] }
0x11f5   :  { %19480 = vmatprep.subr.bf16.mxu0 %v19972_v32  ;;  %19486 = vmatprep.subr.bf16.mxu1 %v19972_v32  ;;  %v8510_v43 = vld [vmem:[%s21307_s15 + $0xb0] sm:$0xff]  ;;  %v8511_v57 = vld [vmem:[%s21307_s15 + $0xb8] sm:$0xff] }
0x11f7   :  { %18360 = vmatmul.mubr.msk.f32.vlgmr.msra.gmra.mrb[104].mxu0 %vm544_vm3, %v21189_v34  ;;  %18371 = vmatmul.mubr.msk.f32.vlgmr.msra.gmra.mrb[104].mxu1 %vm544_vm3, %v21189_v34 }
0x11f8   :  { %19482 = vmatpush3.bf16.msra.mxu0 %v19481_v50  ;;  %19488 = vmatpush3.bf16.msra.mxu1 %v19487_v53  ;;  %v19532_v50 = vpack.c.bf16 %v8475_v46, %v8474_v37  ;;  %v19538_v53 = vpack.c.bf16 %v8479_v49, %v8478_v48  ;;  %v8512_v37 = vld [vmem:[%s21307_s15 + $0xc0] sm:$0xff]  ;;  %v8513_v46 = vld [vmem:[%s21307_s15 + $0xc8] sm:$0xff] }
0x11f9   :  { %19483 = vmatprep.subr.bf16.mxu0 %v19972_v32  ;;  %19489 = vmatprep.subr.bf16.mxu1 %v19972_v32  ;;  %v8516_v48 = vld [vmem:[%s21307_s15 + $0xe0] sm:$0xff]  ;;  %v8517_v49 = vld [vmem:[%s21307_s15 + $0xe8] sm:$0xff] }
0x11fa   :  { %18381 = vmatprep.mubr.msk.f32.mxu0 %vm19968_vm0, %v19967_v4  ;;  %18392 = vmatprep.mubr.msk.f32.mxu1 %vm19968_vm0, %v19967_v4 }
0x11fc   :  { %19485 = vmatpush3.bf16.msra.mxu0 %v19484_v1  ;;  %19491 = vmatpush3.bf16.msra.mxu1 %v19490_v0  ;;  %v19541_v1 = vpack.c.bf16 %v8481_v56, %v8480_v54  ;;  %v19547_v0 = vpack.c.bf16 %v8485_v3, %v8484_v44  ;;  %v8514_v54 = vld [vmem:[%s21307_s15 + $0xd0] sm:$0xff]  ;;  %v8515_v56 = vld [vmem:[%s21307_s15 + $0xd8] sm:$0xff] }
0x11fd   :  { %19492 = vmatprep.subr.bf16.mxu0 %v19972_v32  ;;  %19498 = vmatprep.subr.bf16.mxu1 %v19972_v32  ;;  %v8518_v44 = vld [vmem:[%s21307_s15 + $0xf0] sm:$0xff]  ;;  %v8519_v3 = vld [vmem:[%s21307_s15 + $0xf8] sm:$0xff]  ;;  %s16517_s15 = sld [smem:[%s22257_s0 + %s20008_s12]]  }
0x11ff   :  { %18382 = vmatmul.mubr.msk.f32.vlgmr.msra.gmra.mrb[106].mxu0 %vm544_vm3, %v21189_v34  ;;  %18393 = vmatmul.mubr.msk.f32.vlgmr.msra.gmra.mrb[106].mxu1 %vm544_vm3, %v21189_v34 }
0x1200   :  { %19494 = vmatpush3.bf16.msra.mxu0 %v19493_v63  ;;  %19500 = vmatpush3.bf16.msra.mxu1 %v19499_v61  ;;  %v19544_v63 = vpack.c.bf16 %v8483_v59, %v8482_v58  ;;  %v19550_v61 = vpack.c.bf16 %v8487_v62, %v8486_v60 }
0x1201   :  { %19495 = vmatprep.subr.bf16.mxu0 %v19972_v32  ;;  %19501 = vmatprep.subr.bf16.mxu1 %v19972_v32 }
0x1202   :  { %18403 = vmatprep.mubr.msk.f32.mxu0 %vm19968_vm0, %v19967_v4  ;;  %18414 = vmatprep.mubr.msk.f32.mxu1 %vm19968_vm0, %v19967_v4 }
0x1204   :  { %19497 = vmatpush3.bf16.msra.mxu0 %v19496_v7  ;;  %19503 = vmatpush3.bf16.msra.mxu1 %v19502_v12  ;;  %v19553_v7 = vpack.c.bf16 %v8489_v16, %v8488_v6  ;;  %v19559_v12 = vpack.c.bf16 %v8493_v11, %v8492_v15 }
0x1205   :  { %19504 = vmatprep.subr.bf16.mxu0 %v19972_v32  ;;  %19510 = vmatprep.subr.bf16.mxu1 %v19972_v32 }
0x1207   :  { %18404 = vmatmul.mubr.msk.f32.vlgmr.msra.gmra.mrb[108].mxu0 %vm544_vm3, %v21189_v34  ;;  %18415 = vmatmul.mubr.msk.f32.vlgmr.msra.gmra.mrb[108].mxu1 %vm544_vm3, %v21189_v34 }
0x1208   :  { %19506 = vmatpush3.bf16.msra.mxu0 %v19505_v47  ;;  %19512 = vmatpush3.bf16.msra.mxu1 %v19511_v17  ;;  %v19556_v47 = vpack.c.bf16 %v8491_v20, %v8490_v24  ;;  %v19562_v17 = vpack.c.bf16 %v8495_v2, %v8494_v14 }
0x1209   :  { %19507 = vmatprep.subr.bf16.mxu0 %v19972_v32  ;;  %19513 = vmatprep.subr.bf16.mxu1 %v19972_v32 }
0x120a   :  { %18425 = vmatprep.mubr.msk.f32.mxu0 %vm19968_vm0, %v19967_v4  ;;  %18436 = vmatprep.mubr.msk.f32.mxu1 %vm19968_vm0, %v19967_v4 }
0x120c   :  { %19509 = vmatpush3.bf16.msra.mxu0 %v19508_v21  ;;  %19515 = vmatpush3.bf16.msra.mxu1 %v19514_v26  ;;  %v19565_v21 = vpack.c.bf16 %v8497_v19, %v8496_v18  ;;  %v19571_v26 = vpack.c.bf16 %v8501_v25, %v8500_v23 }
0x120d   :  { %19516 = vmatprep.subr.bf16.mxu0 %v19972_v32  ;;  %19522 = vmatprep.subr.bf16.mxu1 %v19972_v32 }
0x120f   :  { %18426 = vmatmul.mubr.msk.f32.vlgmr.msra.gmra.mrb[110].mxu0 %vm544_vm3, %v21189_v34  ;;  %18437 = vmatmul.mubr.msk.f32.vlgmr.msra.gmra.mrb[110].mxu1 %vm544_vm3, %v21189_v34 }
0x1210   :  { %19518 = vmatpush3.bf16.msra.mxu0 %v19517_v31  ;;  %19524 = vmatpush3.bf16.msra.mxu1 %v19523_v35  ;;  %v19568_v31 = vpack.c.bf16 %v8499_v13, %v8498_v27  ;;  %v19574_v35 = vpack.c.bf16 %v8503_v30, %v8502_v29 }
0x1211   :  { %19519 = vmatprep.subr.bf16.mxu0 %v19972_v32  ;;  %19525 = vmatprep.subr.bf16.mxu1 %v19972_v32 }
0x1212   :  { %18447 = vmatprep.mubr.msk.f32.mxu0 %vm19968_vm0, %v19967_v4  ;;  %18458 = vmatprep.mubr.msk.f32.mxu1 %vm19968_vm0, %v19967_v4 }
0x1214   :  { %19521 = vmatpush3.bf16.msra.mxu0 %v19520_v40  ;;  %19527 = vmatpush3.bf16.msra.mxu1 %v19526_v41  ;;  %v19577_v40 = vpack.c.bf16 %v8505_v51, %v8504_v36  ;;  %v19583_v41 = vpack.c.bf16 %v8509_v39, %v8508_v38  ;;  %v21454_v36 = vld [vmem:[%s21431_s19 + $0x8] sm:$0x7]  ;;  %v21457_v51 = vld [vmem:[%s21431_s19 + $0xc] sm:$0x7] }
0x1215   :  { %19528 = vmatprep.subr.bf16.mxu0 %v19972_v32  ;;  %19534 = vmatprep.subr.bf16.mxu1 %v19972_v32  ;;  %v9151_v38 = vrot.slane %v21454_v36, %v20038_v9  ;;  %v9155_v39 = vrot.slane %v21457_v51, %v20038_v9 }
0x1217   :  { %18448 = vmatmul.mubr.msk.f32.vlgmr.msra.gmra.mrb[112].mxu0 %vm544_vm3, %v21189_v34  ;;  %18459 = vmatmul.mubr.msk.f32.vlgmr.msra.gmra.mrb[112].mxu1 %vm544_vm3, %v21189_v34 }
0x1218   :  { %19530 = vmatpush3.bf16.msra.mxu0 %v19529_v5  ;;  %19536 = vmatpush3.bf16.msra.mxu1 %v19535_v45  ;;  %v19580_v5 = vpack.c.bf16 %v8507_v42, %v8506_v33  ;;  %v19586_v45 = vpack.c.bf16 %v8511_v57, %v8510_v43 }
0x1219   :  { %19531 = vmatprep.subr.bf16.mxu0 %v19972_v32  ;;  %19537 = vmatprep.subr.bf16.mxu1 %v19972_v32 }
0x121a   :  { %18469 = vmatprep.mubr.msk.f32.mxu0 %vm19968_vm0, %v19967_v4  ;;  %18480 = vmatprep.mubr.msk.f32.mxu1 %vm19968_vm0, %v19967_v4 }
0x121c   :  { %19533 = vmatpush3.bf16.msra.mxu0 %v19532_v50  ;;  %19539 = vmatpush3.bf16.msra.mxu1 %v19538_v53  ;;  %v19589_v50 = vpack.c.bf16 %v8513_v46, %v8512_v37  ;;  %v19595_v53 = vpack.c.bf16 %v8517_v49, %v8516_v48  ;;  %v21478_v48 = vld [vmem:[%s21431_s19 + $0x10] sm:$0x7]  ;;  %v21481_v49 = vld [vmem:[%s21431_s19 + $0x14] sm:$0x7] }
0x121d   :  { %19540 = vmatprep.subr.bf16.mxu0 %v19972_v32  ;;  %19546 = vmatprep.subr.bf16.mxu1 %v19972_v32 }
0x121f   :  { %18470 = vmatmul.mubr.msk.f32.vlgmr.msra.gmra.mrb[114].mxu0 %vm544_vm3, %v21189_v34  ;;  %18481 = vmatmul.mubr.msk.f32.vlgmr.msra.gmra.mrb[114].mxu1 %vm544_vm3, %v21189_v34 }
0x1220   :  { %19542 = vmatpush3.bf16.msra.mxu0 %v19541_v1  ;;  %19548 = vmatpush3.bf16.msra.mxu1 %v19547_v0  ;;  %v19592_v1 = vpack.c.bf16 %v8515_v56, %v8514_v54  ;;  %v19598_v0 = vpack.c.bf16 %v8519_v3, %v8518_v44  ;;  %v8564_v54 = vrot.slane %v21478_v48, %v20035_v8 }
0x1221   :  { %19543 = vmatprep.subr.bf16.mxu0 %v19972_v32  ;;  %19549 = vmatprep.subr.bf16.mxu1 %v19972_v32  ;;  %v8568_v56 = vrot.slane %v21481_v49, %v20035_v8 }
0x1222   :  { %18491 = vmatprep.mubr.msk.f32.mxu0 %vm19968_vm0, %v19967_v4  ;;  %18502 = vmatprep.mubr.msk.f32.mxu1 %vm19968_vm0, %v19967_v4 }
0x1224   :  { %19545 = vmatpush3.bf16.msra.mxu0 %v19544_v63  ;;  %19551 = vmatpush3.bf16.msra.mxu1 %v19550_v61 }
0x1225   :  { %19552 = vmatprep.subr.bf16.mxu0 %v19972_v32  ;;  %19558 = vmatprep.subr.bf16.mxu1 %v19972_v32 }
0x1227   :  { %18492 = vmatmul.mubr.msk.f32.vlgmr.msra.gmra.mrb[116].mxu0 %vm544_vm3, %v21189_v34  ;;  %18503 = vmatmul.mubr.msk.f32.vlgmr.msra.gmra.mrb[116].mxu1 %vm544_vm3, %v21189_v34 }
0x1228   :  { %19554 = vmatpush3.bf16.msra.mxu0 %v19553_v7  ;;  %19560 = vmatpush3.bf16.msra.mxu1 %v19559_v12 }
0x1229   :  { %19555 = vmatprep.subr.bf16.mxu0 %v19972_v32  ;;  %19561 = vmatprep.subr.bf16.mxu1 %v19972_v32 }
0x122a   :  { %18513 = vmatprep.mubr.msk.f32.mxu0 %vm19968_vm0, %v19967_v4  ;;  %18524 = vmatprep.mubr.msk.f32.mxu1 %vm19968_vm0, %v19967_v4 }
0x122c   :  { %19557 = vmatpush3.bf16.msra.mxu0 %v19556_v47  ;;  %19563 = vmatpush3.bf16.msra.mxu1 %v19562_v17  ;;  %v21438_v47 = vld [vmem:[%s21431_s19] sm:$0x7]  ;;  %v21441_v17 = vld [vmem:[%s21431_s19 + $0x4] sm:$0x7] }
0x122d   :  { %19564 = vmatprep.subr.bf16.mxu0 %v19972_v32  ;;  %19570 = vmatprep.subr.bf16.mxu1 %v19972_v32  ;;  %v9143_v18 = vrot.slane %v21438_v47, %v20038_v9  ;;  %v9147_v19 = vrot.slane %v21441_v17, %v20038_v9  ;;  %v8548_v23 = vrot.slane %v21438_v47, %v20035_v8 }
0x122e   :  { %v8552_v25 = vrot.slane %v21441_v17, %v20035_v8 }
0x122f   :  { %18514 = vmatmul.mubr.msk.f32.vlgmr.msra.gmra.mrb[118].mxu0 %vm544_vm3, %v21189_v34  ;;  %18525 = vmatmul.mubr.msk.f32.vlgmr.msra.gmra.mrb[118].mxu1 %vm544_vm3, %v21189_v34 }
0x1230   :  { %19566 = vmatpush3.bf16.msra.mxu0 %v19565_v21  ;;  %19572 = vmatpush3.bf16.msra.mxu1 %v19571_v26 }
0x1231   :  { %19567 = vmatprep.subr.bf16.mxu0 %v19972_v32  ;;  %19573 = vmatprep.subr.bf16.mxu1 %v19972_v32 }
0x1232   :  { %18535 = vmatprep.mubr.msk.f32.mxu0 %vm19968_vm0, %v19967_v4  ;;  %18546 = vmatprep.mubr.msk.f32.mxu1 %vm19968_vm0, %v19967_v4 }
0x1234   :  { %19569 = vmatpush3.bf16.msra.mxu0 %v19568_v31  ;;  %19575 = vmatpush3.bf16.msra.mxu1 %v19574_v35 }
0x1235   :  { %19576 = vmatprep.subr.bf16.mxu0 %v19972_v32  ;;  %19582 = vmatprep.subr.bf16.mxu1 %v19972_v32 }
0x1237   :  { %18536 = vmatmul.mubr.msk.f32.vlgmr.msra.gmra.mrb[120].mxu0 %vm544_vm3, %v21189_v34  ;;  %18547 = vmatmul.mubr.msk.f32.vlgmr.msra.gmra.mrb[120].mxu1 %vm544_vm3, %v21189_v34 }
0x1238   :  { %19578 = vmatpush3.bf16.msra.mxu0 %v19577_v40  ;;  %19584 = vmatpush3.bf16.msra.mxu1 %v19583_v41  ;;  %v8556_v40 = vrot.slane %v21454_v36, %v20035_v8  ;;  %v8560_v41 = vrot.slane %v21457_v51, %v20035_v8 }
0x1239   :  { %19579 = vmatprep.subr.bf16.mxu0 %v19972_v32  ;;  %19585 = vmatprep.subr.bf16.mxu1 %v19972_v32 }
0x123a   :  { %18557 = vmatprep.mubr.msk.f32.mxu0 %vm19968_vm0, %v19967_v4  ;;  %18568 = vmatprep.mubr.msk.f32.mxu1 %vm19968_vm0, %v19967_v4 }
0x123c   :  { %19581 = vmatpush3.bf16.msra.mxu0 %v19580_v5  ;;  %19587 = vmatpush3.bf16.msra.mxu1 %v19586_v45 }
0x123d   :  { %19588 = vmatprep.subr.bf16.mxu0 %v19972_v32  ;;  %19594 = vmatprep.subr.bf16.mxu1 %v19972_v32 }
0x123f   :  { %18558 = vmatmul.mubr.msk.f32.vlgmr.msra.gmra.mrb[122].mxu0 %vm544_vm3, %v21189_v34  ;;  %18569 = vmatmul.mubr.msk.f32.vlgmr.msra.gmra.mrb[122].mxu1 %vm544_vm3, %v21189_v34 }
0x1240   :  { %19590 = vmatpush3.bf16.msra.mxu0 %v19589_v50  ;;  %19596 = vmatpush3.bf16.msra.mxu1 %v19595_v53  ;;  %v9159_v50 = vrot.slane %v21478_v48, %v20038_v9  ;;  %v9163_v53 = vrot.slane %v21481_v49, %v20038_v9 }
0x1241   :  { %19591 = vmatprep.subr.bf16.mxu0 %v19972_v32  ;;  %19597 = vmatprep.subr.bf16.mxu1 %v19972_v32 }
0x1242   :  { %18579 = vmatprep.mubr.msk.f32.mxu0 %vm19968_vm0, %v19967_v4  ;;  %18590 = vmatprep.mubr.msk.f32.mxu1 %vm19968_vm0, %v19967_v4 }
0x1244   :  { %19593 = vmatpush3.bf16.msra.mxu0 %v19592_v1  ;;  %19599 = vmatpush3.bf16.msra.mxu1 %v19598_v0 }
0x1245   :  { %18593 = vmatprep.subr.mxu0 %v19967_v4  ;;  %18598 = vmatprep.subr.mxu1 %v19967_v4 }
0x1247   :  { %18580 = vmatmul.mubr.msk.f32.vlgmr.msra.gmra.mrb[124].mxu0 %vm544_vm3, %v21189_v34  ;;  %18591 = vmatmul.mubr.msk.f32.vlgmr.msra.gmra.mrb[124].mxu1 %vm544_vm3, %v21189_v34 }
0x1248   :  { %18595 = vmatprep.mubr.msk.f32.mxu0 %vm19968_vm0, %v19967_v4  ;;  %18600 = vmatprep.mubr.msk.f32.mxu1 %vm19968_vm0, %v19967_v4 }
0x12c2   :  { %v8646_v58 = vpop.f32.mrb[102].mxu0  ;;  %v8716_v59 = vpop.f32.mrb[102].mxu1 }
0x12c3   :  { %v18339_v60 = vpop.f32.mrb[103].mxu0  ;;  %v18350_v62 = vpop.f32.mrb[103].mxu1  ;;  %v8647_v31 = vadd.f32 %v8646_v58, %v8548_v23  ;;  %v8717_v35 = vadd.f32 %v8716_v59, %v8552_v25 }
0x12ca   :  { %v8786_v63 = vpop.f32.mrb[104].mxu0  ;;  %v8856_v61 = vpop.f32.mrb[104].mxu1 }
0x12cb   :  { %v18361_v6 = vpop.f32.mrb[105].mxu0  ;;  %v18372_v16 = vpop.f32.mrb[105].mxu1  ;;  %v8787_v37 = vadd.f32 %v8786_v63, %v8556_v40  ;;  %v8857_v46 = vadd.f32 %v8856_v61, %v8560_v41  ;;  %v8526_v63 = vld [vmem:[%s21431_s19 + $0x18] sm:$0x7]  ;;  %v8527_v61 = vld [vmem:[%s21431_s19 + $0x1c] sm:$0x7]  ;;  %v9751_v40 = vrot.slane %v21478_v48, %v20041_v10  ;;  %v9755_v41 = vrot.slane %v21481_v49, %v20041_v10  ;;  %s16519_s19 = sld [smem:[%s22257_s0 + %s20009_s16]]  }
0x12cc   :  { %v9167_v6 = vrot.slane %v8526_v63, %v20038_v9  ;;  %v9171_v16 = vrot.slane %v8527_v61, %v20038_v9 }
0x12d2   :  { %v21424_v15 = vpop.f32.mrb[106].mxu0  ;;  %v21426_v11 = vpop.f32.mrb[106].mxu1 }
0x12d3   :  { %v18383_v7 = vpop.f32.mrb[107].mxu0  ;;  %v18394_v12 = vpop.f32.mrb[107].mxu1  ;;  %v8927_v60 = vadd.f32 %v21424_v15, %v8564_v54  ;;  %v8997_v62 = vadd.f32 %v21426_v11, %v8568_v56  ;;  %v8572_v15 = vrot.slane %v8526_v63, %v20035_v8  ;;  %v8576_v11 = vrot.slane %v8527_v61, %v20035_v8 }
0x12da   :  { %v21433_v24 = vpop.f32.mrb[108].mxu0  ;;  %v21435_v20 = vpop.f32.mrb[108].mxu1 }
0x12db   :  { %v18405_v14 = vpop.f32.mrb[109].mxu0  ;;  %v18416_v2 = vpop.f32.mrb[109].mxu1  ;;  %v9067_v23 = vadd.f32 %v21433_v24, %v8572_v15  ;;  %v9137_v25 = vadd.f32 %v21435_v20, %v8576_v11 }
0x12e2   :  { %v9238_v21 = vpop.f32.mrb[110].mxu0  ;;  %v9308_v26 = vpop.f32.mrb[110].mxu1 }
0x12e3   :  { %v9239_v27 = vadd.f32 %v9238_v21, %v9143_v18  ;;  %v9309_v13 = vadd.f32 %v9308_v26, %v9147_v19  ;;  %v18427_v29 = vpop.f32.mrb[111].mxu0  ;;  %v18438_v30 = vpop.f32.mrb[111].mxu1  ;;  %v9735_v21 = vrot.slane %v21438_v47, %v20041_v10  ;;  %v9739_v26 = vrot.slane %v21441_v17, %v20041_v10 }
0x12e4   :  { %v9747_v47 = vrot.slane %v21457_v51, %v20041_v10 }
0x12e5   :  { %18594 = vmatpush3.xpose.msk.msra.mxu0 %vm2292_vm4, %v9239_v27  ;;  %18599 = vmatpush3.xpose.msk.msra.mxu1 %vm2292_vm4, %v9309_v13 }
0x12e6   :  { %18603 = vmatprep.subr.mxu0 %v19967_v4  ;;  %18608 = vmatprep.subr.mxu1 %v19967_v4 }
0x12e8   :  { %18596 = vmatmul.mubr.msk.f32.vlgmr.msra.gmra.mrb[126].mxu0 %vm2292_vm4, %v8647_v31  ;;  %18601 = vmatmul.mubr.msk.f32.vlgmr.msra.gmra.mrb[126].mxu1 %vm2292_vm4, %v8717_v35 }
0x12e9   :  { %18605 = vmatprep.mubr.msk.f32.mxu0 %vm19968_vm0, %v19967_v4  ;;  %18610 = vmatprep.mubr.msk.f32.mxu1 %vm19968_vm0, %v19967_v4 }
0x12ea   :  { %v9378_v33 = vpop.f32.mrb[112].mxu0  ;;  %v9448_v42 = vpop.f32.mrb[112].mxu1 }
0x12eb   :  { %v9379_v43 = vadd.f32 %v9378_v33, %v9151_v38  ;;  %v9449_v57 = vadd.f32 %v9448_v42, %v9155_v39  ;;  %v18449_v5 = vpop.f32.mrb[113].mxu0  ;;  %v18460_v45 = vpop.f32.mrb[113].mxu1 }
0x12ec   :  { %v9759_v45 = vrot.slane %v8526_v63, %v20041_v10 }
0x12ed   :  { %18604 = vmatpush3.xpose.msk.msra.mxu0 %vm2292_vm4, %v9379_v43  ;;  %18609 = vmatpush3.xpose.msk.msra.mxu1 %vm2292_vm4, %v9449_v57 }
0x12ee   :  { %18613 = vmatprep.subr.mxu0 %v19967_v4  ;;  %18618 = vmatprep.subr.mxu1 %v19967_v4 }
0x12f0   :  { %18606 = vmatmul.mubr.msk.f32.vlgmr.msra.gmra.mrb[128].mxu0 %vm2292_vm4, %v8787_v37  ;;  %18611 = vmatmul.mubr.msk.f32.vlgmr.msra.gmra.mrb[128].mxu1 %vm2292_vm4, %v8857_v46  ;;  %v9763_v37 = vrot.slane %v8527_v61, %v20041_v10 }
0x12f1   :  { %18615 = vmatprep.mubr.msk.f32.mxu0 %vm19968_vm0, %v19967_v4  ;;  %18620 = vmatprep.mubr.msk.f32.mxu1 %vm19968_vm0, %v19967_v4 }
0x12f2   :  { %v9518_v44 = vpop.f32.mrb[114].mxu0  ;;  %v9588_v3 = vpop.f32.mrb[114].mxu1 }
0x12f3   :  { %v9519_v1 = vadd.f32 %v9518_v44, %v9159_v50  ;;  %v9589_v0 = vadd.f32 %v9588_v3, %v9163_v53  ;;  %v18471_v58 = vpop.f32.mrb[115].mxu0  ;;  %v18482_v59 = vpop.f32.mrb[115].mxu1 }
0x12f5   :  { %18614 = vmatpush3.xpose.msk.msra.mxu0 %vm2292_vm4, %v9519_v1  ;;  %18619 = vmatpush3.xpose.msk.msra.mxu1 %vm2292_vm4, %v9589_v0 }
0x12f6   :  { %18623 = vmatprep.subr.mxu0 %v19967_v4  ;;  %18628 = vmatprep.subr.mxu1 %v19967_v4 }
0x12f8   :  { %18616 = vmatmul.mubr.msk.f32.vlgmr.msra.gmra.mrb[130].mxu0 %vm2292_vm4, %v8927_v60  ;;  %18621 = vmatmul.mubr.msk.f32.vlgmr.msra.gmra.mrb[130].mxu1 %vm2292_vm4, %v8997_v62 }
0x12f9   :  { %18625 = vmatprep.mubr.msk.f32.mxu0 %vm19968_vm0, %v19967_v4  ;;  %18630 = vmatprep.mubr.msk.f32.mxu1 %vm19968_vm0, %v19967_v4 }
0x12fa   :  { %v9658_v7 = vpop.f32.mrb[116].mxu0  ;;  %v9728_v12 = vpop.f32.mrb[116].mxu1 }
0x12fb   :  { %v9659_v14 = vadd.f32 %v9658_v7, %v9167_v6  ;;  %v9729_v2 = vadd.f32 %v9728_v12, %v9171_v16  ;;  %v18493_v18 = vpop.f32.mrb[117].mxu0  ;;  %v18504_v19 = vpop.f32.mrb[117].mxu1 }
0x12fd   :  { %18624 = vmatpush3.xpose.msk.msra.mxu0 %vm2292_vm4, %v9659_v14  ;;  %18629 = vmatpush3.xpose.msk.msra.mxu1 %vm2292_vm4, %v9729_v2 }
0x12fe   :  { %18633 = vmatprep.subr.mxu0 %v19967_v4  ;;  %18638 = vmatprep.subr.mxu1 %v19967_v4 }
0x1300   :  { %18626 = vmatmul.mubr.msk.f32.vlgmr.msra.gmra.mrb[132].mxu0 %vm2292_vm4, %v9067_v23  ;;  %18631 = vmatmul.mubr.msk.f32.vlgmr.msra.gmra.mrb[132].mxu1 %vm2292_vm4, %v9137_v25 }
0x1301   :  { %18635 = vmatprep.mubr.msk.f32.mxu0 %vm19968_vm0, %v19967_v4  ;;  %18640 = vmatprep.mubr.msk.f32.mxu1 %vm19968_vm0, %v19967_v4 }
0x1302   :  { %v9830_v24 = vpop.f32.mrb[118].mxu0  ;;  %v9900_v20 = vpop.f32.mrb[118].mxu1 }
0x1303   :  { %v9831_v27 = vadd.f32 %v9830_v24, %v9735_v21  ;;  %v9901_v13 = vadd.f32 %v9900_v20, %v9739_v26  ;;  %v18515_v29 = vpop.f32.mrb[119].mxu0  ;;  %v18526_v30 = vpop.f32.mrb[119].mxu1 }
0x1305   :  { %18634 = vmatpush3.msra.mxu0 %v9831_v27  ;;  %18639 = vmatpush3.msra.mxu1 %v9901_v13 }
0x1306   :  { %18643 = vmatprep.subr.mxu0 %v19967_v4  ;;  %18648 = vmatprep.subr.mxu1 %v19967_v4 }
0x130a   :  { %v21537_v17 = vpop.f32.mrb[120].mxu0  ;;  %v10040_v31 = vpop.f32.mrb[120].mxu1 }
0x130b   :  { %v21539_v35 = vadd.f32 %v10040_v31, %v9747_v47  ;;  %v18537_v38 = vpop.f32.mrb[121].mxu0  ;;  %v18548_v39 = vpop.f32.mrb[121].mxu1 }
0x1312   :  { %v10110_v33 = vpop.f32.mrb[122].mxu0  ;;  %v10180_v42 = vpop.f32.mrb[122].mxu1 }
0x1313   :  { %v21545_v43 = vadd.f32 %v10110_v33, %v9751_v40  ;;  %v21547_v57 = vadd.f32 %v10180_v42, %v9755_v41  ;;  %v18559_v51 = vpop.f32.mrb[123].mxu0  ;;  %v18570_v5 = vpop.f32.mrb[123].mxu1 }
0x131a   :  { %v10250_v46 = vpop.f32.mrb[124].mxu0  ;;  %v10320_v50 = vpop.f32.mrb[124].mxu1 }
0x131b   :  { %v21551_v53 = vadd.f32 %v10250_v46, %v9759_v45  ;;  %v21553_v48 = vadd.f32 %v10320_v50, %v9763_v37  ;;  %v18581_v54 = vpop.f32.mrb[125].mxu0  ;;  %v18592_v49 = vpop.f32.mrb[125].mxu1 }
0x13bb   :  { %v10396_v56 = vpop.f32.mrb[126].mxu0  ;;  %v10472_v44 = vpop.f32.mrb[126].mxu1 }
0x13bc   :  { %v18597_v3 = vpop.f32.mrb[127].mxu0  ;;  %v18602_v1 = vpop.f32.mrb[127].mxu1  ;;  %v10935_v0 = vsel %vm218_vm1, %v10472_v44, -inf  ;;  %v10932_v58 = vsel %vm218_vm1, %v10396_v56, -inf }
0x13bd   :  { %10936 = vmax.xlane.f32.xlu0 %v10935_v0  ;;  %10933 = vmax.xlane.f32.xlu1 %v10932_v58 }
0x13c3   :  { %v10548_v59 = vpop.f32.mrb[128].mxu0  ;;  %v10624_v60 = vpop.f32.mrb[128].mxu1 }
0x13c4   :  { %v18607_v62 = vpop.f32.mrb[129].mxu0  ;;  %v18612_v63 = vpop.f32.mrb[129].mxu1  ;;  %v10941_v61 = vsel %vm218_vm1, %v10624_v60, -inf  ;;  %v10938_v6 = vsel %vm218_vm1, %v10548_v59, -inf }
0x13c5   :  { %10942 = vmax.xlane.f32.xlu0 %v10941_v61  ;;  %10939 = vmax.xlane.f32.xlu1 %v10938_v6 }
0x13cb   :  { %v10700_v16 = vpop.f32.mrb[130].mxu0  ;;  %v10776_v15 = vpop.f32.mrb[130].mxu1 }
0x13cc   :  { %v18617_v11 = vpop.f32.mrb[131].mxu0  ;;  %v18622_v7 = vpop.f32.mrb[131].mxu1  ;;  %v10947_v12 = vsel %vm218_vm1, %v10776_v15, -inf  ;;  %v10944_v14 = vsel %vm218_vm1, %v10700_v16, -inf }
0x13cd   :  { %10948 = vmax.xlane.f32.xlu0 %v10947_v12  ;;  %10945 = vmax.xlane.f32.xlu1 %v10944_v14 }
0x13d3   :  { %v10852_v2 = vpop.f32.mrb[132].mxu0  ;;  %v10928_v18 = vpop.f32.mrb[132].mxu1 }
0x13d4   :  { %v18627_v19 = vpop.f32.mrb[133].mxu0  ;;  %v18632_v23 = vpop.f32.mrb[133].mxu1  ;;  %v10953_v25 = vsel %vm218_vm1, %v10928_v18, -inf  ;;  %v10950_v21 = vsel %vm218_vm1, %v10852_v2, -inf }
0x13d5   :  { %10954 = vmax.xlane.f32.xlu0 %v10953_v25  ;;  %10951 = vmax.xlane.f32.xlu1 %v10950_v21  ;;  %v9743_v23 = vrot.slane %v21454_v36, %v20041_v10 }
0x144a   :  { %v10937_v26 = vpop.xlane.xlu0 %10936  ;;  %v10934_v24 = vpop.xlane.xlu1 %10933 }
0x144b   :  { %v10957_v20 = vsub.f32 %v10472_v44, %v10937_v26  ;;  %v10956_v27 = vsub.f32 %v10396_v56, %v10934_v24 }
0x144d   :  { %v10966_v13 = vmul.f32 1.442695, %v10957_v20  ;;  %v10964_v29 = vmul.f32 1.442695, %v10956_v27  ;;  %v9971_v20 = vadd.f32 %v21537_v17, %v9743_v23 }
0x144f   :  { %19891 = vpow2.f32 %v10966_v13 }
0x1450   :  { %19893 = vpow2.f32 %v10964_v29 }
0x1452   :  { %v10943_v30 = vpop.xlane.xlu0 %10942  ;;  %v10940_v47 = vpop.xlane.xlu1 %10939 }
0x1453   :  { %v10959_v31 = vsub.f32 %v10624_v60, %v10943_v30  ;;  %v10958_v38 = vsub.f32 %v10548_v59, %v10940_v47 }
0x1455   :  { %v10970_v39 = vmul.f32 1.442695, %v10959_v31  ;;  %v10968_v40 = vmul.f32 1.442695, %v10958_v38 }
0x1457   :  { %19895 = vpow2.f32 %v10970_v39 }
0x1458   :  { %19897 = vpow2.f32 %v10968_v40 }
0x1459   :  { %v19892_v41 = vpop.eup %19891 }
0x145a   :  { %v19894_v33 = vpop.eup %19893  ;;  %v10949_v42 = vpop.xlane.xlu0 %10948  ;;  %v10983_v5 = vsel %vm218_vm1, %v19892_v41, 0.0 }
0x145b   :  { %v10946_v51 = vpop.xlane.xlu1 %10945  ;;  %v10961_v45 = vsub.f32 %v10776_v15, %v10949_v42  ;;  %10984 = vadd.xlane.f32.xlu0 %v10983_v5  ;;  %v10980_v46 = vsel %vm218_vm1, %v19894_v33, 0.0  ;;  %v8531_v42 = vld [vmem:[%s21612_s23 + $0xc] sm:$0xf]  ;;  %v8530_v5 = vld [vmem:[%s21612_s23 + $0x8] sm:$0xf] }
0x145c   :  { %v10960_v37 = vsub.f32 %v10700_v16, %v10946_v51  ;;  %10981 = vadd.xlane.f32.xlu1 %v10980_v46 }
0x145d   :  { %v10974_v50 = vmul.f32 1.442695, %v10961_v45 }
0x145e   :  { %v10972_v54 = vmul.f32 1.442695, %v10960_v37 }
0x145f   :  { %19899 = vpow2.f32 %v10974_v50  ;;  %v8533_v50 = vld [vmem:[%s21612_s23 + $0x14] sm:$0xf] }
0x1460   :  { %19901 = vpow2.f32 %v10972_v54 }
0x1461   :  { %v19896_v49 = vpop.eup %19895 }
0x1462   :  { %v19898_v56 = vpop.eup %19897  ;;  %v10955_v44 = vpop.xlane.xlu0 %10954  ;;  %v10989_v1 = vsel %vm218_vm1, %v19896_v49, 0.0 }
0x1463   :  { %v10952_v3 = vpop.xlane.xlu1 %10951  ;;  %v10963_v0 = vsub.f32 %v10928_v18, %v10955_v44  ;;  %10990 = vadd.xlane.f32.xlu0 %v10989_v1  ;;  %v10986_v59 = vsel %vm218_vm1, %v19898_v56, 0.0  ;;  %v8535_v1 = vld [vmem:[%s21612_s23 + $0x1c] sm:$0xf] }
0x1464   :  { %v10962_v58 = vsub.f32 %v10852_v2, %v10952_v3  ;;  %10987 = vadd.xlane.f32.xlu1 %v10986_v59 }
0x1465   :  { %v10978_v60 = vmul.f32 1.442695, %v10963_v0 }
0x1466   :  { %v10976_v62 = vmul.f32 1.442695, %v10962_v58  ;;  %v8534_v58 = vld [vmem:[%s21612_s23 + $0x18] sm:$0xf] }
0x1467   :  { %19903 = vpow2.f32 %v10978_v60 }
0x1468   :  { %19905 = vpow2.f32 %v10976_v62 }
0x1469   :  { %v19900_v63 = vpop.eup %19899 }
0x146a   :  { %v19902_v61 = vpop.eup %19901  ;;  %v10995_v6 = vsel %vm218_vm1, %v19900_v63, 0.0 }
0x146b   :  { %10996 = vadd.xlane.f32.xlu0 %v10995_v6  ;;  %v10992_v16 = vsel %vm218_vm1, %v19902_v61, 0.0 }
0x146c   :  { %10993 = vadd.xlane.f32.xlu1 %v10992_v16 }
0x1471   :  { %v19904_v15 = vpop.eup %19903 }
0x1472   :  { %v19906_v11 = vpop.eup %19905  ;;  %v11001_v7 = vsel %vm218_vm1, %v19904_v15, 0.0 }
0x1473   :  { %11002 = vadd.xlane.f32.xlu0 %v11001_v7  ;;  %v10998_v12 = vsel %vm218_vm1, %v19906_v11, 0.0 }
0x1474   :  { %10999 = vadd.xlane.f32.xlu1 %v10998_v12 }
0x14e8   :  { %v10985_v14 = vpop.xlane.xlu0 %10984 }
0x14e9   :  { %19907 = vrcp.f32 %v10985_v14  ;;  %v10982_v2 = vpop.xlane.xlu1 %10981 }
0x14ea   :  { %19909 = vrcp.f32 %v10982_v2 }
0x14f0   :  { %v10991_v18 = vpop.xlane.xlu0 %10990 }
0x14f1   :  { %19911 = vrcp.f32 %v10991_v18  ;;  %v10988_v19 = vpop.xlane.xlu1 %10987 }
0x14f2   :  { %19913 = vrcp.f32 %v10988_v19 }
0x14f3   :  { %v19908_v25 = vpop.eup %19907 }
0x14f4   :  { %v19910_v21 = vpop.eup %19909  ;;  %v11013_v26 = vmul.f32 %v19908_v25, %v19892_v41 }
0x14f5   :  { %v11012_v24 = vmul.f32 %v19910_v21, %v19894_v33 }
0x14f6   :  { %18641 = vmatmul.mubr.msk.f32.vlgmr.msra.gmra.mrb[134].mxu1 %vm218_vm1, %v11013_v26 }
0x14f7   :  { %18636 = vmatmul.mubr.msk.f32.vlgmr.msra.gmra.mrb[134].mxu0 %vm218_vm1, %v11012_v24  ;;  %18649 = vmatpush3.msra.mxu1 %v21539_v35 }
0x14f8   :  { %18644 = vmatpush3.msra.mxu0 %v9971_v20  ;;  %v10997_v27 = vpop.xlane.xlu0 %10996  ;;  %18645 = vmatprep.mubr.msk.f32.mxu0 %vm19968_vm0, %v19967_v4 }
0x14f9   :  { %19915 = vrcp.f32 %v10997_v27  ;;  %v10994_v36 = vpop.xlane.xlu1 %10993  ;;  %18650 = vmatprep.mubr.msk.f32.mxu1 %vm19968_vm0, %v19967_v4  ;;  %18653 = vmatprep.subr.mxu0 %v19967_v4 }
0x14fa   :  { %19917 = vrcp.f32 %v10994_v36  ;;  %18658 = vmatprep.subr.mxu1 %v19967_v4 }
0x14fb   :  { %v19912_v17 = vpop.eup %19911 }
0x14fc   :  { %v19914_v13 = vpop.eup %19913  ;;  %v11015_v29 = vmul.f32 %v19912_v17, %v19896_v49  ;;  %v8532_v49 = vld [vmem:[%s21612_s23 + $0x10] sm:$0xf] }
0x14fd   :  { %v11014_v30 = vmul.f32 %v19914_v13, %v19898_v56 }
0x14fe   :  { %18651 = vmatmul.mubr.msk.f32.vlgmr.msra.gmra.mrb[136].mxu1 %vm218_vm1, %v11015_v29 }
0x14ff   :  { %18646 = vmatmul.mubr.msk.f32.vlgmr.msra.gmra.mrb[136].mxu0 %vm218_vm1, %v11014_v30  ;;  %18659 = vmatpush3.msra.mxu1 %v21547_v57 }
0x1500   :  { %18654 = vmatpush3.msra.mxu0 %v21545_v43  ;;  %v11003_v35 = vpop.xlane.xlu0 %11002  ;;  %18655 = vmatprep.mubr.msk.f32.mxu0 %vm19968_vm0, %v19967_v4 }
0x1501   :  { %19919 = vrcp.f32 %v11003_v35  ;;  %v11000_v47 = vpop.xlane.xlu1 %10999  ;;  %18660 = vmatprep.mubr.msk.f32.mxu1 %vm19968_vm0, %v19967_v4  ;;  %18663 = vmatprep.subr.mxu0 %v19967_v4 }
0x1502   :  { %19921 = vrcp.f32 %v11000_v47  ;;  %18668 = vmatprep.subr.mxu1 %v19967_v4 }
0x1503   :  { %v19916_v31 = vpop.eup %19915 }
0x1504   :  { %v19918_v38 = vpop.eup %19917  ;;  %v11017_v39 = vmul.f32 %v19916_v31, %v19900_v63 }
0x1505   :  { %v11016_v57 = vmul.f32 %v19918_v38, %v19902_v61  ;;  %v21671_v38 = vld [vmem:[%s16508_s27] sm:$0x7f] }
0x1506   :  { %18661 = vmatmul.mubr.msk.f32.vlgmr.msra.gmra.mrb[138].mxu1 %vm218_vm1, %v11017_v39 }
0x1507   :  { %18656 = vmatmul.mubr.msk.f32.vlgmr.msra.gmra.mrb[138].mxu0 %vm218_vm1, %v11016_v57  ;;  %18669 = vmatpush3.msra.mxu1 %v21553_v48  ;;  %v8529_v48 = vld [vmem:[%s21612_s23 + $0x4] sm:$0xf] }
0x1508   :  { %18664 = vmatpush3.msra.mxu0 %v21551_v53  ;;  %18665 = vmatprep.mubr.msk.f32.mxu0 %vm19968_vm0, %v19967_v4  ;;  %v8528_v53 = vld [vmem:[%s21612_s23] sm:$0xf] }
0x1509   :  { %18670 = vmatprep.mubr.msk.f32.mxu1 %vm19968_vm0, %v19967_v4  ;;  %18673 = vmatprep.subr.mxu0 %v19967_v4 }
0x150a   :  { %18678 = vmatprep.subr.mxu1 %v19967_v4 }
0x150b   :  { %v19920_v43 = vpop.eup %19919 }
0x150c   :  { %v19922_v40 = vpop.eup %19921  ;;  %v11019_v41 = vmul.f32 %v19920_v43, %v19904_v15 }
0x150d   :  { %v11018_v33 = vmul.f32 %v19922_v40, %v19906_v11 }
0x150e   :  { %18671 = vmatmul.mubr.msk.f32.vlgmr.msra.gmra.mrb[140].mxu1 %vm218_vm1, %v11019_v41 }
0x150f   :  { %18666 = vmatmul.mubr.msk.f32.vlgmr.msra.gmra.mrb[140].mxu0 %vm218_vm1, %v11018_v33  ;;  %18680 = vmatprep.mubr.msk.f32.mxu1 %vm19968_vm0, %v19967_v4 }
0x1510   :  { %18675 = vmatprep.mubr.msk.f32.mxu0 %vm19968_vm0, %v19967_v4  ;;  %18674 = vmatpush3.msk.msra.mxu0 %vm3576_vm5, %v8528_v53  ;;  %v12230_v53 = vrot.slane %v21671_v38, %v20035_v8 }
0x1511   :  { %18679 = vmatpush3.msk.msra.mxu1 %vm3576_vm5, %v8529_v48  ;;  %18683 = vmatprep.subr.mxu0 %v19967_v4 }
0x1512   :  { %18688 = vmatprep.subr.mxu1 %v19967_v4 }
0x15c9   :  { %v11162_v51 = vpop.f32.mrb[134].mxu1 }
0x15ca   :  { %v11089_v45 = vpop.f32.mrb[134].mxu0  ;;  %v18642_v37 = vpop.f32.mrb[135].mxu1  ;;  %18681 = vmatmul.mubr.msk.f32.vlgmr.msra.gmra.mrb[142].mxu1 %vm2292_vm4, %v11162_v51 }
0x15cb   :  { %v18637_v46 = vpop.f32.mrb[135].mxu0  ;;  %18676 = vmatmul.mubr.msk.f32.vlgmr.msra.gmra.mrb[142].mxu0 %vm2292_vm4, %v11089_v45  ;;  %18689 = vmatpush3.msk.msra.mxu1 %vm3576_vm5, %v8531_v42 }
0x15cc   :  { %18684 = vmatpush3.msk.msra.mxu0 %vm3576_vm5, %v8530_v5  ;;  %18685 = vmatprep.mubr.msk.f32.mxu0 %vm19968_vm0, %v19967_v4 }
0x15cd   :  { %18690 = vmatprep.mubr.msk.f32.mxu1 %vm19968_vm0, %v19967_v4  ;;  %18693 = vmatprep.subr.mxu0 %v19967_v4 }
0x15ce   :  { %18698 = vmatprep.subr.mxu1 %v19967_v4 }
0x15d1   :  { %v11308_v54 = vpop.f32.mrb[136].mxu1 }
0x15d2   :  { %v11235_v56 = vpop.f32.mrb[136].mxu0  ;;  %v18652_v44 = vpop.f32.mrb[137].mxu1  ;;  %18691 = vmatmul.mubr.msk.f32.vlgmr.msra.gmra.mrb[144].mxu1 %vm2292_vm4, %v11308_v54  ;;  %v8537_v54 = vld [vmem:[%s16506_s1 + $0x8] sm:$0xff] }
0x15d3   :  { %v18647_v3 = vpop.f32.mrb[137].mxu0  ;;  %18686 = vmatmul.mubr.msk.f32.vlgmr.msra.gmra.mrb[144].mxu0 %vm2292_vm4, %v11235_v56  ;;  %18699 = vmatpush3.msk.msra.mxu1 %vm3576_vm5, %v8533_v50  ;;  %v8536_v50 = vld [vmem:[%s16506_s1] sm:$0xff]  ;;  %v8538_v56 = vld [vmem:[%s16506_s1 + $0x10] sm:$0xff]  ;;  %v8539_v44 = vld [vmem:[%s16506_s1 + $0x18] sm:$0xff] }
0x15d4   :  { %18694 = vmatpush3.msk.msra.mxu0 %vm3576_vm5, %v8532_v49  ;;  %18695 = vmatprep.mubr.msk.f32.mxu0 %vm19968_vm0, %v19967_v4  ;;  %v19601_v49 = vpack.c.bf16 %v8537_v54, %v8536_v50  ;;  %v8540_v3 = vld [vmem:[%s16507_s5] sm:$0xff] }
0x15d5   :  { %18700 = vmatprep.mubr.msk.f32.mxu1 %vm19968_vm0, %v19967_v4  ;;  %18703 = vmatprep.subr.mxu0 %v19967_v4 }
0x15d6   :  { %18708 = vmatprep.subr.mxu1 %v19967_v4 }
0x15d9   :  { %v11454_v0 = vpop.f32.mrb[138].mxu1 }
0x15da   :  { %v11381_v59 = vpop.f32.mrb[138].mxu0  ;;  %v18662_v60 = vpop.f32.mrb[139].mxu1  ;;  %18701 = vmatmul.mubr.msk.f32.vlgmr.msra.gmra.mrb[146].mxu1 %vm2292_vm4, %v11454_v0 }
0x15db   :  { %v18657_v62 = vpop.f32.mrb[139].mxu0  ;;  %18696 = vmatmul.mubr.msk.f32.vlgmr.msra.gmra.mrb[146].mxu0 %vm2292_vm4, %v11381_v59  ;;  %18709 = vmatpush3.msk.msra.mxu1 %vm3576_vm5, %v8535_v1  ;;  %v8541_v1 = vld [vmem:[%s16507_s5 + $0x8] sm:$0xff] }
0x15dc   :  { %18704 = vmatpush3.msk.msra.mxu0 %vm3576_vm5, %v8534_v58  ;;  %18705 = vmatprep.mubr.msk.f32.mxu0 %vm19968_vm0, %v19967_v4  ;;  %v19607_v0 = vpack.c.bf16 %v8541_v1, %v8540_v3  ;;  %v12447_v1 = vld [vmem:[%s21709_s9 + $0x40] sm:$0xff] }
0x15dd   :  { %18710 = vmatprep.mubr.msk.f32.mxu1 %vm19968_vm0, %v19967_v4  ;;  %19600 = vmatprep.subr.bf16.mxu0 %v19972_v32 }
0x15de   :  { %19606 = vmatprep.subr.bf16.mxu1 %v19972_v32 }
0x15e1   :  { %v11600_v63 = vpop.f32.mrb[140].mxu1 }
0x15e2   :  { %v11527_v61 = vpop.f32.mrb[140].mxu0  ;;  %v18672_v6 = vpop.f32.mrb[141].mxu1  ;;  %18711 = vmatmul.mubr.msk.f32.vlgmr.msra.gmra.mrb[148].mxu1 %vm2292_vm4, %v11600_v63 }
0x15e3   :  { %v18667_v16 = vpop.f32.mrb[141].mxu0  ;;  %18706 = vmatmul.mubr.msk.f32.vlgmr.msra.gmra.mrb[148].mxu0 %vm2292_vm4, %v11527_v61  ;;  %18732 = vmatprep.mubr.msk.f32.mxu1 %vm19968_vm0, %v19967_v4 }
0x15e4   :  { %18721 = vmatprep.mubr.msk.f32.mxu0 %vm19968_vm0, %v19967_v4  ;;  %19602 = vmatpush3.bf16.msra.mxu0 %v19601_v49 }
0x15e5   :  { %19603 = vmatprep.subr.bf16.mxu0 %v19972_v32  ;;  %19608 = vmatpush3.bf16.msra.mxu1 %v19607_v0  ;;  %v12437_v0 = vrot.slane %v21671_v38, %v20635_v52 }
0x15e6   :  { %19609 = vmatprep.subr.bf16.mxu1 %v19972_v32 }
0x169d   :  { %v11752_v15 = vpop.f32.mrb[142].mxu1 }
0x169e   :  { %v11676_v11 = vpop.f32.mrb[142].mxu0  ;;  %v12213_v7 = vsel %vm544_vm3, %v11752_v15, 0.0  ;;  %v18682_v12 = vpop.f32.mrb[143].mxu1  ;;  %v12251_v15 = vrot.slane %v21671_v38, %v20038_v9 }
0x169f   :  { %v12212_v14 = vsel %vm544_vm3, %v11676_v11, 0.0  ;;  %v18677_v2 = vpop.f32.mrb[143].mxu0  ;;  %v12256_v12 = vrot.slane %v21671_v38, %v20041_v10 }
0x16a0   :  { %v12214_v18 = vadd.f32 %v12213_v7, %v12212_v14 }
0x16a5   :  { %v11904_v19 = vpop.f32.mrb[144].mxu1 }
0x16a6   :  { %v11828_v23 = vpop.f32.mrb[144].mxu0  ;;  %v18692_v25 = vpop.f32.mrb[145].mxu1  ;;  %v12217_v20 = vsel %vm544_vm3, %v11904_v19, 0.0  ;;  %v8543_v19 = vld [vmem:[%s16507_s5 + $0x18] sm:$0xff] }
0x16a7   :  { %v12215_v21 = vsel %vm544_vm3, %v11828_v23, 0.0  ;;  %v18687_v26 = vpop.f32.mrb[145].mxu0  ;;  %v12261_v25 = vrot.slane %v21671_v38, %v20600_v22 }
0x16a8   :  { %v12216_v24 = vadd.f32 %v12215_v21, %v12214_v18  ;;  %v8542_v18 = vld [vmem:[%s16507_s5 + $0x10] sm:$0xff] }
0x16a9   :  { %v19610_v23 = vpack.c.bf16 %v8543_v19, %v8542_v18  ;;  %v12456_v18 = vld [vmem:[%s21709_s9 + $0x88] sm:$0xff]  ;;  %v12459_v19 = vld [vmem:[%s21709_s9 + $0xa0] sm:$0xff] }
0x16aa   :  { %v12218_v27 = vadd.f32 %v12217_v20, %v12216_v24 }
0x16ab   :  { %19611 = vmatpush3.bf16.msra.mxu1 %v19610_v23  ;;  %v12460_v23 = vld [vmem:[%s21709_s9 + $0xa8] sm:$0xff] }
0x16ac   :  { %19618 = vmatprep.subr.bf16.mxu1 %v19972_v32 }
0x16ad   :  { %v12056_v36 = vpop.f32.mrb[146].mxu1 }
0x16ae   :  { %v11980_v17 = vpop.f32.mrb[146].mxu0  ;;  %v18702_v13 = vpop.f32.mrb[147].mxu1  ;;  %v12221_v47 = vsel %vm544_vm3, %v12056_v36, 0.0 }
0x16af   :  { %v12219_v29 = vsel %vm544_vm3, %v11980_v17, 0.0  ;;  %v18697_v30 = vpop.f32.mrb[147].mxu0 }
0x16b0   :  { %v12220_v35 = vadd.f32 %v12219_v29, %v12218_v27  ;;  %v12339_v27 = vrot.slane %v21671_v38, %v20608_v28 }
0x16b2   :  { %v12222_v31 = vadd.f32 %v12221_v47, %v12220_v35 }
0x16b5   :  { %v12208_v39 = vpop.f32.mrb[148].mxu1 }
0x16b6   :  { %v12132_v57 = vpop.f32.mrb[148].mxu0  ;;  %v18712_v43 = vpop.f32.mrb[149].mxu1  ;;  %v12225_v48 = vsel %vm544_vm3, %v12208_v39, 0.0  ;;  %v12440_v39 = vld [vmem:[%s21709_s9 + $0x8] sm:$0xff] }
0x16b7   :  { %v12223_v40 = vsel %vm544_vm3, %v12132_v57, 0.0  ;;  %v18707_v41 = vpop.f32.mrb[149].mxu0  ;;  %v12443_v57 = vld [vmem:[%s21709_s9 + $0x20] sm:$0xff] }
0x16b8   :  { %v12224_v33 = vadd.f32 %v12223_v40, %v12222_v31  ;;  %v12439_v31 = vld [vmem:[%s21709_s9] sm:$0xff]  ;;  %v12444_v40 = vld [vmem:[%s21709_s9 + $0x28] sm:$0xff] }
0x16b9   :  { %v19613_v43 = vpack.c.bf16 %v12440_v39, %v12439_v31  ;;  %v19619_v41 = vpack.c.bf16 %v12444_v40, %v12443_v57  ;;  %v12465_v39 = vld [vmem:[%s21709_s9 + $0xd0] sm:$0xff]  ;;  %v12466_v57 = vld [vmem:[%s21709_s9 + $0xd8] sm:$0xff] }
0x16ba   :  { %v12226_v42 = vadd.f32 %v12225_v48, %v12224_v33  ;;  %v12441_v33 = vld [vmem:[%s21709_s9 + $0x10] sm:$0xff]  ;;  %v12470_v40 = vld [vmem:[%s21709_s9 + $0xf8] sm:$0xff] }
0x16bb   :  { %v12445_v48 = vld [vmem:[%s21709_s9 + $0x30] sm:$0xff] }
0x16bc   :  { %v12231_v51 = vadd.f32 %v12230_v53, %v12226_v42  ;;  %v12442_v53 = vld [vmem:[%s21709_s9 + $0x18] sm:$0xff] }
0x16bd   :  { %v19616_v42 = vpack.c.bf16 %v12442_v53, %v12441_v33  ;;  %v12471_v53 = vld [vmem:[%s21765_s13] sm:$0xff] }
0x16be   :  { %v12232_v5 = vadd.f32 %v12231_v51, %v21189_v34  ;;  %v19604_v34 = vpack.c.bf16 %v8539_v44, %v8538_v56  ;;  %v12446_v51 = vld [vmem:[%s21709_s9 + $0x38] sm:$0xff] }
0x16c0   :  { %v12233_v45 = vsel %vm544_vm3, %v12232_v5, 0.0  ;;  %v12236_v37 = vmul.f32 %v12232_v5, %v12232_v5  ;;  %19605 = vmatpush3.bf16.msra.mxu0 %v19604_v34  ;;  %v12432_v34 = vrot.slane %v21671_v38, %v20632_v55 }
0x16c1   :  { %12234 = vadd.xlane.f32.xlu1 %v12233_v45  ;;  %19612 = vmatprep.subr.bf16.mxu0 %v19972_v32 }
0x16c2   :  { %v12237_v46 = vsel %vm544_vm3, %v12236_v37, 0.0 }
0x16c3   :  { %12238 = vadd.xlane.f32.xlu0 %v12237_v46 }
0x174e   :  { %v12235_v58 = vpop.xlane.xlu1 %12234 }
0x174f   :  { %v12240_v59 = vmul.f32 0.03125, %v12235_v58 }
0x1750   :  { %v12239_v60 = vpop.xlane.xlu0 %12238 }
0x1751   :  { %v12242_v62 = vmul.f32 %v12240_v59, %v12240_v59  ;;  %v12241_v63 = vmul.f32 0.03125, %v12239_v60  ;;  %v12244_v16 = vsub.f32 %v12232_v5, %v12240_v59  ;;  %v19622_v5 = vpack.c.bf16 %v12446_v51, %v12445_v48  ;;  %v12448_v59 = vld [vmem:[%s21709_s9 + $0x48] sm:$0xff]  ;;  %v12451_v60 = vld [vmem:[%s21709_s9 + $0x60] sm:$0xff] }
0x1752   :  { %v12472_v48 = vld [vmem:[%s21765_s13 + $0x8] sm:$0xff] }
0x1753   :  { %v12243_v61 = vsub.f32 %v12241_v63, %v12242_v62  ;;  %v12452_v62 = vld [vmem:[%s21709_s9 + $0x68] sm:$0xff] }
0x1754   :  { %v12476_v51 = vld [vmem:[%s21765_s13 + $0x28] sm:$0xff] }
0x1755   :  { %v12245_v6 = vadd.f32 1e-05, %v12243_v61  ;;  %v19625_v61 = vpack.c.bf16 %v12448_v59, %v12447_v1  ;;  %v12484_v1 = vld [vmem:[%s21765_s13 + $0x68] sm:$0xff]  ;;  %v12481_v59 = vld [vmem:[%s21765_s13 + $0x50] sm:$0xff] }
0x1757   :  { %19923 = vrsqrt.f32 %v12245_v6  ;;  %v19631_v6 = vpack.c.bf16 %v12452_v62, %v12451_v60  ;;  %v12482_v60 = vld [vmem:[%s21765_s13 + $0x58] sm:$0xff]  ;;  %v12485_v62 = vld [vmem:[%s21765_s13 + $0x70] sm:$0xff] }
0x1761   :  { %v19924_v11 = vpop.eup %19923 }
0x1762   :  { %v12247_v7 = vmul.f32 %v19924_v11, %v12244_v16  ;;  %v12449_v16 = vld [vmem:[%s21709_s9 + $0x50] sm:$0xff]  ;;  %v12450_v11 = vld [vmem:[%s21709_s9 + $0x58] sm:$0xff] }
0x1763   :  { %v19628_v38 = vpack.c.bf16 %v12450_v11, %v12449_v16  ;;  %v12487_v16 = vld [vmem:[%s21765_s13 + $0x80] sm:$0xff]  ;;  %v12488_v11 = vld [vmem:[%s21765_s13 + $0x88] sm:$0xff] }
0x1764   :  { %v12252_v14 = vmul.f32 %v12251_v15, %v12247_v7  ;;  %v12453_v7 = vld [vmem:[%s21709_s9 + $0x70] sm:$0xff] }
0x1766   :  { %v12257_v2 = vadd.f32 %v12256_v12, %v12252_v14  ;;  %v12454_v12 = vld [vmem:[%s21709_s9 + $0x78] sm:$0xff] }
0x1767   :  { %v19634_v14 = vpack.c.bf16 %v12454_v12, %v12453_v7  ;;  %v12491_v7 = vld [vmem:[%s21765_s13 + $0xa0] sm:$0xff]  ;;  %v12492_v12 = vld [vmem:[%s21765_s13 + $0xa8] sm:$0xff] }
0x1768   :  { %18722 = vmatmul.mubr.msk.f32.vlgmr.msra.gmra.mrb[150].mxu0 %vm544_vm3, %v12257_v2 }
0x1769   :  { %18743 = vmatprep.mubr.msk.f32.mxu0 %vm19968_vm0, %v19967_v4  ;;  %19614 = vmatpush3.bf16.msra.mxu0 %v19613_v43  ;;  %v12469_v43 = vld [vmem:[%s21709_s9 + $0xf0] sm:$0xff] }
0x176a   :  { %19615 = vmatprep.subr.bf16.mxu0 %v19972_v32  ;;  %v19658_v33 = vpack.c.bf16 %v12470_v40, %v12469_v43  ;;  %v12507_v43 = vld [vmem:[%s21850_s17 + $0x20] sm:$0xff]  ;;  %v12508_v40 = vld [vmem:[%s21850_s17 + $0x28] sm:$0xff] }
0x176d   :  { %19617 = vmatpush3.bf16.msra.mxu0 %v19616_v42  ;;  %v12475_v42 = vld [vmem:[%s21765_s13 + $0x20] sm:$0xff] }
0x176e   :  { %19624 = vmatprep.subr.bf16.mxu0 %v19972_v32 }
0x183b   :  { %v12331_v21 = vpop.f32.mrb[150].mxu0 }
0x183c   :  { %v12332_v26 = vadd.f32 %v12331_v21, %v12261_v25  ;;  %v18723_v24 = vpop.f32.mrb[151].mxu0  ;;  %v19643_v21 = vpack.c.bf16 %v12460_v23, %v12459_v19  ;;  %v12493_v19 = vld [vmem:[%s21765_s13 + $0xb0] sm:$0xff]  ;;  %v12494_v23 = vld [vmem:[%s21765_s13 + $0xb8] sm:$0xff] }
0x183d   :  { %v12458_v24 = vld [vmem:[%s21709_s9 + $0x98] sm:$0xff] }
0x183e   :  { %v12335_v20 = vmax.f32 %v12332_v26, 0.0  ;;  %v12457_v26 = vld [vmem:[%s21709_s9 + $0x90] sm:$0xff] }
0x1840   :  { %18733 = vmatmul.mubr.msk.f32.vlgmr.msra.gmra.mrb[150].mxu1 %vm544_vm3, %v12335_v20  ;;  %v12461_v20 = vld [vmem:[%s21709_s9 + $0xb0] sm:$0xff] }
0x1841   :  { %18754 = vmatprep.mubr.msk.f32.mxu1 %vm19968_vm0, %v19967_v4  ;;  %19620 = vmatpush3.bf16.msra.mxu1 %v19619_v41  ;;  %v19652_v41 = vpack.c.bf16 %v12466_v57, %v12465_v39  ;;  %v12503_v39 = vld [vmem:[%s21850_s17] sm:$0xff]  ;;  %v12504_v57 = vld [vmem:[%s21850_s17 + $0x8] sm:$0xff] }
0x1842   :  { %19621 = vmatprep.subr.bf16.mxu1 %v19972_v32 }
0x1845   :  { %19623 = vmatpush3.bf16.msra.mxu1 %v19622_v5  ;;  %v19661_v5 = vpack.c.bf16 %v12472_v48, %v12471_v53  ;;  %v12505_v53 = vld [vmem:[%s21850_s17 + $0x10] sm:$0xff]  ;;  %v12506_v48 = vld [vmem:[%s21850_s17 + $0x18] sm:$0xff] }
0x1846   :  { %19630 = vmatprep.subr.bf16.mxu1 %v19972_v32 }
0x1913   :  { %v12409_v36 = vpop.f32.mrb[150].mxu1 }
0x1914   :  { %v12410_v17 = vadd.f32 %v12409_v36, %v12339_v27  ;;  %v18734_v13 = vpop.f32.mrb[151].mxu1  ;;  %v12462_v27 = vld [vmem:[%s21709_s9 + $0xb8] sm:$0xff]  ;;  %v19640_v36 = vpack.c.bf16 %v12458_v24, %v12457_v26  ;;  %v12495_v26 = vld [vmem:[%s21765_s13 + $0xc0] sm:$0xff]  ;;  %v12496_v24 = vld [vmem:[%s21765_s13 + $0xc8] sm:$0xff] }
0x1915   :  { %v12463_v13 = vld [vmem:[%s21709_s9 + $0xc0] sm:$0xff] }
0x1916   :  { %v12413_v29 = vadd.f32 %v12410_v17, %v12257_v2  ;;  %v12455_v2 = vld [vmem:[%s21709_s9 + $0x80] sm:$0xff]  ;;  %v19646_v17 = vpack.c.bf16 %v12462_v27, %v12461_v20  ;;  %v12500_v27 = vld [vmem:[%s21765_s13 + $0xe8] sm:$0xff] }
0x1917   :  { %v19637_v25 = vpack.c.bf16 %v12456_v18, %v12455_v2  ;;  %v12489_v2 = vld [vmem:[%s21765_s13 + $0x90] sm:$0xff]  ;;  %v12490_v18 = vld [vmem:[%s21765_s13 + $0x98] sm:$0xff]  ;;  %v12499_v20 = vld [vmem:[%s21765_s13 + $0xe0] sm:$0xff] }
0x1918   :  { %v12414_v30 = vsel %vm544_vm3, %v12413_v29, 0.0  ;;  %v12417_v35 = vmul.f32 %v12413_v29, %v12413_v29 }
0x1919   :  { %12415 = vadd.xlane.f32.xlu1 %v12414_v30  ;;  %v12467_v30 = vld [vmem:[%s21709_s9 + $0xe0] sm:$0xff] }
0x191a   :  { %v12418_v47 = vsel %vm544_vm3, %v12417_v35, 0.0  ;;  %v12468_v35 = vld [vmem:[%s21709_s9 + $0xe8] sm:$0xff] }
0x191b   :  { %12419 = vadd.xlane.f32.xlu0 %v12418_v47  ;;  %v19655_v31 = vpack.c.bf16 %v12468_v35, %v12467_v30  ;;  %v12501_v30 = vld [vmem:[%s21765_s13 + $0xf0] sm:$0xff]  ;;  %v12502_v35 = vld [vmem:[%s21765_s13 + $0xf8] sm:$0xff] }
0x19a6   :  { %v12416_v45 = vpop.xlane.xlu1 %12415 }
0x19a7   :  { %v12421_v37 = vmul.f32 0.03125, %v12416_v45  ;;  %v19667_v45 = vpack.c.bf16 %v12476_v51, %v12475_v42  ;;  %v12509_v42 = vld [vmem:[%s21850_s17 + $0x30] sm:$0xff]  ;;  %v12510_v51 = vld [vmem:[%s21850_s17 + $0x38] sm:$0xff] }
0x19a8   :  { %v12420_v46 = vpop.xlane.xlu0 %12419 }
0x19a9   :  { %v12423_v50 = vmul.f32 %v12421_v37, %v12421_v37  ;;  %v12422_v54 = vmul.f32 0.03125, %v12420_v46  ;;  %v12425_v44 = vsub.f32 %v12413_v29, %v12421_v37  ;;  %v12464_v29 = vld [vmem:[%s21709_s9 + $0xc8] sm:$0xff]  ;;  %v12473_v37 = vld [vmem:[%s21765_s13 + $0x10] sm:$0xff]  ;;  %v12474_v46 = vld [vmem:[%s21765_s13 + $0x18] sm:$0xff] }
0x19aa   :  { %v19649_v47 = vpack.c.bf16 %v12464_v29, %v12463_v13  ;;  %v12497_v13 = vld [vmem:[%s21765_s13 + $0xd0] sm:$0xff]  ;;  %v12498_v29 = vld [vmem:[%s21765_s13 + $0xd8] sm:$0xff] }
0x19ab   :  { %v12424_v49 = vsub.f32 %v12422_v54, %v12423_v50  ;;  %v12477_v50 = vld [vmem:[%s21765_s13 + $0x30] sm:$0xff]  ;;  %v12478_v54 = vld [vmem:[%s21765_s13 + $0x38] sm:$0xff] }
0x19ad   :  { %v12426_v56 = vadd.f32 1e-05, %v12424_v49  ;;  %v19664_v49 = vpack.c.bf16 %v12474_v46, %v12473_v37  ;;  %v12511_v37 = vld [vmem:[%s21850_s17 + $0x40] sm:$0xff]  ;;  %v12512_v46 = vld [vmem:[%s21850_s17 + $0x48] sm:$0xff] }
0x19af   :  { %19925 = vrsqrt.f32 %v12426_v56  ;;  %v19670_v56 = vpack.c.bf16 %v12478_v54, %v12477_v50  ;;  %v12515_v50 = vld [vmem:[%s21850_s17 + $0x60] sm:$0xff]  ;;  %v12516_v54 = vld [vmem:[%s21850_s17 + $0x68] sm:$0xff] }
0x19b9   :  { %v19926_v3 = vpop.eup %19925 }
0x19ba   :  { %v12428_v58 = vmul.f32 %v19926_v3, %v12425_v44  ;;  %v12479_v44 = vld [vmem:[%s21765_s13 + $0x40] sm:$0xff] }
0x19bb   :  { %v12483_v3 = vld [vmem:[%s21765_s13 + $0x60] sm:$0xff] }
0x19bc   :  { %v12433_v63 = vmul.f32 %v12432_v34, %v12428_v58  ;;  %v12480_v34 = vld [vmem:[%s21765_s13 + $0x48] sm:$0xff]  ;;  %v19679_v58 = vpack.c.bf16 %v12484_v1, %v12483_v3  ;;  %v12517_v3 = vld [vmem:[%s21850_s17 + $0x70] sm:$0xff]  ;;  %v12518_v1 = vld [vmem:[%s21850_s17 + $0x78] sm:$0xff] }
0x19be   :  { %v21732_v15 = vadd.f32 %v12437_v0, %v12433_v63  ;;  %v19673_v0 = vpack.c.bf16 %v12480_v34, %v12479_v44  ;;  %v12486_v63 = vld [vmem:[%s21765_s13 + $0x78] sm:$0xff]  ;;  %v12513_v44 = vld [vmem:[%s21850_s17 + $0x50] sm:$0xff] }
0x19bf   :  { %v12514_v34 = vld [vmem:[%s21850_s17 + $0x58] sm:$0xff] }
0x19c0   :  { %18744 = vmatmul.mubr.msk.f32.vlgmr.msra.gmra.mrb[152].mxu0 %vm544_vm3, %v21732_v15  ;;  %18755 = vmatmul.mubr.msk.f32.vlgmr.msra.gmra.mrb[152].mxu1 %vm544_vm3, %v21732_v15 }
0x19c1   :  { %19626 = vmatpush3.bf16.msra.mxu0 %v19625_v61  ;;  %19632 = vmatpush3.bf16.msra.mxu1 %v19631_v6  ;;  %v19676_v61 = vpack.c.bf16 %v12482_v60, %v12481_v59  ;;  %v19682_v6 = vpack.c.bf16 %v12486_v63, %v12485_v62  ;;  %v12519_v59 = vld [vmem:[%s21850_s17 + $0x80] sm:$0xff]  ;;  %v12520_v60 = vld [vmem:[%s21850_s17 + $0x88] sm:$0xff] }
0x19c2   :  { %19627 = vmatprep.subr.bf16.mxu0 %v19972_v32  ;;  %19633 = vmatprep.subr.bf16.mxu1 %v19972_v32  ;;  %v12523_v62 = vld [vmem:[%s21850_s17 + $0xa0] sm:$0xff]  ;;  %v12524_v63 = vld [vmem:[%s21850_s17 + $0xa8] sm:$0xff] }
0x19c3   :  { %18765 = vmatprep.mubr.msk.f32.mxu0 %vm19968_vm0, %v19967_v4  ;;  %18776 = vmatprep.mubr.msk.f32.mxu1 %vm19968_vm0, %v19967_v4 }
0x19c5   :  { %19629 = vmatpush3.bf16.msra.mxu0 %v19628_v38  ;;  %19635 = vmatpush3.bf16.msra.mxu1 %v19634_v14  ;;  %v19685_v38 = vpack.c.bf16 %v12488_v11, %v12487_v16  ;;  %v19691_v14 = vpack.c.bf16 %v12492_v12, %v12491_v7  ;;  %v12521_v16 = vld [vmem:[%s21850_s17 + $0x90] sm:$0xff]  ;;  %v12522_v11 = vld [vmem:[%s21850_s17 + $0x98] sm:$0xff] }
0x19c6   :  { %19636 = vmatprep.subr.bf16.mxu0 %v19972_v32  ;;  %19642 = vmatprep.subr.bf16.mxu1 %v19972_v32  ;;  %v12525_v7 = vld [vmem:[%s21850_s17 + $0xb0] sm:$0xff]  ;;  %v12526_v12 = vld [vmem:[%s21850_s17 + $0xb8] sm:$0xff] }
0x19c8   :  { %18766 = vmatmul.mubr.msk.f32.vlgmr.msra.gmra.mrb[154].mxu0 %vm544_vm3, %v21732_v15  ;;  %18777 = vmatmul.mubr.msk.f32.vlgmr.msra.gmra.mrb[154].mxu1 %vm544_vm3, %v21732_v15 }
0x19c9   :  { %19638 = vmatpush3.bf16.msra.mxu0 %v19637_v25  ;;  %19644 = vmatpush3.bf16.msra.mxu1 %v19643_v21  ;;  %v19688_v25 = vpack.c.bf16 %v12490_v18, %v12489_v2  ;;  %v19694_v21 = vpack.c.bf16 %v12494_v23, %v12493_v19  ;;  %v12527_v2 = vld [vmem:[%s21850_s17 + $0xc0] sm:$0xff]  ;;  %v12528_v18 = vld [vmem:[%s21850_s17 + $0xc8] sm:$0xff] }
0x19ca   :  { %19639 = vmatprep.subr.bf16.mxu0 %v19972_v32  ;;  %19645 = vmatprep.subr.bf16.mxu1 %v19972_v32  ;;  %v12531_v19 = vld [vmem:[%s21850_s17 + $0xe0] sm:$0xff]  ;;  %v12532_v23 = vld [vmem:[%s21850_s17 + $0xe8] sm:$0xff] }
0x19cb   :  { %18787 = vmatprep.mubr.msk.f32.mxu0 %vm19968_vm0, %v19967_v4  ;;  %18798 = vmatprep.mubr.msk.f32.mxu1 %vm19968_vm0, %v19967_v4 }
0x19cd   :  { %19641 = vmatpush3.bf16.msra.mxu0 %v19640_v36  ;;  %19647 = vmatpush3.bf16.msra.mxu1 %v19646_v17  ;;  %v19697_v36 = vpack.c.bf16 %v12496_v24, %v12495_v26  ;;  %v19703_v17 = vpack.c.bf16 %v12500_v27, %v12499_v20  ;;  %v12529_v26 = vld [vmem:[%s21850_s17 + $0xd0] sm:$0xff]  ;;  %v12530_v24 = vld [vmem:[%s21850_s17 + $0xd8] sm:$0xff] }
0x19ce   :  { %19648 = vmatprep.subr.bf16.mxu0 %v19972_v32  ;;  %19654 = vmatprep.subr.bf16.mxu1 %v19972_v32  ;;  %v12533_v20 = vld [vmem:[%s21850_s17 + $0xf0] sm:$0xff]  ;;  %v12534_v27 = vld [vmem:[%s21850_s17 + $0xf8] sm:$0xff] }
0x19d0   :  { %18788 = vmatmul.mubr.msk.f32.vlgmr.msra.gmra.mrb[156].mxu0 %vm544_vm3, %v21732_v15  ;;  %18799 = vmatmul.mubr.msk.f32.vlgmr.msra.gmra.mrb[156].mxu1 %vm544_vm3, %v21732_v15 }
0x19d1   :  { %19650 = vmatpush3.bf16.msra.mxu0 %v19649_v47  ;;  %19656 = vmatpush3.bf16.msra.mxu1 %v19655_v31  ;;  %v19700_v47 = vpack.c.bf16 %v12498_v29, %v12497_v13  ;;  %v19706_v31 = vpack.c.bf16 %v12502_v35, %v12501_v30 }
0x19d2   :  { %19651 = vmatprep.subr.bf16.mxu0 %v19972_v32  ;;  %19657 = vmatprep.subr.bf16.mxu1 %v19972_v32 }
0x19d3   :  { %18809 = vmatprep.mubr.msk.f32.mxu0 %vm19968_vm0, %v19967_v4  ;;  %18820 = vmatprep.mubr.msk.f32.mxu1 %vm19968_vm0, %v19967_v4 }
0x19d5   :  { %19653 = vmatpush3.bf16.msra.mxu0 %v19652_v41  ;;  %19659 = vmatpush3.bf16.msra.mxu1 %v19658_v33  ;;  %v19709_v41 = vpack.c.bf16 %v12504_v57, %v12503_v39  ;;  %v19715_v33 = vpack.c.bf16 %v12508_v40, %v12507_v43 }
0x19d6   :  { %19660 = vmatprep.subr.bf16.mxu0 %v19972_v32  ;;  %19666 = vmatprep.subr.bf16.mxu1 %v19972_v32 }
0x19d8   :  { %18810 = vmatmul.mubr.msk.f32.vlgmr.msra.gmra.mrb[158].mxu0 %vm544_vm3, %v21732_v15  ;;  %18821 = vmatmul.mubr.msk.f32.vlgmr.msra.gmra.mrb[158].mxu1 %vm544_vm3, %v21732_v15 }
0x19d9   :  { %19662 = vmatpush3.bf16.msra.mxu0 %v19661_v5  ;;  %19668 = vmatpush3.bf16.msra.mxu1 %v19667_v45  ;;  %v19712_v5 = vpack.c.bf16 %v12506_v48, %v12505_v53  ;;  %v19718_v45 = vpack.c.bf16 %v12510_v51, %v12509_v42 }
0x19da   :  { %19663 = vmatprep.subr.bf16.mxu0 %v19972_v32  ;;  %19669 = vmatprep.subr.bf16.mxu1 %v19972_v32 }
0x19db   :  { %18831 = vmatprep.mubr.msk.f32.mxu0 %vm19968_vm0, %v19967_v4  ;;  %18842 = vmatprep.mubr.msk.f32.mxu1 %vm19968_vm0, %v19967_v4 }
0x19dd   :  { %19665 = vmatpush3.bf16.msra.mxu0 %v19664_v49  ;;  %19671 = vmatpush3.bf16.msra.mxu1 %v19670_v56  ;;  %v19721_v49 = vpack.c.bf16 %v12512_v46, %v12511_v37  ;;  %v19727_v56 = vpack.c.bf16 %v12516_v54, %v12515_v50 }
0x19de   :  { %19672 = vmatprep.subr.bf16.mxu0 %v19972_v32  ;;  %19678 = vmatprep.subr.bf16.mxu1 %v19972_v32 }
0x19e0   :  { %18832 = vmatmul.mubr.msk.f32.vlgmr.msra.gmra.mrb[160].mxu0 %vm544_vm3, %v21732_v15  ;;  %18843 = vmatmul.mubr.msk.f32.vlgmr.msra.gmra.mrb[160].mxu1 %vm544_vm3, %v21732_v15 }
0x19e1   :  { %19674 = vmatpush3.bf16.msra.mxu0 %v19673_v0  ;;  %19680 = vmatpush3.bf16.msra.mxu1 %v19679_v58  ;;  %v19724_v0 = vpack.c.bf16 %v12514_v34, %v12513_v44  ;;  %v19730_v58 = vpack.c.bf16 %v12518_v1, %v12517_v3 }
0x19e2   :  { %19675 = vmatprep.subr.bf16.mxu0 %v19972_v32  ;;  %19681 = vmatprep.subr.bf16.mxu1 %v19972_v32 }
0x19e3   :  { %18853 = vmatprep.mubr.msk.f32.mxu0 %vm19968_vm0, %v19967_v4  ;;  %18864 = vmatprep.mubr.msk.f32.mxu1 %vm19968_vm0, %v19967_v4 }
0x19e5   :  { %19677 = vmatpush3.bf16.msra.mxu0 %v19676_v61  ;;  %19683 = vmatpush3.bf16.msra.mxu1 %v19682_v6  ;;  %v19733_v61 = vpack.c.bf16 %v12520_v60, %v12519_v59  ;;  %v19739_v6 = vpack.c.bf16 %v12524_v63, %v12523_v62  ;;  %v21997_v59 = vld [vmem:[%s21974_s21 + $0x8] sm:$0x7]  ;;  %v22000_v60 = vld [vmem:[%s21974_s21 + $0xc] sm:$0x7] }
0x19e6   :  { %19684 = vmatprep.subr.bf16.mxu0 %v19972_v32  ;;  %19690 = vmatprep.subr.bf16.mxu1 %v19972_v32  ;;  %v13166_v62 = vrot.slane %v21997_v59, %v20038_v9  ;;  %v13170_v63 = vrot.slane %v22000_v60, %v20038_v9 }
0x19e8   :  { %18854 = vmatmul.mubr.msk.f32.vlgmr.msra.gmra.mrb[162].mxu0 %vm544_vm3, %v21732_v15  ;;  %18865 = vmatmul.mubr.msk.f32.vlgmr.msra.gmra.mrb[162].mxu1 %vm544_vm3, %v21732_v15 }
0x19e9   :  { %19686 = vmatpush3.bf16.msra.mxu0 %v19685_v38  ;;  %19692 = vmatpush3.bf16.msra.mxu1 %v19691_v14  ;;  %v19736_v38 = vpack.c.bf16 %v12522_v11, %v12521_v16  ;;  %v19742_v14 = vpack.c.bf16 %v12526_v12, %v12525_v7 }
0x19ea   :  { %19687 = vmatprep.subr.bf16.mxu0 %v19972_v32  ;;  %19693 = vmatprep.subr.bf16.mxu1 %v19972_v32 }
0x19eb   :  { %18875 = vmatprep.mubr.msk.f32.mxu0 %vm19968_vm0, %v19967_v4  ;;  %18886 = vmatprep.mubr.msk.f32.mxu1 %vm19968_vm0, %v19967_v4 }
0x19ed   :  { %19689 = vmatpush3.bf16.msra.mxu0 %v19688_v25  ;;  %19695 = vmatpush3.bf16.msra.mxu1 %v19694_v21  ;;  %v19745_v25 = vpack.c.bf16 %v12528_v18, %v12527_v2  ;;  %v19751_v21 = vpack.c.bf16 %v12532_v23, %v12531_v19  ;;  %v22021_v19 = vld [vmem:[%s21974_s21 + $0x10] sm:$0x7]  ;;  %v22024_v23 = vld [vmem:[%s21974_s21 + $0x14] sm:$0x7] }
0x19ee   :  { %19696 = vmatprep.subr.bf16.mxu0 %v19972_v32  ;;  %19702 = vmatprep.subr.bf16.mxu1 %v19972_v32 }
0x19f0   :  { %18876 = vmatmul.mubr.msk.f32.vlgmr.msra.gmra.mrb[164].mxu0 %vm544_vm3, %v21732_v15  ;;  %18887 = vmatmul.mubr.msk.f32.vlgmr.msra.gmra.mrb[164].mxu1 %vm544_vm3, %v21732_v15 }
0x19f1   :  { %19698 = vmatpush3.bf16.msra.mxu0 %v19697_v36  ;;  %19704 = vmatpush3.bf16.msra.mxu1 %v19703_v17  ;;  %v19748_v36 = vpack.c.bf16 %v12530_v24, %v12529_v26  ;;  %v19754_v17 = vpack.c.bf16 %v12534_v27, %v12533_v20  ;;  %v12579_v26 = vrot.slane %v22021_v19, %v20035_v8 }
0x19f2   :  { %19699 = vmatprep.subr.bf16.mxu0 %v19972_v32  ;;  %19705 = vmatprep.subr.bf16.mxu1 %v19972_v32  ;;  %v12583_v24 = vrot.slane %v22024_v23, %v20035_v8 }
0x19f3   :  { %18897 = vmatprep.mubr.msk.f32.mxu0 %vm19968_vm0, %v19967_v4  ;;  %18908 = vmatprep.mubr.msk.f32.mxu1 %vm19968_vm0, %v19967_v4 }
0x19f5   :  { %19701 = vmatpush3.bf16.msra.mxu0 %v19700_v47  ;;  %19707 = vmatpush3.bf16.msra.mxu1 %v19706_v31 }
0x19f6   :  { %19708 = vmatprep.subr.bf16.mxu0 %v19972_v32  ;;  %19714 = vmatprep.subr.bf16.mxu1 %v19972_v32 }
0x19f8   :  { %18898 = vmatmul.mubr.msk.f32.vlgmr.msra.gmra.mrb[166].mxu0 %vm544_vm3, %v21732_v15  ;;  %18909 = vmatmul.mubr.msk.f32.vlgmr.msra.gmra.mrb[166].mxu1 %vm544_vm3, %v21732_v15 }
0x19f9   :  { %19710 = vmatpush3.bf16.msra.mxu0 %v19709_v41  ;;  %19716 = vmatpush3.bf16.msra.mxu1 %v19715_v33 }
0x19fa   :  { %19711 = vmatprep.subr.bf16.mxu0 %v19972_v32  ;;  %19717 = vmatprep.subr.bf16.mxu1 %v19972_v32 }
0x19fb   :  { %18919 = vmatprep.mubr.msk.f32.mxu0 %vm19968_vm0, %v19967_v4  ;;  %18930 = vmatprep.mubr.msk.f32.mxu1 %vm19968_vm0, %v19967_v4 }
0x19fd   :  { %19713 = vmatpush3.bf16.msra.mxu0 %v19712_v5  ;;  %19719 = vmatpush3.bf16.msra.mxu1 %v19718_v45  ;;  %v21981_v5 = vld [vmem:[%s21974_s21] sm:$0x7]  ;;  %v21984_v45 = vld [vmem:[%s21974_s21 + $0x4] sm:$0x7] }
0x19fe   :  { %19720 = vmatprep.subr.bf16.mxu0 %v19972_v32  ;;  %19726 = vmatprep.subr.bf16.mxu1 %v19972_v32  ;;  %v13158_v37 = vrot.slane %v21981_v5, %v20038_v9  ;;  %v13162_v46 = vrot.slane %v21984_v45, %v20038_v9  ;;  %v12563_v50 = vrot.slane %v21981_v5, %v20035_v8 }
0x19ff   :  { %v12567_v54 = vrot.slane %v21984_v45, %v20035_v8 }
0x1a00   :  { %18920 = vmatmul.mubr.msk.f32.vlgmr.msra.gmra.mrb[168].mxu0 %vm544_vm3, %v21732_v15  ;;  %18931 = vmatmul.mubr.msk.f32.vlgmr.msra.gmra.mrb[168].mxu1 %vm544_vm3, %v21732_v15 }
0x1a01   :  { %19722 = vmatpush3.bf16.msra.mxu0 %v19721_v49  ;;  %19728 = vmatpush3.bf16.msra.mxu1 %v19727_v56 }
0x1a02   :  { %19723 = vmatprep.subr.bf16.mxu0 %v19972_v32  ;;  %19729 = vmatprep.subr.bf16.mxu1 %v19972_v32 }
0x1a03   :  { %18941 = vmatprep.mubr.msk.f32.mxu0 %vm19968_vm0, %v19967_v4  ;;  %18952 = vmatprep.mubr.msk.f32.mxu1 %vm19968_vm0, %v19967_v4 }
0x1a05   :  { %19725 = vmatpush3.bf16.msra.mxu0 %v19724_v0  ;;  %19731 = vmatpush3.bf16.msra.mxu1 %v19730_v58 }
0x1a06   :  { %19732 = vmatprep.subr.bf16.mxu0 %v19972_v32  ;;  %19738 = vmatprep.subr.bf16.mxu1 %v19972_v32 }
0x1a08   :  { %18942 = vmatmul.mubr.msk.f32.vlgmr.msra.gmra.mrb[170].mxu0 %vm544_vm3, %v21732_v15  ;;  %18953 = vmatmul.mubr.msk.f32.vlgmr.msra.gmra.mrb[170].mxu1 %vm544_vm3, %v21732_v15 }
0x1a09   :  { %19734 = vmatpush3.bf16.msra.mxu0 %v19733_v61  ;;  %19740 = vmatpush3.bf16.msra.mxu1 %v19739_v6  ;;  %v12571_v61 = vrot.slane %v21997_v59, %v20035_v8  ;;  %v12575_v6 = vrot.slane %v22000_v60, %v20035_v8 }
0x1a0a   :  { %19735 = vmatprep.subr.bf16.mxu0 %v19972_v32  ;;  %19741 = vmatprep.subr.bf16.mxu1 %v19972_v32 }
0x1a0b   :  { %18963 = vmatprep.mubr.msk.f32.mxu0 %vm19968_vm0, %v19967_v4  ;;  %18974 = vmatprep.mubr.msk.f32.mxu1 %vm19968_vm0, %v19967_v4 }
0x1a0d   :  { %19737 = vmatpush3.bf16.msra.mxu0 %v19736_v38  ;;  %19743 = vmatpush3.bf16.msra.mxu1 %v19742_v14 }
0x1a0e   :  { %19744 = vmatprep.subr.bf16.mxu0 %v19972_v32  ;;  %19750 = vmatprep.subr.bf16.mxu1 %v19972_v32 }
0x1a10   :  { %18964 = vmatmul.mubr.msk.f32.vlgmr.msra.gmra.mrb[172].mxu0 %vm544_vm3, %v21732_v15  ;;  %18975 = vmatmul.mubr.msk.f32.vlgmr.msra.gmra.mrb[172].mxu1 %vm544_vm3, %v21732_v15 }
0x1a11   :  { %19746 = vmatpush3.bf16.msra.mxu0 %v19745_v25  ;;  %19752 = vmatpush3.bf16.msra.mxu1 %v19751_v21  ;;  %v13174_v25 = vrot.slane %v22021_v19, %v20038_v9  ;;  %v13178_v21 = vrot.slane %v22024_v23, %v20038_v9 }
0x1a12   :  { %19747 = vmatprep.subr.bf16.mxu0 %v19972_v32  ;;  %19753 = vmatprep.subr.bf16.mxu1 %v19972_v32 }
0x1a13   :  { %18985 = vmatprep.mubr.msk.f32.mxu0 %vm19968_vm0, %v19967_v4  ;;  %18996 = vmatprep.mubr.msk.f32.mxu1 %vm19968_vm0, %v19967_v4 }
0x1a15   :  { %19749 = vmatpush3.bf16.msra.mxu0 %v19748_v36  ;;  %19755 = vmatpush3.bf16.msra.mxu1 %v19754_v17 }
0x1a16   :  { %18999 = vmatprep.subr.mxu0 %v19967_v4  ;;  %19004 = vmatprep.subr.mxu1 %v19967_v4 }
0x1a18   :  { %18986 = vmatmul.mubr.msk.f32.vlgmr.msra.gmra.mrb[174].mxu0 %vm544_vm3, %v21732_v15  ;;  %18997 = vmatmul.mubr.msk.f32.vlgmr.msra.gmra.mrb[174].mxu1 %vm544_vm3, %v21732_v15 }
0x1a19   :  { %19001 = vmatprep.mubr.msk.f32.mxu0 %vm19968_vm0, %v19967_v4  ;;  %19006 = vmatprep.mubr.msk.f32.mxu1 %vm19968_vm0, %v19967_v4 }
0x1a93   :  { %v12661_v13 = vpop.f32.mrb[152].mxu0  ;;  %v12731_v29 = vpop.f32.mrb[152].mxu1 }
0x1a94   :  { %v18745_v30 = vpop.f32.mrb[153].mxu0  ;;  %v18756_v35 = vpop.f32.mrb[153].mxu1  ;;  %v12662_v0 = vadd.f32 %v12661_v13, %v12563_v50  ;;  %v12732_v58 = vadd.f32 %v12731_v29, %v12567_v54 }
0x1a9b   :  { %v12801_v47 = vpop.f32.mrb[154].mxu0  ;;  %v12871_v31 = vpop.f32.mrb[154].mxu1 }
0x1a9c   :  { %v18767_v39 = vpop.f32.mrb[155].mxu0  ;;  %v18778_v57 = vpop.f32.mrb[155].mxu1  ;;  %v12802_v2 = vadd.f32 %v12801_v47, %v12571_v61  ;;  %v12872_v18 = vadd.f32 %v12871_v31, %v12575_v6  ;;  %v12541_v47 = vld [vmem:[%s21974_s21 + $0x18] sm:$0x7]  ;;  %v12542_v31 = vld [vmem:[%s21974_s21 + $0x1c] sm:$0x7]  ;;  %v13766_v61 = vrot.slane %v22021_v19, %v20041_v10  ;;  %v13770_v6 = vrot.slane %v22024_v23, %v20041_v10 }
0x1a9d   :  { %v13182_v39 = vrot.slane %v12541_v47, %v20038_v9  ;;  %v13186_v57 = vrot.slane %v12542_v31, %v20038_v9 }
0x1aa3   :  { %v21967_v43 = vpop.f32.mrb[156].mxu0  ;;  %v21969_v40 = vpop.f32.mrb[156].mxu1 }
0x1aa4   :  { %v18789_v41 = vpop.f32.mrb[157].mxu0  ;;  %v18800_v33 = vpop.f32.mrb[157].mxu1  ;;  %v12942_v30 = vadd.f32 %v21967_v43, %v12579_v26  ;;  %v13012_v35 = vadd.f32 %v21969_v40, %v12583_v24  ;;  %v12587_v43 = vrot.slane %v12541_v47, %v20035_v8  ;;  %v12591_v40 = vrot.slane %v12542_v31, %v20035_v8 }
0x1aab   :  { %v21976_v53 = vpop.f32.mrb[158].mxu0  ;;  %v21978_v48 = vpop.f32.mrb[158].mxu1 }
0x1aac   :  { %v18811_v42 = vpop.f32.mrb[159].mxu0  ;;  %v18822_v51 = vpop.f32.mrb[159].mxu1  ;;  %v13082_v50 = vadd.f32 %v21976_v53, %v12587_v43  ;;  %v13152_v54 = vadd.f32 %v21978_v48, %v12591_v40 }
0x1ab3   :  { %v13253_v49 = vpop.f32.mrb[160].mxu0  ;;  %v13323_v56 = vpop.f32.mrb[160].mxu1 }
0x1ab4   :  { %v13254_v44 = vadd.f32 %v13253_v49, %v13158_v37  ;;  %v13324_v34 = vadd.f32 %v13323_v56, %v13162_v46  ;;  %v18833_v3 = vpop.f32.mrb[161].mxu0  ;;  %v18844_v1 = vpop.f32.mrb[161].mxu1  ;;  %v13750_v49 = vrot.slane %v21981_v5, %v20041_v10  ;;  %v13754_v56 = vrot.slane %v21984_v45, %v20041_v10 }
0x1ab5   :  { %v13762_v5 = vrot.slane %v22000_v60, %v20041_v10 }
0x1ab6   :  { %19000 = vmatpush3.xpose.msk.msra.mxu0 %vm2292_vm4, %v13254_v44  ;;  %19005 = vmatpush3.xpose.msk.msra.mxu1 %vm2292_vm4, %v13324_v34 }
0x1ab7   :  { %19009 = vmatprep.subr.mxu0 %v19967_v4  ;;  %19014 = vmatprep.subr.mxu1 %v19967_v4 }
0x1ab9   :  { %19002 = vmatmul.mubr.msk.f32.vlgmr.msra.gmra.mrb[176].mxu0 %vm2292_vm4, %v12662_v0  ;;  %19007 = vmatmul.mubr.msk.f32.vlgmr.msra.gmra.mrb[176].mxu1 %vm2292_vm4, %v12732_v58 }
0x1aba   :  { %19011 = vmatprep.mubr.msk.f32.mxu0 %vm19968_vm0, %v19967_v4  ;;  %19016 = vmatprep.mubr.msk.f32.mxu1 %vm19968_vm0, %v19967_v4 }
0x1abb   :  { %v13393_v16 = vpop.f32.mrb[162].mxu0  ;;  %v13463_v11 = vpop.f32.mrb[162].mxu1 }
0x1abc   :  { %v13394_v7 = vadd.f32 %v13393_v16, %v13166_v62  ;;  %v13464_v12 = vadd.f32 %v13463_v11, %v13170_v63  ;;  %v18855_v38 = vpop.f32.mrb[163].mxu0  ;;  %v18866_v14 = vpop.f32.mrb[163].mxu1 }
0x1abd   :  { %v13774_v14 = vrot.slane %v12541_v47, %v20041_v10 }
0x1abe   :  { %19010 = vmatpush3.xpose.msk.msra.mxu0 %vm2292_vm4, %v13394_v7  ;;  %19015 = vmatpush3.xpose.msk.msra.mxu1 %vm2292_vm4, %v13464_v12 }
0x1abf   :  { %19019 = vmatprep.subr.mxu0 %v19967_v4  ;;  %19024 = vmatprep.subr.mxu1 %v19967_v4 }
0x1ac1   :  { %19012 = vmatmul.mubr.msk.f32.vlgmr.msra.gmra.mrb[178].mxu0 %vm2292_vm4, %v12802_v2  ;;  %19017 = vmatmul.mubr.msk.f32.vlgmr.msra.gmra.mrb[178].mxu1 %vm2292_vm4, %v12872_v18  ;;  %v13778_v2 = vrot.slane %v12542_v31, %v20041_v10 }
0x1ac2   :  { %19021 = vmatprep.mubr.msk.f32.mxu0 %vm19968_vm0, %v19967_v4  ;;  %19026 = vmatprep.mubr.msk.f32.mxu1 %vm19968_vm0, %v19967_v4 }
0x1ac3   :  { %v13533_v20 = vpop.f32.mrb[164].mxu0  ;;  %v13603_v27 = vpop.f32.mrb[164].mxu1 }
0x1ac4   :  { %v13534_v36 = vadd.f32 %v13533_v20, %v13174_v25  ;;  %v13604_v17 = vadd.f32 %v13603_v27, %v13178_v21  ;;  %v18877_v13 = vpop.f32.mrb[165].mxu0  ;;  %v18888_v29 = vpop.f32.mrb[165].mxu1 }
0x1ac6   :  { %19020 = vmatpush3.xpose.msk.msra.mxu0 %vm2292_vm4, %v13534_v36  ;;  %19025 = vmatpush3.xpose.msk.msra.mxu1 %vm2292_vm4, %v13604_v17 }
0x1ac7   :  { %19029 = vmatprep.subr.mxu0 %v19967_v4  ;;  %19034 = vmatprep.subr.mxu1 %v19967_v4 }
0x1ac9   :  { %19022 = vmatmul.mubr.msk.f32.vlgmr.msra.gmra.mrb[180].mxu0 %vm2292_vm4, %v12942_v30  ;;  %19027 = vmatmul.mubr.msk.f32.vlgmr.msra.gmra.mrb[180].mxu1 %vm2292_vm4, %v13012_v35 }
0x1aca   :  { %19031 = vmatprep.mubr.msk.f32.mxu0 %vm19968_vm0, %v19967_v4  ;;  %19036 = vmatprep.mubr.msk.f32.mxu1 %vm19968_vm0, %v19967_v4 }
0x1acb   :  { %v13673_v41 = vpop.f32.mrb[166].mxu0  ;;  %v13743_v33 = vpop.f32.mrb[166].mxu1 }
0x1acc   :  { %v13674_v42 = vadd.f32 %v13673_v41, %v13182_v39  ;;  %v13744_v51 = vadd.f32 %v13743_v33, %v13186_v57  ;;  %v18899_v37 = vpop.f32.mrb[167].mxu0  ;;  %v18910_v46 = vpop.f32.mrb[167].mxu1 }
0x1ace   :  { %19030 = vmatpush3.xpose.msk.msra.mxu0 %vm2292_vm4, %v13674_v42  ;;  %19035 = vmatpush3.xpose.msk.msra.mxu1 %vm2292_vm4, %v13744_v51 }
0x1acf   :  { %19039 = vmatprep.subr.mxu0 %v19967_v4  ;;  %19044 = vmatprep.subr.mxu1 %v19967_v4 }
0x1ad1   :  { %19032 = vmatmul.mubr.msk.f32.vlgmr.msra.gmra.mrb[182].mxu0 %vm2292_vm4, %v13082_v50  ;;  %19037 = vmatmul.mubr.msk.f32.vlgmr.msra.gmra.mrb[182].mxu1 %vm2292_vm4, %v13152_v54 }
0x1ad2   :  { %19041 = vmatprep.mubr.msk.f32.mxu0 %vm19968_vm0, %v19967_v4  ;;  %19046 = vmatprep.mubr.msk.f32.mxu1 %vm19968_vm0, %v19967_v4 }
0x1ad3   :  { %v13845_v53 = vpop.f32.mrb[168].mxu0  ;;  %v13915_v48 = vpop.f32.mrb[168].mxu1 }
0x1ad4   :  { %v13846_v44 = vadd.f32 %v13845_v53, %v13750_v49  ;;  %v13916_v34 = vadd.f32 %v13915_v48, %v13754_v56  ;;  %v18921_v3 = vpop.f32.mrb[169].mxu0  ;;  %v18932_v1 = vpop.f32.mrb[169].mxu1 }
0x1ad6   :  { %19040 = vmatpush3.msra.mxu0 %v13846_v44  ;;  %19045 = vmatpush3.msra.mxu1 %v13916_v34 }
0x1ad7   :  { %19049 = vmatprep.subr.mxu0 %v19967_v4  ;;  %19054 = vmatprep.subr.mxu1 %v19967_v4 }
0x1adb   :  { %v22080_v45 = vpop.f32.mrb[170].mxu0  ;;  %v14055_v0 = vpop.f32.mrb[170].mxu1 }
0x1adc   :  { %v22082_v58 = vadd.f32 %v14055_v0, %v13762_v5  ;;  %v18943_v62 = vpop.f32.mrb[171].mxu0  ;;  %v18954_v63 = vpop.f32.mrb[171].mxu1 }
0x1ae3   :  { %v14125_v16 = vpop.f32.mrb[172].mxu0  ;;  %v14195_v11 = vpop.f32.mrb[172].mxu1 }
0x1ae4   :  { %v22088_v7 = vadd.f32 %v14125_v16, %v13766_v61  ;;  %v22090_v12 = vadd.f32 %v14195_v11, %v13770_v6  ;;  %v18965_v60 = vpop.f32.mrb[173].mxu0  ;;  %v18976_v38 = vpop.f32.mrb[173].mxu1 }
0x1aeb   :  { %v14265_v18 = vpop.f32.mrb[174].mxu0  ;;  %v14335_v25 = vpop.f32.mrb[174].mxu1 }
0x1aec   :  { %v22094_v21 = vadd.f32 %v14265_v18, %v13774_v14  ;;  %v22096_v19 = vadd.f32 %v14335_v25, %v13778_v2  ;;  %v18987_v26 = vpop.f32.mrb[175].mxu0  ;;  %v18998_v23 = vpop.f32.mrb[175].mxu1 }
0x1b8c   :  { %v14411_v24 = vpop.f32.mrb[176].mxu0  ;;  %v14487_v20 = vpop.f32.mrb[176].mxu1 }
0x1b8d   :  { %v19003_v27 = vpop.f32.mrb[177].mxu0  ;;  %v19008_v36 = vpop.f32.mrb[177].mxu1  ;;  %v14950_v17 = vsel %vm218_vm1, %v14487_v20, -inf  ;;  %v14947_v13 = vsel %vm218_vm1, %v14411_v24, -inf }
0x1b8e   :  { %14951 = vmax.xlane.f32.xlu0 %v14950_v17  ;;  %14948 = vmax.xlane.f32.xlu1 %v14947_v13 }
0x1b94   :  { %v14563_v29 = vpop.f32.mrb[178].mxu0  ;;  %v14639_v30 = vpop.f32.mrb[178].mxu1 }
0x1b95   :  { %v19013_v35 = vpop.f32.mrb[179].mxu0  ;;  %v19018_v47 = vpop.f32.mrb[179].mxu1  ;;  %v14956_v31 = vsel %vm218_vm1, %v14639_v30, -inf  ;;  %v14953_v39 = vsel %vm218_vm1, %v14563_v29, -inf }
0x1b96   :  { %14957 = vmax.xlane.f32.xlu0 %v14956_v31  ;;  %14954 = vmax.xlane.f32.xlu1 %v14953_v39 }
0x1b9c   :  { %v14715_v57 = vpop.f32.mrb[180].mxu0  ;;  %v14791_v43 = vpop.f32.mrb[180].mxu1 }
0x1b9d   :  { %v19023_v40 = vpop.f32.mrb[181].mxu0  ;;  %v19028_v41 = vpop.f32.mrb[181].mxu1  ;;  %v14962_v33 = vsel %vm218_vm1, %v14791_v43, -inf  ;;  %v14959_v42 = vsel %vm218_vm1, %v14715_v57, -inf }
0x1b9e   :  { %14963 = vmax.xlane.f32.xlu0 %v14962_v33  ;;  %14960 = vmax.xlane.f32.xlu1 %v14959_v42 }
0x1ba4   :  { %v14867_v51 = vpop.f32.mrb[182].mxu0  ;;  %v14943_v37 = vpop.f32.mrb[182].mxu1 }
0x1ba5   :  { %v19033_v46 = vpop.f32.mrb[183].mxu0  ;;  %v19038_v50 = vpop.f32.mrb[183].mxu1  ;;  %v14968_v54 = vsel %vm218_vm1, %v14943_v37, -inf  ;;  %v14965_v49 = vsel %vm218_vm1, %v14867_v51, -inf }
0x1ba6   :  { %14969 = vmax.xlane.f32.xlu0 %v14968_v54  ;;  %14966 = vmax.xlane.f32.xlu1 %v14965_v49  ;;  %v13758_v50 = vrot.slane %v21997_v59, %v20041_v10 }
0x1c1b   :  { %v14952_v56 = vpop.xlane.xlu0 %14951  ;;  %v14949_v53 = vpop.xlane.xlu1 %14948 }
0x1c1c   :  { %v14972_v48 = vsub.f32 %v14487_v20, %v14952_v56  ;;  %v14971_v44 = vsub.f32 %v14411_v24, %v14949_v53 }
0x1c1e   :  { %v14981_v34 = vmul.f32 1.442695, %v14972_v48  ;;  %v14979_v3 = vmul.f32 1.442695, %v14971_v44  ;;  %v13986_v48 = vadd.f32 %v22080_v45, %v13758_v50 }
0x1c20   :  { %19927 = vpow2.f32 %v14981_v34 }
0x1c21   :  { %19929 = vpow2.f32 %v14979_v3 }
0x1c23   :  { %v14958_v1 = vpop.xlane.xlu0 %14957  ;;  %v14955_v5 = vpop.xlane.xlu1 %14954 }
0x1c24   :  { %v14974_v0 = vsub.f32 %v14639_v30, %v14958_v1  ;;  %v14973_v62 = vsub.f32 %v14563_v29, %v14955_v5 }
0x1c26   :  { %v14985_v63 = vmul.f32 1.442695, %v14974_v0  ;;  %v14983_v61 = vmul.f32 1.442695, %v14973_v62 }
0x1c28   :  { %19931 = vpow2.f32 %v14985_v63 }
0x1c29   :  { %19933 = vpow2.f32 %v14983_v61 }
0x1c2a   :  { %v19928_v6 = vpop.eup %19927 }
0x1c2b   :  { %v19930_v16 = vpop.eup %19929  ;;  %v14964_v11 = vpop.xlane.xlu0 %14963  ;;  %v14998_v38 = vsel %vm218_vm1, %v19928_v6, 0.0 }
0x1c2c   :  { %v14961_v60 = vpop.xlane.xlu1 %14960  ;;  %v14976_v14 = vsub.f32 %v14791_v43, %v14964_v11  ;;  %14999 = vadd.xlane.f32.xlu0 %v14998_v38  ;;  %v14995_v18 = vsel %vm218_vm1, %v19930_v16, 0.0  ;;  %v12546_v11 = vld [vmem:[%s22155_s25 + $0xc] sm:$0xf]  ;;  %v12545_v38 = vld [vmem:[%s22155_s25 + $0x8] sm:$0xf] }
0x1c2d   :  { %v14975_v2 = vsub.f32 %v14715_v57, %v14961_v60  ;;  %14996 = vadd.xlane.f32.xlu1 %v14995_v18 }
0x1c2e   :  { %v14989_v25 = vmul.f32 1.442695, %v14976_v14 }
0x1c2f   :  { %v14987_v26 = vmul.f32 1.442695, %v14975_v2 }
0x1c30   :  { %19935 = vpow2.f32 %v14989_v25  ;;  %v12548_v25 = vld [vmem:[%s22155_s25 + $0x14] sm:$0xf] }
0x1c31   :  { %19937 = vpow2.f32 %v14987_v26 }
0x1c32   :  { %v19932_v23 = vpop.eup %19931 }
0x1c33   :  { %v19934_v24 = vpop.eup %19933  ;;  %v14970_v20 = vpop.xlane.xlu0 %14969  ;;  %v15004_v36 = vsel %vm218_vm1, %v19932_v23, 0.0 }
0x1c34   :  { %v14967_v27 = vpop.xlane.xlu1 %14966  ;;  %v14978_v17 = vsub.f32 %v14943_v37, %v14970_v20  ;;  %15005 = vadd.xlane.f32.xlu0 %v15004_v36  ;;  %v15001_v29 = vsel %vm218_vm1, %v19934_v24, 0.0  ;;  %v12550_v36 = vld [vmem:[%s22155_s25 + $0x1c] sm:$0xf] }
0x1c35   :  { %v14977_v13 = vsub.f32 %v14867_v51, %v14967_v27  ;;  %15002 = vadd.xlane.f32.xlu1 %v15001_v29 }
0x1c36   :  { %v14993_v30 = vmul.f32 1.442695, %v14978_v17 }
0x1c37   :  { %v14991_v35 = vmul.f32 1.442695, %v14977_v13  ;;  %v12549_v13 = vld [vmem:[%s22155_s25 + $0x18] sm:$0xf] }
0x1c38   :  { %19939 = vpow2.f32 %v14993_v30 }
0x1c39   :  { %19941 = vpow2.f32 %v14991_v35 }
0x1c3a   :  { %v19936_v47 = vpop.eup %19935 }
0x1c3b   :  { %v19938_v31 = vpop.eup %19937  ;;  %v15010_v39 = vsel %vm218_vm1, %v19936_v47, 0.0 }
0x1c3c   :  { %15011 = vadd.xlane.f32.xlu0 %v15010_v39  ;;  %v15007_v57 = vsel %vm218_vm1, %v19938_v31, 0.0 }
0x1c3d   :  { %15008 = vadd.xlane.f32.xlu1 %v15007_v57 }
0x1c42   :  { %v19940_v43 = vpop.eup %19939 }
0x1c43   :  { %v19942_v40 = vpop.eup %19941  ;;  %v15016_v41 = vsel %vm218_vm1, %v19940_v43, 0.0 }
0x1c44   :  { %15017 = vadd.xlane.f32.xlu0 %v15016_v41  ;;  %v15013_v33 = vsel %vm218_vm1, %v19942_v40, 0.0 }
0x1c45   :  { %15014 = vadd.xlane.f32.xlu1 %v15013_v33 }
0x1cb9   :  { %v15000_v42 = vpop.xlane.xlu0 %14999 }
0x1cba   :  { %19943 = vrcp.f32 %v15000_v42  ;;  %v14997_v51 = vpop.xlane.xlu1 %14996 }
0x1cbb   :  { %19945 = vrcp.f32 %v14997_v51 }
0x1cc1   :  { %v15006_v37 = vpop.xlane.xlu0 %15005 }
0x1cc2   :  { %19947 = vrcp.f32 %v15006_v37  ;;  %v15003_v46 = vpop.xlane.xlu1 %15002 }
0x1cc3   :  { %19949 = vrcp.f32 %v15003_v46 }
0x1cc4   :  { %v19944_v54 = vpop.eup %19943 }
0x1cc5   :  { %v19946_v49 = vpop.eup %19945  ;;  %v15028_v56 = vmul.f32 %v19944_v54, %v19928_v6 }
0x1cc6   :  { %v15027_v53 = vmul.f32 %v19946_v49, %v19930_v16 }
0x1cc7   :  { %19047 = vmatmul.mubr.msk.f32.vlgmr.msra.gmra.mrb[184].mxu1 %vm218_vm1, %v15028_v56 }
0x1cc8   :  { %19042 = vmatmul.mubr.msk.f32.vlgmr.msra.gmra.mrb[184].mxu0 %vm218_vm1, %v15027_v53  ;;  %19055 = vmatpush3.msra.mxu1 %v22082_v58 }
0x1cc9   :  { %19050 = vmatpush3.msra.mxu0 %v13986_v48  ;;  %v15012_v44 = vpop.xlane.xlu0 %15011  ;;  %19051 = vmatprep.mubr.msk.f32.mxu0 %vm19968_vm0, %v19967_v4 }
0x1cca   :  { %19951 = vrcp.f32 %v15012_v44  ;;  %v15009_v59 = vpop.xlane.xlu1 %15008  ;;  %19056 = vmatprep.mubr.msk.f32.mxu1 %vm19968_vm0, %v19967_v4  ;;  %19059 = vmatprep.subr.mxu0 %v19967_v4 }
0x1ccb   :  { %19953 = vrcp.f32 %v15009_v59  ;;  %19064 = vmatprep.subr.mxu1 %v19967_v4 }
0x1ccc   :  { %v19948_v45 = vpop.eup %19947 }
0x1ccd   :  { %v19950_v34 = vpop.eup %19949  ;;  %v15030_v3 = vmul.f32 %v19948_v45, %v19932_v23  ;;  %v12547_v23 = vld [vmem:[%s22155_s25 + $0x10] sm:$0xf] }
0x1cce   :  { %v15029_v1 = vmul.f32 %v19950_v34, %v19934_v24 }
0x1ccf   :  { %19057 = vmatmul.mubr.msk.f32.vlgmr.msra.gmra.mrb[186].mxu1 %vm218_vm1, %v15030_v3 }
0x1cd0   :  { %19052 = vmatmul.mubr.msk.f32.vlgmr.msra.gmra.mrb[186].mxu0 %vm218_vm1, %v15029_v1  ;;  %19065 = vmatpush3.msra.mxu1 %v22090_v12 }
0x1cd1   :  { %19060 = vmatpush3.msra.mxu0 %v22088_v7  ;;  %v15018_v58 = vpop.xlane.xlu0 %15017  ;;  %19061 = vmatprep.mubr.msk.f32.mxu0 %vm19968_vm0, %v19967_v4 }
0x1cd2   :  { %19955 = vrcp.f32 %v15018_v58  ;;  %v15015_v5 = vpop.xlane.xlu1 %15014  ;;  %19066 = vmatprep.mubr.msk.f32.mxu1 %vm19968_vm0, %v19967_v4  ;;  %19069 = vmatprep.subr.mxu0 %v19967_v4 }
0x1cd3   :  { %19957 = vrcp.f32 %v15015_v5  ;;  %19074 = vmatprep.subr.mxu1 %v19967_v4 }
0x1cd4   :  { %v19952_v0 = vpop.eup %19951 }
0x1cd5   :  { %v19954_v62 = vpop.eup %19953  ;;  %v15032_v63 = vmul.f32 %v19952_v0, %v19936_v47  ;;  %v22214_v0 = vld [vmem:[%s16516_s29] sm:$0x7f] }
0x1cd6   :  { %v15031_v12 = vmul.f32 %v19954_v62, %v19938_v31 }
0x1cd7   :  { %19067 = vmatmul.mubr.msk.f32.vlgmr.msra.gmra.mrb[188].mxu1 %vm218_vm1, %v15032_v63 }
0x1cd8   :  { %19062 = vmatmul.mubr.msk.f32.vlgmr.msra.gmra.mrb[188].mxu0 %vm218_vm1, %v15031_v12  ;;  %19075 = vmatpush3.msra.mxu1 %v22096_v19  ;;  %v12544_v19 = vld [vmem:[%s22155_s25 + $0x4] sm:$0xf] }
0x1cd9   :  { %19070 = vmatpush3.msra.mxu0 %v22094_v21  ;;  %19071 = vmatprep.mubr.msk.f32.mxu0 %vm19968_vm0, %v19967_v4  ;;  %v12543_v21 = vld [vmem:[%s22155_s25] sm:$0xf] }
0x1cda   :  { %19076 = vmatprep.mubr.msk.f32.mxu1 %vm19968_vm0, %v19967_v4  ;;  %19079 = vmatprep.subr.mxu0 %v19967_v4 }
0x1cdb   :  { %19084 = vmatprep.subr.mxu1 %v19967_v4 }
0x1cdc   :  { %v19956_v7 = vpop.eup %19955 }
0x1cdd   :  { %v19958_v61 = vpop.eup %19957  ;;  %v15034_v6 = vmul.f32 %v19956_v7, %v19940_v43 }
0x1cde   :  { %v15033_v16 = vmul.f32 %v19958_v61, %v19942_v40 }
0x1cdf   :  { %19077 = vmatmul.mubr.msk.f32.vlgmr.msra.gmra.mrb[190].mxu1 %vm218_vm1, %v15034_v6 }
0x1ce0   :  { %19072 = vmatmul.mubr.msk.f32.vlgmr.msra.gmra.mrb[190].mxu0 %vm218_vm1, %v15033_v16  ;;  %19086 = vmatprep.mubr.msk.f32.mxu1 %vm19968_vm0, %v19967_v4  ;;  %v16245_v16 = vrot.slane %v22214_v0, %v20035_v8  ;;  %v12552_v8 = vld [vmem:[%s16514_s3 + $0x8] sm:$0xff] }
0x1ce1   :  { %19081 = vmatprep.mubr.msk.f32.mxu0 %vm19968_vm0, %v19967_v4  ;;  %19080 = vmatpush3.msk.msra.mxu0 %vm3576_vm5, %v12543_v21 }
0x1ce2   :  { %19085 = vmatpush3.msk.msra.mxu1 %vm3576_vm5, %v12544_v19  ;;  %19089 = vmatprep.subr.mxu0 %v19967_v4 }
0x1ce3   :  { %19094 = vmatprep.subr.mxu1 %v19967_v4 }
0x1d9a   :  { %v15177_v60 = vpop.f32.mrb[184].mxu1 }
0x1d9b   :  { %v15104_v14 = vpop.f32.mrb[184].mxu0  ;;  %v19048_v2 = vpop.f32.mrb[185].mxu1  ;;  %19087 = vmatmul.mubr.msk.f32.vlgmr.msra.gmra.mrb[192].mxu1 %vm2292_vm4, %v15177_v60 }
0x1d9c   :  { %v19043_v18 = vpop.f32.mrb[185].mxu0  ;;  %19082 = vmatmul.mubr.msk.f32.vlgmr.msra.gmra.mrb[192].mxu0 %vm2292_vm4, %v15104_v14  ;;  %19095 = vmatpush3.msk.msra.mxu1 %vm3576_vm5, %v12546_v11 }
0x1d9d   :  { %19090 = vmatpush3.msk.msra.mxu0 %vm3576_vm5, %v12545_v38  ;;  %19091 = vmatprep.mubr.msk.f32.mxu0 %vm19968_vm0, %v19967_v4  ;;  %v12551_v18 = vld [vmem:[%s16514_s3] sm:$0xff] }
0x1d9e   :  { %19096 = vmatprep.mubr.msk.f32.mxu1 %vm19968_vm0, %v19967_v4  ;;  %19099 = vmatprep.subr.mxu0 %v19967_v4 }
0x1d9f   :  { %19104 = vmatprep.subr.mxu1 %v19967_v4 }
0x1da2   :  { %v15323_v26 = vpop.f32.mrb[186].mxu1 }
0x1da3   :  { %v15250_v24 = vpop.f32.mrb[186].mxu0  ;;  %v19058_v20 = vpop.f32.mrb[187].mxu1  ;;  %19097 = vmatmul.mubr.msk.f32.vlgmr.msra.gmra.mrb[194].mxu1 %vm2292_vm4, %v15323_v26  ;;  %v12553_v26 = vld [vmem:[%s16514_s3 + $0x10] sm:$0xff] }
0x1da4   :  { %v19053_v27 = vpop.f32.mrb[187].mxu0  ;;  %19092 = vmatmul.mubr.msk.f32.vlgmr.msra.gmra.mrb[194].mxu0 %vm2292_vm4, %v15250_v24  ;;  %19105 = vmatpush3.msk.msra.mxu1 %vm3576_vm5, %v12548_v25  ;;  %v19757_v25 = vpack.c.bf16 %v12552_v8, %v12551_v18  ;;  %v12555_v24 = vld [vmem:[%s16515_s7] sm:$0xff]  ;;  %v12556_v20 = vld [vmem:[%s16515_s7 + $0x8] sm:$0xff] }
0x1da5   :  { %19100 = vmatpush3.msk.msra.mxu0 %vm3576_vm5, %v12547_v23  ;;  %19101 = vmatprep.mubr.msk.f32.mxu0 %vm19968_vm0, %v19967_v4  ;;  %v12554_v23 = vld [vmem:[%s16514_s3 + $0x18] sm:$0xff]  ;;  %v19763_v27 = vpack.c.bf16 %v12556_v20, %v12555_v24 }
0x1da6   :  { %19106 = vmatprep.mubr.msk.f32.mxu1 %vm19968_vm0, %v19967_v4  ;;  %19109 = vmatprep.subr.mxu0 %v19967_v4 }
0x1da7   :  { %19114 = vmatprep.subr.mxu1 %v19967_v4 }
0x1daa   :  { %v15469_v17 = vpop.f32.mrb[188].mxu1 }
0x1dab   :  { %v15396_v29 = vpop.f32.mrb[188].mxu0  ;;  %v19068_v30 = vpop.f32.mrb[189].mxu1  ;;  %19107 = vmatmul.mubr.msk.f32.vlgmr.msra.gmra.mrb[196].mxu1 %vm2292_vm4, %v15469_v17 }
0x1dac   :  { %v19063_v35 = vpop.f32.mrb[189].mxu0  ;;  %19102 = vmatmul.mubr.msk.f32.vlgmr.msra.gmra.mrb[196].mxu0 %vm2292_vm4, %v15396_v29  ;;  %19115 = vmatpush3.msk.msra.mxu1 %vm3576_vm5, %v12550_v36 }
0x1dad   :  { %19110 = vmatpush3.msk.msra.mxu0 %vm3576_vm5, %v12549_v13  ;;  %19111 = vmatprep.mubr.msk.f32.mxu0 %vm19968_vm0, %v19967_v4 }
0x1dae   :  { %19116 = vmatprep.mubr.msk.f32.mxu1 %vm19968_vm0, %v19967_v4  ;;  %19756 = vmatprep.subr.bf16.mxu0 %v19972_v32 }
0x1daf   :  { %19762 = vmatprep.subr.bf16.mxu1 %v19972_v32 }
0x1db2   :  { %v15615_v47 = vpop.f32.mrb[190].mxu1 }
0x1db3   :  { %v15542_v31 = vpop.f32.mrb[190].mxu0  ;;  %v19078_v39 = vpop.f32.mrb[191].mxu1  ;;  %19117 = vmatmul.mubr.msk.f32.vlgmr.msra.gmra.mrb[198].mxu1 %vm2292_vm4, %v15615_v47 }
0x1db4   :  { %v19073_v57 = vpop.f32.mrb[191].mxu0  ;;  %19112 = vmatmul.mubr.msk.f32.vlgmr.msra.gmra.mrb[198].mxu0 %vm2292_vm4, %v15542_v31  ;;  %19138 = vmatprep.mubr.msk.f32.mxu1 %vm19968_vm0, %v19967_v4  ;;  %v16266_v39 = vrot.slane %v22214_v0, %v20038_v9 }
0x1db5   :  { %19127 = vmatprep.mubr.msk.f32.mxu0 %vm19968_vm0, %v19967_v4  ;;  %19758 = vmatpush3.bf16.msra.mxu0 %v19757_v25 }
0x1db6   :  { %19759 = vmatprep.subr.bf16.mxu0 %v19972_v32  ;;  %19764 = vmatpush3.bf16.msra.mxu1 %v19763_v27 }
0x1db7   :  { %19765 = vmatprep.subr.bf16.mxu1 %v19972_v32  ;;  %v12557_v32 = vld [vmem:[%s16515_s7 + $0x10] sm:$0xff] }
0x1e6e   :  { %v15767_v43 = vpop.f32.mrb[192].mxu1 }
0x1e6f   :  { %v15691_v40 = vpop.f32.mrb[192].mxu0  ;;  %v16228_v41 = vsel %vm544_vm3, %v15767_v43, 0.0  ;;  %v19088_v33 = vpop.f32.mrb[193].mxu1 }
0x1e70   :  { %v16227_v42 = vsel %vm544_vm3, %v15691_v40, 0.0  ;;  %v19083_v51 = vpop.f32.mrb[193].mxu0  ;;  %v16271_v40 = vrot.slane %v22214_v0, %v20041_v10  ;;  %v16354_v10 = vrot.slane %v22214_v0, %v20608_v28 }
0x1e71   :  { %v16229_v37 = vadd.f32 %v16228_v41, %v16227_v42  ;;  %v12558_v42 = vld [vmem:[%s16515_s7 + $0x18] sm:$0xff] }
0x1e72   :  { %v19766_v51 = vpack.c.bf16 %v12558_v42, %v12557_v32 }
0x1e74   :  { %19767 = vmatpush3.bf16.msra.mxu1 %v19766_v51 }
0x1e76   :  { %v15919_v46 = vpop.f32.mrb[194].mxu1 }
0x1e77   :  { %v15843_v50 = vpop.f32.mrb[194].mxu0  ;;  %v19098_v54 = vpop.f32.mrb[195].mxu1  ;;  %v16232_v48 = vsel %vm544_vm3, %v15919_v46, 0.0 }
0x1e78   :  { %v16230_v49 = vsel %vm544_vm3, %v15843_v50, 0.0  ;;  %v19093_v56 = vpop.f32.mrb[195].mxu0 }
0x1e79   :  { %v16231_v53 = vadd.f32 %v16230_v49, %v16229_v37  ;;  %v16276_v37 = vrot.slane %v22214_v0, %v20600_v22  ;;  %v88_v22 = vstv %s16518_s11 }
0x1e7a   :  { %89 = vst [vmem:[#allocation2] sm:$0x1] %v88_v22 }
0x1e7b   :  { %v16233_v44 = vadd.f32 %v16232_v48, %v16231_v53 }
0x1e7e   :  { %v16071_v4 = vpop.f32.mrb[196].mxu1 }
0x1e7f   :  { %v15995_v59 = vpop.f32.mrb[196].mxu0  ;;  %v19108_v45 = vpop.f32.mrb[197].mxu1  ;;  %v16236_v58 = vsel %vm544_vm3, %v16071_v4, 0.0 }
0x1e80   :  { %v16234_v34 = vsel %vm544_vm3, %v15995_v59, 0.0  ;;  %v19103_v3 = vpop.f32.mrb[197].mxu0 }
0x1e81   :  { %v16235_v1 = vadd.f32 %v16234_v34, %v16233_v44 }
0x1e83   :  { %v16237_v5 = vadd.f32 %v16236_v58, %v16235_v1 }
0x1e86   :  { %v16223_v62 = vpop.f32.mrb[198].mxu1 }
0x1e87   :  { %v16147_v63 = vpop.f32.mrb[198].mxu0  ;;  %v19118_v12 = vpop.f32.mrb[199].mxu1  ;;  %v16240_v21 = vsel %vm544_vm3, %v16223_v62, 0.0 }
0x1e88   :  { %v16238_v7 = vsel %vm544_vm3, %v16147_v63, 0.0  ;;  %v19113_v61 = vpop.f32.mrb[199].mxu0  ;;  %v16447_v63 = vrot.slane %v22214_v0, %v20632_v55 }
0x1e89   :  { %v16239_v6 = vadd.f32 %v16238_v7, %v16237_v5  ;;  %v16452_v61 = vrot.slane %v22214_v0, %v20635_v52 }
0x1e8b   :  { %v16241_v19 = vadd.f32 %v16240_v21, %v16239_v6 }
0x1e8d   :  { %v16246_v11 = vadd.f32 %v16245_v16, %v16241_v19  ;;  %v16786_v16 = vld [vmem:[%s16517_s15] ss:$0 sm:$0xff] }
0x1e8f   :  { %v16247_v60 = vadd.f32 %v16246_v11, %v21732_v15  ;;  %v19760_v15 = vpack.c.bf16 %v12554_v23, %v12553_v26 }
0x1e91   :  { %v16248_v38 = vsel %vm544_vm3, %v16247_v60, 0.0  ;;  %v16251_v14 = vmul.f32 %v16247_v60, %v16247_v60  ;;  %19761 = vmatpush3.bf16.msra.mxu0 %v19760_v15 }
0x1e92   :  { %16249 = vadd.xlane.f32.xlu1 %v16248_v38 }
0x1e93   :  { %v16252_v2 = vsel %vm544_vm3, %v16251_v14, 0.0 }
0x1e94   :  { %16253 = vadd.xlane.f32.xlu0 %v16252_v2 }
0x1f1f   :  { %v16250_v36 = vpop.xlane.xlu1 %16249 }
0x1f20   :  { %v16255_v17 = vmul.f32 0.03125, %v16250_v36 }
0x1f21   :  { %v16254_v13 = vpop.xlane.xlu0 %16253 }
0x1f22   :  { %v16257_v29 = vmul.f32 %v16255_v17, %v16255_v17  ;;  %v16256_v30 = vmul.f32 0.03125, %v16254_v13  ;;  %v16259_v31 = vsub.f32 %v16247_v60, %v16255_v17  ;;  %v16787_v60 = vld [vmem:[#allocation2] ss:$0 sm:$0xff] }
0x1f24   :  { %v16258_v35 = vsub.f32 %v16256_v30, %v16257_v29 }
0x1f26   :  { %v16260_v47 = vadd.f32 1e-05, %v16258_v35 }
0x1f28   :  { %19959 = vrsqrt.f32 %v16260_v47 }
0x1f32   :  { %v19960_v57 = vpop.eup %19959 }
0x1f33   :  { %v16262_v43 = vmul.f32 %v19960_v57, %v16259_v31 }
0x1f35   :  { %v16267_v41 = vmul.f32 %v16266_v39, %v16262_v43 }
0x1f37   :  { %v16272_v33 = vadd.f32 %v16271_v40, %v16267_v41 }
0x1f39   :  { %19128 = vmatmul.mubr.msk.f32.vlgmr.msra.gmra.mrb[200].mxu0 %vm544_vm3, %v16272_v33 }
0x200c   :  { %v16346_v46 = vpop.f32.mrb[200].mxu0 }
0x200d   :  { %v16347_v50 = vadd.f32 %v16346_v46, %v16276_v37  ;;  %v19129_v54 = vpop.f32.mrb[201].mxu0 }
0x200f   :  { %v16350_v9 = vmax.f32 %v16347_v50, 0.0 }
0x2011   :  { %19139 = vmatmul.mubr.msk.f32.vlgmr.msra.gmra.mrb[200].mxu1 %vm544_vm3, %v16350_v9 }
0x20e4   :  { %v16424_v49 = vpop.f32.mrb[200].mxu1 }
0x20e5   :  { %v16425_v56 = vadd.f32 %v16424_v49, %v16354_v10  ;;  %v19140_v53 = vpop.f32.mrb[201].mxu1 }
0x20e7   :  { %v16428_v48 = vadd.f32 %v16425_v56, %v16272_v33 }
0x20e9   :  { %v16429_v44 = vsel %vm544_vm3, %v16428_v48, 0.0  ;;  %v16432_v4 = vmul.f32 %v16428_v48, %v16428_v48 }
0x20ea   :  { %16430 = vadd.xlane.f32.xlu1 %v16429_v44 }
0x20eb   :  { %v16433_v59 = vsel %vm544_vm3, %v16432_v4, 0.0 }
0x20ec   :  { %16434 = vadd.xlane.f32.xlu0 %v16433_v59 }
0x2177   :  { %v16431_v45 = vpop.xlane.xlu1 %16430 }
0x2178   :  { %v16436_v28 = vmul.f32 0.03125, %v16431_v45 }
0x2179   :  { %v16435_v34 = vpop.xlane.xlu0 %16434 }
0x217a   :  { %v16438_v3 = vmul.f32 %v16436_v28, %v16436_v28  ;;  %v16437_v1 = vmul.f32 0.03125, %v16435_v34  ;;  %v16440_v62 = vsub.f32 %v16428_v48, %v16436_v28 }
0x217c   :  { %v16439_v58 = vsub.f32 %v16437_v1, %v16438_v3 }
0x217e   :  { %v16441_v5 = vadd.f32 1e-05, %v16439_v58 }
0x2180   :  { %19961 = vrsqrt.f32 %v16441_v5 }
0x218a   :  { %v19962_v12 = vpop.eup %19961 }
0x218b   :  { %v16443_v7 = vmul.f32 %v19962_v12, %v16440_v62 }
0x218d   :  { %v16448_v6 = vmul.f32 %v16447_v63, %v16443_v7 }
0x218f   :  { %v16453_v21 = vadd.f32 %v16452_v61, %v16448_v6 }
0x2191   :  { %v16462_v19 = vmul.f32 %v16786_v16, %v16453_v21 }
0x2193   :  { %v16463_v11 = vsel %vm544_vm3, %v16462_v19, 0.0 }
0x2194   :  { %16464 = vadd.xlane.f32.xlu1 %v16463_v11 }
0x2221   :  { %v16465_v55 = vpop.xlane.xlu1 %16464 }
0x2222   :  { %v16472_v38 = vadd.f32 %v16787_v60, %v16465_v55 }
0x2224   :  { %16474 = vst.msk [vmem:[%s16519_s19] sm:$0xff] %vm16473_vm6, %v16472_v38 }

</bundles_post_ra>
